<compile_context>
chip_gen: v5e
topology: v5e:2x2
jax: 0.10.0
libtpu: 0.0.40
codegen_flags: <defaults>
</compile_context>

<pallas_src>
import functools
import math

import jax
import jax.numpy as jnp
from jax.experimental import pallas as pl
from jax.experimental.pallas import tpu as pltpu


# ----------------------------------------------------------------------------
# Fused forward kernel
# ----------------------------------------------------------------------------
def _fused_kernel(*refs, T, B, gru_relu, hidden_sizes, n_lin, activ):
    """Entire ClassifierGRU forward in one kernel invocation.

    refs layout (all resident in VMEM, whole arrays):
      [x_flat (T*B, Din)]
      per GRU layer: w_ih (Din, 3H), w_hh (H, 3H), b_x (1, 3H), b_hn (1, H)
      per linear   : w_t (Din, Dout), b (1, Dout)
      [o_ref (B, Dout_last)]
    Gate order along the 3H lane dim follows PyTorch nn.GRU: [r, z, n].
    """
    idx = 0
    seq = refs[idx][...]                      # (T*B, Din), time-major flattened
    idx += 1

    n_gru = len(hidden_sizes)
    h_last = None
    for li in range(n_gru):
        w_ih = refs[idx][...]                 # (Din, 3H)
        w_hh = refs[idx + 1][...]             # (H, 3H)
        b_x = refs[idx + 2][...]              # (1, 3H)  (r/z biases pre-folded)
        b_hn = refs[idx + 3][...]             # (1, H)
        idx += 4
        H = hidden_sizes[li]
        last_layer = li == n_gru - 1

        # Input projection for ALL timesteps at once (no recurrent dependency).
        gx = jnp.dot(seq, w_ih, preferred_element_type=jnp.float32) + b_x

        h = jnp.zeros((B, H), jnp.float32)
        outs = []
        for t in range(T):                    # static, tiny trip count -> unroll
            gx_t = gx[t * B:(t + 1) * B, :]   # (B, 3H) static slice
            gh = jnp.dot(h, w_hh, preferred_element_type=jnp.float32)
            r = jax.nn.sigmoid(gx_t[:, 0:H] + gh[:, 0:H])
            z = jax.nn.sigmoid(gx_t[:, H:2 * H] + gh[:, H:2 * H])
            n = jnp.tanh(gx_t[:, 2 * H:3 * H] + r * (gh[:, 2 * H:3 * H] + b_hn))
            h = (1.0 - z) * n + z * h         # recurrent carry: never relu'd
            if not last_layer:
                outs.append(h)

        if last_layer:
            # Only the final timestep is needed downstream (h[:, -1, :]).
            h_last = jnp.maximum(h, 0.0) if gru_relu[li] else h
        else:
            seq = jnp.concatenate(outs, axis=0)          # (T*B, H), time-major
            if gru_relu[li]:                              # ReLU after the GRU
                seq = jnp.maximum(seq, 0.0)               # *module* output only

    # F.dropout(training=False) is the identity at inference.
    y = h_last
    for _ in range(n_lin):
        w_t = refs[idx][...]
        b = refs[idx + 1][...]
        idx += 2
        y = jnp.dot(y, w_t, preferred_element_type=jnp.float32) + b
        if activ:                 # PyTorch module applies ReLU after EVERY linear
            y = jnp.maximum(y, 0.0)

    o_ref = refs[idx]
    o_ref[...] = y.astype(o_ref.dtype)


# ----------------------------------------------------------------------------
# Parameter init (deterministic, PyTorch-style uniform(-1/sqrt(fan), 1/sqrt(fan)))
# laid out the way the fused kernel wants it.
# ----------------------------------------------------------------------------
def init_gru_layer_params(key, din, h):
    k1, k2, k3, k4 = jax.random.split(key, 4)
    s = 1.0 / math.sqrt(h)
    # PyTorch layout: weight_ih (3H, Din), weight_hh (3H, H), gates [r, z, n].
    w_ih = jax.random.uniform(k1, (3, h, din), jnp.float32, -s, s)
    w_hh = jax.random.uniform(k2, (3, h, h), jnp.float32, -s, s)
    b_ih = jax.random.uniform(k3, (3, h), jnp.float32, -s, s)
    b_hh = jax.random.uniform(k4, (3, h), jnp.float32, -s, s)
    # Kernel layout: gate-concatenated along the lane (last) dim.
    w_ih_cat = jnp.concatenate([w_ih[g].T for g in range(3)], axis=1)  # (Din, 3H)
    w_hh_cat = jnp.concatenate([w_hh[g].T for g in range(3)], axis=1)  # (H, 3H)
    # r/z biases folded; b_hn stays separate (inside r * (h@W_hn + b_hn)).
    b_x = jnp.concatenate(
        [b_ih[0] + b_hh[0], b_ih[1] + b_hh[1], b_ih[2]]).reshape(1, 3 * h)
    b_hn = b_hh[2].reshape(1, h)
    return (w_ih_cat, w_hh_cat, b_x, b_hn)


def init_linear_params(key, din, dout):
    k1, k2 = jax.random.split(key)
    s = 1.0 / math.sqrt(din)
    w = jax.random.uniform(k1, (dout, din), jnp.float32, -s, s)  # PyTorch (out,in)
    b = jax.random.uniform(k2, (dout,), jnp.float32, -s, s)
    return (jnp.transpose(w), b.reshape(1, dout))                # kernel wants W^T


# ----------------------------------------------------------------------------
# ClassifierGRU config + forward
# ----------------------------------------------------------------------------
class Cfg:
    num_rnn = 2
    rnn_io = [[32, 32], [32, 32]]
    num_layers = [1, 2]
    num_linear = 2
    linear_io = [[32, 32], [32, 16]]
    activ = True
    dropout = True


def init_classifier_gru(cfg, key):
    gru_layers, gru_relu, hidden = [], [], []
    for i in range(cfg.num_rnn):
        din, h = cfg.rnn_io[i]
        for li in range(cfg.num_layers[i]):
            key, sub = jax.random.split(key)
            gru_layers.append(init_gru_layer_params(sub, din if li == 0 else h, h))
            hidden.append(h)
            # ReLU only after the full nn.GRU module (its last stacked layer).
            gru_relu.append(bool(cfg.activ) and li == cfg.num_layers[i] - 1)
    lin_layers = []
    for i in range(cfg.num_linear):
        key, sub = jax.random.split(key)
        lin_layers.append(init_linear_params(sub, *cfg.linear_io[i]))
    return {"gru": gru_layers, "gru_relu": tuple(gru_relu),
            "hidden": tuple(hidden), "lin": lin_layers}


def classifier_gru_forward(cfg, params, input_seqs, training=False):
    """input_seqs: (B, T, D) batch-first, matching the PyTorch module."""
    x = input_seqs.astype(jnp.float32)
    B, T, D = x.shape
    x_flat = jnp.transpose(x, (1, 0, 2)).reshape(T * B, D)  # time-major, flat

    flat = [x_flat]
    for p in params["gru"]:
        flat.extend(p)
    for p in params["lin"]:
        flat.extend(p)

    out_dim = params["lin"][-1][0].shape[1]
    # TODO(synk): training-mode dropout omitted — F.dropout(training=False) is identity.
    kernel = functools.partial(
        _fused_kernel, T=T, B=B,
        gru_relu=params["gru_relu"], hidden_sizes=params["hidden"],
        n_lin=len(params["lin"]), activ=bool(cfg.activ))

    vmem_spec = pl.BlockSpec(memory_space=pltpu.MemorySpace.VMEM)
    return pl.pallas_call(
        kernel,
        out_shape=jax.ShapeDtypeStruct((B, out_dim), jnp.float32),
        in_specs=[vmem_spec] * len(flat),
        out_specs=vmem_spec,
    )(*flat)


# ----------------------------------------------------------------------------
# Pure-JAX reference (same param layout) for a correctness check.
# ----------------------------------------------------------------------------
def classifier_gru_reference(cfg, params, input_seqs):
    hp = jax.lax.Precision.HIGHEST
    x = input_seqs.astype(jnp.float32)
    B, T, D = x.shape
    seq = jnp.transpose(x, (1, 0, 2))                       # (T, B, D)
    for (w_ih, w_hh, b_x, b_hn), relu, H in zip(
            params["gru"], params["gru_relu"], params["hidden"]):
        h = jnp.zeros((B, H), jnp.float32)
        outs = []
        for t in range(T):
            gx = jnp.dot(seq[t], w_ih, precision=hp) + b_x
            gh = jnp.dot(h, w_hh, precision=hp)
            r = jax.nn.sigmoid(gx[:, :H] + gh[:, :H])
            z = jax.nn.sigmoid(gx[:, H:2 * H] + gh[:, H:2 * H])
            n = jnp.tanh(gx[:, 2 * H:] + r * (gh[:, 2 * H:] + b_hn))
            h = (1.0 - z) * n + z * h
            outs.append(h)
        seq = jnp.stack(outs, axis=0)
        if relu:
            seq = jnp.maximum(seq, 0.0)
    y = seq[-1]
    for (w_t, b) in params["lin"]:
        y = jnp.dot(y, w_t, precision=hp) + b
        if cfg.activ:
            y = jnp.maximum(y, 0.0)
    return y


if __name__ == "__main__":
    cfg = Cfg()
    key = jax.random.PRNGKey(0)
    pkey, xkey = jax.random.split(key)

    params = init_classifier_gru(cfg, pkey)

    B, T, D = 2, 8, 32
    x = jax.random.normal(xkey, (B, T, D), jnp.float32)

    out = classifier_gru_forward(cfg, params, x, training=False)
    out = jax.block_until_ready(out)
    assert out.shape == (B, cfg.linear_io[-1][1]), out.shape
    assert bool(jnp.all(jnp.isfinite(out)))

    ref = classifier_gru_reference(cfg, params, x)
    assert jnp.allclose(out, ref, rtol=2e-3, atol=2e-3), (out, ref)

    print("KERNEL_OK")
</pallas_src>

<mosaic_0001>
module attributes {stable_mosaic.version = 11 : i64} {
  func.func @_fused_kernel(%arg0: memref<16x32xf32, #tpu.memory_space<vmem>>, %arg1: memref<32x96xf32, #tpu.memory_space<vmem>>, %arg2: memref<32x96xf32, #tpu.memory_space<vmem>>, %arg3: memref<1x96xf32, #tpu.memory_space<vmem>>, %arg4: memref<1x32xf32, #tpu.memory_space<vmem>>, %arg5: memref<32x96xf32, #tpu.memory_space<vmem>>, %arg6: memref<32x96xf32, #tpu.memory_space<vmem>>, %arg7: memref<1x96xf32, #tpu.memory_space<vmem>>, %arg8: memref<1x32xf32, #tpu.memory_space<vmem>>, %arg9: memref<32x96xf32, #tpu.memory_space<vmem>>, %arg10: memref<32x96xf32, #tpu.memory_space<vmem>>, %arg11: memref<1x96xf32, #tpu.memory_space<vmem>>, %arg12: memref<1x32xf32, #tpu.memory_space<vmem>>, %arg13: memref<32x32xf32, #tpu.memory_space<vmem>>, %arg14: memref<1x32xf32, #tpu.memory_space<vmem>>, %arg15: memref<32x16xf32, #tpu.memory_space<vmem>>, %arg16: memref<1x16xf32, #tpu.memory_space<vmem>>, %arg17: memref<2x16xf32, #tpu.memory_space<vmem>>) attributes {dimension_semantics = [], scalar_prefetch = 0 : i64, scratch_operands = 0 : i64, tpu.core_type = #tpu.core_type<tc>} {
    %c0 = arith.constant 0 : index
    %c0_0 = arith.constant 0 : index
    %0 = vector.load %arg0[%c0, %c0_0] : memref<16x32xf32, #tpu.memory_space<vmem>>, vector<16x32xf32>
    %c0_1 = arith.constant 0 : index
    %c0_2 = arith.constant 0 : index
    %1 = vector.load %arg1[%c0_1, %c0_2] : memref<32x96xf32, #tpu.memory_space<vmem>>, vector<32x96xf32>
    %c0_3 = arith.constant 0 : index
    %c0_4 = arith.constant 0 : index
    %2 = vector.load %arg2[%c0_3, %c0_4] : memref<32x96xf32, #tpu.memory_space<vmem>>, vector<32x96xf32>
    %c0_5 = arith.constant 0 : index
    %c0_6 = arith.constant 0 : index
    %3 = vector.load %arg3[%c0_5, %c0_6] : memref<1x96xf32, #tpu.memory_space<vmem>>, vector<1x96xf32>
    %c0_7 = arith.constant 0 : index
    %c0_8 = arith.constant 0 : index
    %4 = vector.load %arg4[%c0_7, %c0_8] : memref<1x32xf32, #tpu.memory_space<vmem>>, vector<1x32xf32>
    %cst = arith.constant dense<0.000000e+00> : vector<16x96xf32>
    %5 = tpu.matmul %0, %1, %cst {dimension_numbers = #tpu.dot_dimension_numbers<[1], [0], [0], [1], [0, 0, 1, 1], [], []>} : vector<16x32xf32>, vector<32x96xf32>, vector<16x96xf32> -> vector<16x96xf32>
    %6 = vector.broadcast %3 : vector<1x96xf32> to vector<16x96xf32>
    %7 = arith.addf %5, %6 : vector<16x96xf32>
    %cst_9 = arith.constant 0.000000e+00 : f32
    %8 = vector.broadcast %cst_9 : f32 to vector<2x32xf32>
    %9 = vector.extract_strided_slice %7 {offsets = [0, 0], sizes = [2, 96], strides = [1, 1]} : vector<16x96xf32> to vector<2x96xf32>
    %cst_10 = arith.constant dense<0.000000e+00> : vector<2x96xf32>
    %10 = tpu.matmul %8, %2, %cst_10 {dimension_numbers = #tpu.dot_dimension_numbers<[1], [0], [0], [1], [0, 0, 1, 1], [], []>} : vector<2x32xf32>, vector<32x96xf32>, vector<2x96xf32> -> vector<2x96xf32>
    %11 = vector.extract_strided_slice %9 {offsets = [0, 0], sizes = [2, 32], strides = [1, 1]} : vector<2x96xf32> to vector<2x32xf32>
    %12 = vector.extract_strided_slice %10 {offsets = [0, 0], sizes = [2, 32], strides = [1, 1]} : vector<2x96xf32> to vector<2x32xf32>
    %13 = arith.addf %11, %12 : vector<2x32xf32>
    %14 = arith.negf %13 : vector<2x32xf32>
    %15 = math.exp %14 : vector<2x32xf32>
    %cst_11 = arith.constant 1.000000e+00 : f32
    %16 = vector.broadcast %cst_11 : f32 to vector<2x32xf32>
    %17 = arith.addf %16, %15 : vector<2x32xf32>
    %18 = arith.divf %16, %17 : vector<2x32xf32>
    %19 = vector.extract_strided_slice %9 {offsets = [0, 32], sizes = [2, 32], strides = [1, 1]} : vector<2x96xf32> to vector<2x32xf32>
    %20 = vector.extract_strided_slice %10 {offsets = [0, 32], sizes = [2, 32], strides = [1, 1]} : vector<2x96xf32> to vector<2x32xf32>
    %21 = arith.addf %19, %20 : vector<2x32xf32>
    %22 = arith.negf %21 : vector<2x32xf32>
    %23 = math.exp %22 : vector<2x32xf32>
    %cst_12 = arith.constant 1.000000e+00 : f32
    %24 = vector.broadcast %cst_12 : f32 to vector<2x32xf32>
    %25 = arith.addf %24, %23 : vector<2x32xf32>
    %26 = arith.divf %24, %25 : vector<2x32xf32>
    %27 = vector.extract_strided_slice %9 {offsets = [0, 64], sizes = [2, 32], strides = [1, 1]} : vector<2x96xf32> to vector<2x32xf32>
    %28 = vector.extract_strided_slice %10 {offsets = [0, 64], sizes = [2, 32], strides = [1, 1]} : vector<2x96xf32> to vector<2x32xf32>
    %29 = vector.broadcast %4 : vector<1x32xf32> to vector<2x32xf32>
    %30 = arith.addf %28, %29 : vector<2x32xf32>
    %31 = arith.mulf %18, %30 : vector<2x32xf32>
    %32 = arith.addf %27, %31 : vector<2x32xf32>
    %33 = math.tanh %32 : vector<2x32xf32>
    %cst_13 = arith.constant 1.000000e+00 : f32
    %34 = vector.broadcast %cst_13 : f32 to vector<2x32xf32>
    %35 = arith.subf %34, %26 : vector<2x32xf32>
    %36 = arith.mulf %35, %33 : vector<2x32xf32>
    %37 = arith.mulf %26, %8 : vector<2x32xf32>
    %38 = arith.addf %36, %37 : vector<2x32xf32>
    %39 = vector.extract_strided_slice %7 {offsets = [2, 0], sizes = [2, 96], strides = [1, 1]} : vector<16x96xf32> to vector<2x96xf32>
    %cst_14 = arith.constant dense<0.000000e+00> : vector<2x96xf32>
    %40 = tpu.matmul %38, %2, %cst_14 {dimension_numbers = #tpu.dot_dimension_numbers<[1], [0], [0], [1], [0, 0, 1, 1], [], []>} : vector<2x32xf32>, vector<32x96xf32>, vector<2x96xf32> -> vector<2x96xf32>
    %41 = vector.extract_strided_slice %39 {offsets = [0, 0], sizes = [2, 32], strides = [1, 1]} : vector<2x96xf32> to vector<2x32xf32>
    %42 = vector.extract_strided_slice %40 {offsets = [0, 0], sizes = [2, 32], strides = [1, 1]} : vector<2x96xf32> to vector<2x32xf32>
    %43 = arith.addf %41, %42 : vector<2x32xf32>
    %44 = arith.negf %43 : vector<2x32xf32>
    %45 = math.exp %44 : vector<2x32xf32>
    %cst_15 = arith.constant 1.000000e+00 : f32
    %46 = vector.broadcast %cst_15 : f32 to vector<2x32xf32>
    %47 = arith.addf %46, %45 : vector<2x32xf32>
    %48 = arith.divf %46, %47 : vector<2x32xf32>
    %49 = vector.extract_strided_slice %39 {offsets = [0, 32], sizes = [2, 32], strides = [1, 1]} : vector<2x96xf32> to vector<2x32xf32>
    %50 = vector.extract_strided_slice %40 {offsets = [0, 32], sizes = [2, 32], strides = [1, 1]} : vector<2x96xf32> to vector<2x32xf32>
    %51 = arith.addf %49, %50 : vector<2x32xf32>
    %52 = arith.negf %51 : vector<2x32xf32>
    %53 = math.exp %52 : vector<2x32xf32>
    %cst_16 = arith.constant 1.000000e+00 : f32
    %54 = vector.broadcast %cst_16 : f32 to vector<2x32xf32>
    %55 = arith.addf %54, %53 : vector<2x32xf32>
    %56 = arith.divf %54, %55 : vector<2x32xf32>
    %57 = vector.extract_strided_slice %39 {offsets = [0, 64], sizes = [2, 32], strides = [1, 1]} : vector<2x96xf32> to vector<2x32xf32>
    %58 = vector.extract_strided_slice %40 {offsets = [0, 64], sizes = [2, 32], strides = [1, 1]} : vector<2x96xf32> to vector<2x32xf32>
    %59 = vector.broadcast %4 : vector<1x32xf32> to vector<2x32xf32>
    %60 = arith.addf %58, %59 : vector<2x32xf32>
    %61 = arith.mulf %48, %60 : vector<2x32xf32>
    %62 = arith.addf %57, %61 : vector<2x32xf32>
    %63 = math.tanh %62 : vector<2x32xf32>
    %cst_17 = arith.constant 1.000000e+00 : f32
    %64 = vector.broadcast %cst_17 : f32 to vector<2x32xf32>
    %65 = arith.subf %64, %56 : vector<2x32xf32>
    %66 = arith.mulf %65, %63 : vector<2x32xf32>
    %67 = arith.mulf %56, %38 : vector<2x32xf32>
    %68 = arith.addf %66, %67 : vector<2x32xf32>
    %69 = vector.extract_strided_slice %7 {offsets = [4, 0], sizes = [2, 96], strides = [1, 1]} : vector<16x96xf32> to vector<2x96xf32>
    %cst_18 = arith.constant dense<0.000000e+00> : vector<2x96xf32>
    %70 = tpu.matmul %68, %2, %cst_18 {dimension_numbers = #tpu.dot_dimension_numbers<[1], [0], [0], [1], [0, 0, 1, 1], [], []>} : vector<2x32xf32>, vector<32x96xf32>, vector<2x96xf32> -> vector<2x96xf32>
    %71 = vector.extract_strided_slice %69 {offsets = [0, 0], sizes = [2, 32], strides = [1, 1]} : vector<2x96xf32> to vector<2x32xf32>
    %72 = vector.extract_strided_slice %70 {offsets = [0, 0], sizes = [2, 32], strides = [1, 1]} : vector<2x96xf32> to vector<2x32xf32>
    %73 = arith.addf %71, %72 : vector<2x32xf32>
    %74 = arith.negf %73 : vector<2x32xf32>
    %75 = math.exp %74 : vector<2x32xf32>
    %cst_19 = arith.constant 1.000000e+00 : f32
    %76 = vector.broadcast %cst_19 : f32 to vector<2x32xf32>
    %77 = arith.addf %76, %75 : vector<2x32xf32>
    %78 = arith.divf %76, %77 : vector<2x32xf32>
    %79 = vector.extract_strided_slice %69 {offsets = [0, 32], sizes = [2, 32], strides = [1, 1]} : vector<2x96xf32> to vector<2x32xf32>
    %80 = vector.extract_strided_slice %70 {offsets = [0, 32], sizes = [2, 32], strides = [1, 1]} : vector<2x96xf32> to vector<2x32xf32>
    %81 = arith.addf %79, %80 : vector<2x32xf32>
    %82 = arith.negf %81 : vector<2x32xf32>
    %83 = math.exp %82 : vector<2x32xf32>
    %cst_20 = arith.constant 1.000000e+00 : f32
    %84 = vector.broadcast %cst_20 : f32 to vector<2x32xf32>
    %85 = arith.addf %84, %83 : vector<2x32xf32>
    %86 = arith.divf %84, %85 : vector<2x32xf32>
    %87 = vector.extract_strided_slice %69 {offsets = [0, 64], sizes = [2, 32], strides = [1, 1]} : vector<2x96xf32> to vector<2x32xf32>
    %88 = vector.extract_strided_slice %70 {offsets = [0, 64], sizes = [2, 32], strides = [1, 1]} : vector<2x96xf32> to vector<2x32xf32>
    %89 = vector.broadcast %4 : vector<1x32xf32> to vector<2x32xf32>
    %90 = arith.addf %88, %89 : vector<2x32xf32>
    %91 = arith.mulf %78, %90 : vector<2x32xf32>
    %92 = arith.addf %87, %91 : vector<2x32xf32>
    %93 = math.tanh %92 : vector<2x32xf32>
    %cst_21 = arith.constant 1.000000e+00 : f32
    %94 = vector.broadcast %cst_21 : f32 to vector<2x32xf32>
    %95 = arith.subf %94, %86 : vector<2x32xf32>
    %96 = arith.mulf %95, %93 : vector<2x32xf32>
    %97 = arith.mulf %86, %68 : vector<2x32xf32>
    %98 = arith.addf %96, %97 : vector<2x32xf32>
    %99 = vector.extract_strided_slice %7 {offsets = [6, 0], sizes = [2, 96], strides = [1, 1]} : vector<16x96xf32> to vector<2x96xf32>
    %cst_22 = arith.constant dense<0.000000e+00> : vector<2x96xf32>
    %100 = tpu.matmul %98, %2, %cst_22 {dimension_numbers = #tpu.dot_dimension_numbers<[1], [0], [0], [1], [0, 0, 1, 1], [], []>} : vector<2x32xf32>, vector<32x96xf32>, vector<2x96xf32> -> vector<2x96xf32>
    %101 = vector.extract_strided_slice %99 {offsets = [0, 0], sizes = [2, 32], strides = [1, 1]} : vector<2x96xf32> to vector<2x32xf32>
    %102 = vector.extract_strided_slice %100 {offsets = [0, 0], sizes = [2, 32], strides = [1, 1]} : vector<2x96xf32> to vector<2x32xf32>
    %103 = arith.addf %101, %102 : vector<2x32xf32>
    %104 = arith.negf %103 : vector<2x32xf32>
    %105 = math.exp %104 : vector<2x32xf32>
    %cst_23 = arith.constant 1.000000e+00 : f32
    %106 = vector.broadcast %cst_23 : f32 to vector<2x32xf32>
    %107 = arith.addf %106, %105 : vector<2x32xf32>
    %108 = arith.divf %106, %107 : vector<2x32xf32>
    %109 = vector.extract_strided_slice %99 {offsets = [0, 32], sizes = [2, 32], strides = [1, 1]} : vector<2x96xf32> to vector<2x32xf32>
    %110 = vector.extract_strided_slice %100 {offsets = [0, 32], sizes = [2, 32], strides = [1, 1]} : vector<2x96xf32> to vector<2x32xf32>
    %111 = arith.addf %109, %110 : vector<2x32xf32>
    %112 = arith.negf %111 : vector<2x32xf32>
    %113 = math.exp %112 : vector<2x32xf32>
    %cst_24 = arith.constant 1.000000e+00 : f32
    %114 = vector.broadcast %cst_24 : f32 to vector<2x32xf32>
    %115 = arith.addf %114, %113 : vector<2x32xf32>
    %116 = arith.divf %114, %115 : vector<2x32xf32>
    %117 = vector.extract_strided_slice %99 {offsets = [0, 64], sizes = [2, 32], strides = [1, 1]} : vector<2x96xf32> to vector<2x32xf32>
    %118 = vector.extract_strided_slice %100 {offsets = [0, 64], sizes = [2, 32], strides = [1, 1]} : vector<2x96xf32> to vector<2x32xf32>
    %119 = vector.broadcast %4 : vector<1x32xf32> to vector<2x32xf32>
    %120 = arith.addf %118, %119 : vector<2x32xf32>
    %121 = arith.mulf %108, %120 : vector<2x32xf32>
    %122 = arith.addf %117, %121 : vector<2x32xf32>
    %123 = math.tanh %122 : vector<2x32xf32>
    %cst_25 = arith.constant 1.000000e+00 : f32
    %124 = vector.broadcast %cst_25 : f32 to vector<2x32xf32>
    %125 = arith.subf %124, %116 : vector<2x32xf32>
    %126 = arith.mulf %125, %123 : vector<2x32xf32>
    %127 = arith.mulf %116, %98 : vector<2x32xf32>
    %128 = arith.addf %126, %127 : vector<2x32xf32>
    %129 = vector.extract_strided_slice %7 {offsets = [8, 0], sizes = [2, 96], strides = [1, 1]} : vector<16x96xf32> to vector<2x96xf32>
    %cst_26 = arith.constant dense<0.000000e+00> : vector<2x96xf32>
    %130 = tpu.matmul %128, %2, %cst_26 {dimension_numbers = #tpu.dot_dimension_numbers<[1], [0], [0], [1], [0, 0, 1, 1], [], []>} : vector<2x32xf32>, vector<32x96xf32>, vector<2x96xf32> -> vector<2x96xf32>
    %131 = vector.extract_strided_slice %129 {offsets = [0, 0], sizes = [2, 32], strides = [1, 1]} : vector<2x96xf32> to vector<2x32xf32>
    %132 = vector.extract_strided_slice %130 {offsets = [0, 0], sizes = [2, 32], strides = [1, 1]} : vector<2x96xf32> to vector<2x32xf32>
    %133 = arith.addf %131, %132 : vector<2x32xf32>
    %134 = arith.negf %133 : vector<2x32xf32>
    %135 = math.exp %134 : vector<2x32xf32>
    %cst_27 = arith.constant 1.000000e+00 : f32
    %136 = vector.broadcast %cst_27 : f32 to vector<2x32xf32>
    %137 = arith.addf %136, %135 : vector<2x32xf32>
    %138 = arith.divf %136, %137 : vector<2x32xf32>
    %139 = vector.extract_strided_slice %129 {offsets = [0, 32], sizes = [2, 32], strides = [1, 1]} : vector<2x96xf32> to vector<2x32xf32>
    %140 = vector.extract_strided_slice %130 {offsets = [0, 32], sizes = [2, 32], strides = [1, 1]} : vector<2x96xf32> to vector<2x32xf32>
    %141 = arith.addf %139, %140 : vector<2x32xf32>
    %142 = arith.negf %141 : vector<2x32xf32>
    %143 = math.exp %142 : vector<2x32xf32>
    %cst_28 = arith.constant 1.000000e+00 : f32
    %144 = vector.broadcast %cst_28 : f32 to vector<2x32xf32>
    %145 = arith.addf %144, %143 : vector<2x32xf32>
    %146 = arith.divf %144, %145 : vector<2x32xf32>
    %147 = vector.extract_strided_slice %129 {offsets = [0, 64], sizes = [2, 32], strides = [1, 1]} : vector<2x96xf32> to vector<2x32xf32>
    %148 = vector.extract_strided_slice %130 {offsets = [0, 64], sizes = [2, 32], strides = [1, 1]} : vector<2x96xf32> to vector<2x32xf32>
    %149 = vector.broadcast %4 : vector<1x32xf32> to vector<2x32xf32>
    %150 = arith.addf %148, %149 : vector<2x32xf32>
    %151 = arith.mulf %138, %150 : vector<2x32xf32>
    %152 = arith.addf %147, %151 : vector<2x32xf32>
    %153 = math.tanh %152 : vector<2x32xf32>
    %cst_29 = arith.constant 1.000000e+00 : f32
    %154 = vector.broadcast %cst_29 : f32 to vector<2x32xf32>
    %155 = arith.subf %154, %146 : vector<2x32xf32>
    %156 = arith.mulf %155, %153 : vector<2x32xf32>
    %157 = arith.mulf %146, %128 : vector<2x32xf32>
    %158 = arith.addf %156, %157 : vector<2x32xf32>
    %159 = vector.extract_strided_slice %7 {offsets = [10, 0], sizes = [2, 96], strides = [1, 1]} : vector<16x96xf32> to vector<2x96xf32>
    %cst_30 = arith.constant dense<0.000000e+00> : vector<2x96xf32>
    %160 = tpu.matmul %158, %2, %cst_30 {dimension_numbers = #tpu.dot_dimension_numbers<[1], [0], [0], [1], [0, 0, 1, 1], [], []>} : vector<2x32xf32>, vector<32x96xf32>, vector<2x96xf32> -> vector<2x96xf32>
    %161 = vector.extract_strided_slice %159 {offsets = [0, 0], sizes = [2, 32], strides = [1, 1]} : vector<2x96xf32> to vector<2x32xf32>
    %162 = vector.extract_strided_slice %160 {offsets = [0, 0], sizes = [2, 32], strides = [1, 1]} : vector<2x96xf32> to vector<2x32xf32>
    %163 = arith.addf %161, %162 : vector<2x32xf32>
    %164 = arith.negf %163 : vector<2x32xf32>
    %165 = math.exp %164 : vector<2x32xf32>
    %cst_31 = arith.constant 1.000000e+00 : f32
    %166 = vector.broadcast %cst_31 : f32 to vector<2x32xf32>
    %167 = arith.addf %166, %165 : vector<2x32xf32>
    %168 = arith.divf %166, %167 : vector<2x32xf32>
    %169 = vector.extract_strided_slice %159 {offsets = [0, 32], sizes = [2, 32], strides = [1, 1]} : vector<2x96xf32> to vector<2x32xf32>
    %170 = vector.extract_strided_slice %160 {offsets = [0, 32], sizes = [2, 32], strides = [1, 1]} : vector<2x96xf32> to vector<2x32xf32>
    %171 = arith.addf %169, %170 : vector<2x32xf32>
    %172 = arith.negf %171 : vector<2x32xf32>
    %173 = math.exp %172 : vector<2x32xf32>
    %cst_32 = arith.constant 1.000000e+00 : f32
    %174 = vector.broadcast %cst_32 : f32 to vector<2x32xf32>
    %175 = arith.addf %174, %173 : vector<2x32xf32>
    %176 = arith.divf %174, %175 : vector<2x32xf32>
    %177 = vector.extract_strided_slice %159 {offsets = [0, 64], sizes = [2, 32], strides = [1, 1]} : vector<2x96xf32> to vector<2x32xf32>
    %178 = vector.extract_strided_slice %160 {offsets = [0, 64], sizes = [2, 32], strides = [1, 1]} : vector<2x96xf32> to vector<2x32xf32>
    %179 = vector.broadcast %4 : vector<1x32xf32> to vector<2x32xf32>
    %180 = arith.addf %178, %179 : vector<2x32xf32>
    %181 = arith.mulf %168, %180 : vector<2x32xf32>
    %182 = arith.addf %177, %181 : vector<2x32xf32>
    %183 = math.tanh %182 : vector<2x32xf32>
    %cst_33 = arith.constant 1.000000e+00 : f32
    %184 = vector.broadcast %cst_33 : f32 to vector<2x32xf32>
    %185 = arith.subf %184, %176 : vector<2x32xf32>
    %186 = arith.mulf %185, %183 : vector<2x32xf32>
    %187 = arith.mulf %176, %158 : vector<2x32xf32>
    %188 = arith.addf %186, %187 : vector<2x32xf32>
    %189 = vector.extract_strided_slice %7 {offsets = [12, 0], sizes = [2, 96], strides = [1, 1]} : vector<16x96xf32> to vector<2x96xf32>
    %cst_34 = arith.constant dense<0.000000e+00> : vector<2x96xf32>
    %190 = tpu.matmul %188, %2, %cst_34 {dimension_numbers = #tpu.dot_dimension_numbers<[1], [0], [0], [1], [0, 0, 1, 1], [], []>} : vector<2x32xf32>, vector<32x96xf32>, vector<2x96xf32> -> vector<2x96xf32>
    %191 = vector.extract_strided_slice %189 {offsets = [0, 0], sizes = [2, 32], strides = [1, 1]} : vector<2x96xf32> to vector<2x32xf32>
    %192 = vector.extract_strided_slice %190 {offsets = [0, 0], sizes = [2, 32], strides = [1, 1]} : vector<2x96xf32> to vector<2x32xf32>
    %193 = arith.addf %191, %192 : vector<2x32xf32>
    %194 = arith.negf %193 : vector<2x32xf32>
    %195 = math.exp %194 : vector<2x32xf32>
    %cst_35 = arith.constant 1.000000e+00 : f32
    %196 = vector.broadcast %cst_35 : f32 to vector<2x32xf32>
    %197 = arith.addf %196, %195 : vector<2x32xf32>
    %198 = arith.divf %196, %197 : vector<2x32xf32>
    %199 = vector.extract_strided_slice %189 {offsets = [0, 32], sizes = [2, 32], strides = [1, 1]} : vector<2x96xf32> to vector<2x32xf32>
    %200 = vector.extract_strided_slice %190 {offsets = [0, 32], sizes = [2, 32], strides = [1, 1]} : vector<2x96xf32> to vector<2x32xf32>
    %201 = arith.addf %199, %200 : vector<2x32xf32>
    %202 = arith.negf %201 : vector<2x32xf32>
    %203 = math.exp %202 : vector<2x32xf32>
    %cst_36 = arith.constant 1.000000e+00 : f32
    %204 = vector.broadcast %cst_36 : f32 to vector<2x32xf32>
    %205 = arith.addf %204, %203 : vector<2x32xf32>
    %206 = arith.divf %204, %205 : vector<2x32xf32>
    %207 = vector.extract_strided_slice %189 {offsets = [0, 64], sizes = [2, 32], strides = [1, 1]} : vector<2x96xf32> to vector<2x32xf32>
    %208 = vector.extract_strided_slice %190 {offsets = [0, 64], sizes = [2, 32], strides = [1, 1]} : vector<2x96xf32> to vector<2x32xf32>
    %209 = vector.broadcast %4 : vector<1x32xf32> to vector<2x32xf32>
    %210 = arith.addf %208, %209 : vector<2x32xf32>
    %211 = arith.mulf %198, %210 : vector<2x32xf32>
    %212 = arith.addf %207, %211 : vector<2x32xf32>
    %213 = math.tanh %212 : vector<2x32xf32>
    %cst_37 = arith.constant 1.000000e+00 : f32
    %214 = vector.broadcast %cst_37 : f32 to vector<2x32xf32>
    %215 = arith.subf %214, %206 : vector<2x32xf32>
    %216 = arith.mulf %215, %213 : vector<2x32xf32>
    %217 = arith.mulf %206, %188 : vector<2x32xf32>
    %218 = arith.addf %216, %217 : vector<2x32xf32>
    %219 = vector.extract_strided_slice %7 {offsets = [14, 0], sizes = [2, 96], strides = [1, 1]} : vector<16x96xf32> to vector<2x96xf32>
    %cst_38 = arith.constant dense<0.000000e+00> : vector<2x96xf32>
    %220 = tpu.matmul %218, %2, %cst_38 {dimension_numbers = #tpu.dot_dimension_numbers<[1], [0], [0], [1], [0, 0, 1, 1], [], []>} : vector<2x32xf32>, vector<32x96xf32>, vector<2x96xf32> -> vector<2x96xf32>
    %221 = vector.extract_strided_slice %219 {offsets = [0, 0], sizes = [2, 32], strides = [1, 1]} : vector<2x96xf32> to vector<2x32xf32>
    %222 = vector.extract_strided_slice %220 {offsets = [0, 0], sizes = [2, 32], strides = [1, 1]} : vector<2x96xf32> to vector<2x32xf32>
    %223 = arith.addf %221, %222 : vector<2x32xf32>
    %224 = arith.negf %223 : vector<2x32xf32>
    %225 = math.exp %224 : vector<2x32xf32>
    %cst_39 = arith.constant 1.000000e+00 : f32
    %226 = vector.broadcast %cst_39 : f32 to vector<2x32xf32>
    %227 = arith.addf %226, %225 : vector<2x32xf32>
    %228 = arith.divf %226, %227 : vector<2x32xf32>
    %229 = vector.extract_strided_slice %219 {offsets = [0, 32], sizes = [2, 32], strides = [1, 1]} : vector<2x96xf32> to vector<2x32xf32>
    %230 = vector.extract_strided_slice %220 {offsets = [0, 32], sizes = [2, 32], strides = [1, 1]} : vector<2x96xf32> to vector<2x32xf32>
    %231 = arith.addf %229, %230 : vector<2x32xf32>
    %232 = arith.negf %231 : vector<2x32xf32>
    %233 = math.exp %232 : vector<2x32xf32>
    %cst_40 = arith.constant 1.000000e+00 : f32
    %234 = vector.broadcast %cst_40 : f32 to vector<2x32xf32>
    %235 = arith.addf %234, %233 : vector<2x32xf32>
    %236 = arith.divf %234, %235 : vector<2x32xf32>
    %237 = vector.extract_strided_slice %219 {offsets = [0, 64], sizes = [2, 32], strides = [1, 1]} : vector<2x96xf32> to vector<2x32xf32>
    %238 = vector.extract_strided_slice %220 {offsets = [0, 64], sizes = [2, 32], strides = [1, 1]} : vector<2x96xf32> to vector<2x32xf32>
    %239 = vector.broadcast %4 : vector<1x32xf32> to vector<2x32xf32>
    %240 = arith.addf %238, %239 : vector<2x32xf32>
    %241 = arith.mulf %228, %240 : vector<2x32xf32>
    %242 = arith.addf %237, %241 : vector<2x32xf32>
    %243 = math.tanh %242 : vector<2x32xf32>
    %cst_41 = arith.constant 1.000000e+00 : f32
    %244 = vector.broadcast %cst_41 : f32 to vector<2x32xf32>
    %245 = arith.subf %244, %236 : vector<2x32xf32>
    %246 = arith.mulf %245, %243 : vector<2x32xf32>
    %247 = arith.mulf %236, %218 : vector<2x32xf32>
    %248 = arith.addf %246, %247 : vector<2x32xf32>
    %249 = tpu.concatenate %38, %68, %98, %128, %158, %188, %218, %248 in 0 : vector<2x32xf32>, vector<2x32xf32>, vector<2x32xf32>, vector<2x32xf32>, vector<2x32xf32>, vector<2x32xf32>, vector<2x32xf32>, vector<2x32xf32> -> vector<16x32xf32>
    %cst_42 = arith.constant 0.000000e+00 : f32
    %250 = vector.broadcast %cst_42 : f32 to vector<16x32xf32>
    %251 = arith.maximumf %249, %250 : vector<16x32xf32>
    %c0_43 = arith.constant 0 : index
    %c0_44 = arith.constant 0 : index
    %252 = vector.load %arg5[%c0_43, %c0_44] : memref<32x96xf32, #tpu.memory_space<vmem>>, vector<32x96xf32>
    %c0_45 = arith.constant 0 : index
    %c0_46 = arith.constant 0 : index
    %253 = vector.load %arg6[%c0_45, %c0_46] : memref<32x96xf32, #tpu.memory_space<vmem>>, vector<32x96xf32>
    %c0_47 = arith.constant 0 : index
    %c0_48 = arith.constant 0 : index
    %254 = vector.load %arg7[%c0_47, %c0_48] : memref<1x96xf32, #tpu.memory_space<vmem>>, vector<1x96xf32>
    %c0_49 = arith.constant 0 : index
    %c0_50 = arith.constant 0 : index
    %255 = vector.load %arg8[%c0_49, %c0_50] : memref<1x32xf32, #tpu.memory_space<vmem>>, vector<1x32xf32>
    %cst_51 = arith.constant dense<0.000000e+00> : vector<16x96xf32>
    %256 = tpu.matmul %251, %252, %cst_51 {dimension_numbers = #tpu.dot_dimension_numbers<[1], [0], [0], [1], [0, 0, 1, 1], [], []>} : vector<16x32xf32>, vector<32x96xf32>, vector<16x96xf32> -> vector<16x96xf32>
    %257 = vector.broadcast %254 : vector<1x96xf32> to vector<16x96xf32>
    %258 = arith.addf %256, %257 : vector<16x96xf32>
    %cst_52 = arith.constant 0.000000e+00 : f32
    %259 = vector.broadcast %cst_52 : f32 to vector<2x32xf32>
    %260 = vector.extract_strided_slice %258 {offsets = [0, 0], sizes = [2, 96], strides = [1, 1]} : vector<16x96xf32> to vector<2x96xf32>
    %cst_53 = arith.constant dense<0.000000e+00> : vector<2x96xf32>
    %261 = tpu.matmul %259, %253, %cst_53 {dimension_numbers = #tpu.dot_dimension_numbers<[1], [0], [0], [1], [0, 0, 1, 1], [], []>} : vector<2x32xf32>, vector<32x96xf32>, vector<2x96xf32> -> vector<2x96xf32>
    %262 = vector.extract_strided_slice %260 {offsets = [0, 0], sizes = [2, 32], strides = [1, 1]} : vector<2x96xf32> to vector<2x32xf32>
    %263 = vector.extract_strided_slice %261 {offsets = [0, 0], sizes = [2, 32], strides = [1, 1]} : vector<2x96xf32> to vector<2x32xf32>
    %264 = arith.addf %262, %263 : vector<2x32xf32>
    %265 = arith.negf %264 : vector<2x32xf32>
    %266 = math.exp %265 : vector<2x32xf32>
    %cst_54 = arith.constant 1.000000e+00 : f32
    %267 = vector.broadcast %cst_54 : f32 to vector<2x32xf32>
    %268 = arith.addf %267, %266 : vector<2x32xf32>
    %269 = arith.divf %267, %268 : vector<2x32xf32>
    %270 = vector.extract_strided_slice %260 {offsets = [0, 32], sizes = [2, 32], strides = [1, 1]} : vector<2x96xf32> to vector<2x32xf32>
    %271 = vector.extract_strided_slice %261 {offsets = [0, 32], sizes = [2, 32], strides = [1, 1]} : vector<2x96xf32> to vector<2x32xf32>
    %272 = arith.addf %270, %271 : vector<2x32xf32>
    %273 = arith.negf %272 : vector<2x32xf32>
    %274 = math.exp %273 : vector<2x32xf32>
    %cst_55 = arith.constant 1.000000e+00 : f32
    %275 = vector.broadcast %cst_55 : f32 to vector<2x32xf32>
    %276 = arith.addf %275, %274 : vector<2x32xf32>
    %277 = arith.divf %275, %276 : vector<2x32xf32>
    %278 = vector.extract_strided_slice %260 {offsets = [0, 64], sizes = [2, 32], strides = [1, 1]} : vector<2x96xf32> to vector<2x32xf32>
    %279 = vector.extract_strided_slice %261 {offsets = [0, 64], sizes = [2, 32], strides = [1, 1]} : vector<2x96xf32> to vector<2x32xf32>
    %280 = vector.broadcast %255 : vector<1x32xf32> to vector<2x32xf32>
    %281 = arith.addf %279, %280 : vector<2x32xf32>
    %282 = arith.mulf %269, %281 : vector<2x32xf32>
    %283 = arith.addf %278, %282 : vector<2x32xf32>
    %284 = math.tanh %283 : vector<2x32xf32>
    %cst_56 = arith.constant 1.000000e+00 : f32
    %285 = vector.broadcast %cst_56 : f32 to vector<2x32xf32>
    %286 = arith.subf %285, %277 : vector<2x32xf32>
    %287 = arith.mulf %286, %284 : vector<2x32xf32>
    %288 = arith.mulf %277, %259 : vector<2x32xf32>
    %289 = arith.addf %287, %288 : vector<2x32xf32>
    %290 = vector.extract_strided_slice %258 {offsets = [2, 0], sizes = [2, 96], strides = [1, 1]} : vector<16x96xf32> to vector<2x96xf32>
    %cst_57 = arith.constant dense<0.000000e+00> : vector<2x96xf32>
    %291 = tpu.matmul %289, %253, %cst_57 {dimension_numbers = #tpu.dot_dimension_numbers<[1], [0], [0], [1], [0, 0, 1, 1], [], []>} : vector<2x32xf32>, vector<32x96xf32>, vector<2x96xf32> -> vector<2x96xf32>
    %292 = vector.extract_strided_slice %290 {offsets = [0, 0], sizes = [2, 32], strides = [1, 1]} : vector<2x96xf32> to vector<2x32xf32>
    %293 = vector.extract_strided_slice %291 {offsets = [0, 0], sizes = [2, 32], strides = [1, 1]} : vector<2x96xf32> to vector<2x32xf32>
    %294 = arith.addf %292, %293 : vector<2x32xf32>
    %295 = arith.negf %294 : vector<2x32xf32>
    %296 = math.exp %295 : vector<2x32xf32>
    %cst_58 = arith.constant 1.000000e+00 : f32
    %297 = vector.broadcast %cst_58 : f32 to vector<2x32xf32>
    %298 = arith.addf %297, %296 : vector<2x32xf32>
    %299 = arith.divf %297, %298 : vector<2x32xf32>
    %300 = vector.extract_strided_slice %290 {offsets = [0, 32], sizes = [2, 32], strides = [1, 1]} : vector<2x96xf32> to vector<2x32xf32>
    %301 = vector.extract_strided_slice %291 {offsets = [0, 32], sizes = [2, 32], strides = [1, 1]} : vector<2x96xf32> to vector<2x32xf32>
    %302 = arith.addf %300, %301 : vector<2x32xf32>
    %303 = arith.negf %302 : vector<2x32xf32>
    %304 = math.exp %303 : vector<2x32xf32>
    %cst_59 = arith.constant 1.000000e+00 : f32
    %305 = vector.broadcast %cst_59 : f32 to vector<2x32xf32>
    %306 = arith.addf %305, %304 : vector<2x32xf32>
    %307 = arith.divf %305, %306 : vector<2x32xf32>
    %308 = vector.extract_strided_slice %290 {offsets = [0, 64], sizes = [2, 32], strides = [1, 1]} : vector<2x96xf32> to vector<2x32xf32>
    %309 = vector.extract_strided_slice %291 {offsets = [0, 64], sizes = [2, 32], strides = [1, 1]} : vector<2x96xf32> to vector<2x32xf32>
    %310 = vector.broadcast %255 : vector<1x32xf32> to vector<2x32xf32>
    %311 = arith.addf %309, %310 : vector<2x32xf32>
    %312 = arith.mulf %299, %311 : vector<2x32xf32>
    %313 = arith.addf %308, %312 : vector<2x32xf32>
    %314 = math.tanh %313 : vector<2x32xf32>
    %cst_60 = arith.constant 1.000000e+00 : f32
    %315 = vector.broadcast %cst_60 : f32 to vector<2x32xf32>
    %316 = arith.subf %315, %307 : vector<2x32xf32>
    %317 = arith.mulf %316, %314 : vector<2x32xf32>
    %318 = arith.mulf %307, %289 : vector<2x32xf32>
    %319 = arith.addf %317, %318 : vector<2x32xf32>
    %320 = vector.extract_strided_slice %258 {offsets = [4, 0], sizes = [2, 96], strides = [1, 1]} : vector<16x96xf32> to vector<2x96xf32>
    %cst_61 = arith.constant dense<0.000000e+00> : vector<2x96xf32>
    %321 = tpu.matmul %319, %253, %cst_61 {dimension_numbers = #tpu.dot_dimension_numbers<[1], [0], [0], [1], [0, 0, 1, 1], [], []>} : vector<2x32xf32>, vector<32x96xf32>, vector<2x96xf32> -> vector<2x96xf32>
    %322 = vector.extract_strided_slice %320 {offsets = [0, 0], sizes = [2, 32], strides = [1, 1]} : vector<2x96xf32> to vector<2x32xf32>
    %323 = vector.extract_strided_slice %321 {offsets = [0, 0], sizes = [2, 32], strides = [1, 1]} : vector<2x96xf32> to vector<2x32xf32>
    %324 = arith.addf %322, %323 : vector<2x32xf32>
    %325 = arith.negf %324 : vector<2x32xf32>
    %326 = math.exp %325 : vector<2x32xf32>
    %cst_62 = arith.constant 1.000000e+00 : f32
    %327 = vector.broadcast %cst_62 : f32 to vector<2x32xf32>
    %328 = arith.addf %327, %326 : vector<2x32xf32>
    %329 = arith.divf %327, %328 : vector<2x32xf32>
    %330 = vector.extract_strided_slice %320 {offsets = [0, 32], sizes = [2, 32], strides = [1, 1]} : vector<2x96xf32> to vector<2x32xf32>
    %331 = vector.extract_strided_slice %321 {offsets = [0, 32], sizes = [2, 32], strides = [1, 1]} : vector<2x96xf32> to vector<2x32xf32>
    %332 = arith.addf %330, %331 : vector<2x32xf32>
    %333 = arith.negf %332 : vector<2x32xf32>
    %334 = math.exp %333 : vector<2x32xf32>
    %cst_63 = arith.constant 1.000000e+00 : f32
    %335 = vector.broadcast %cst_63 : f32 to vector<2x32xf32>
    %336 = arith.addf %335, %334 : vector<2x32xf32>
    %337 = arith.divf %335, %336 : vector<2x32xf32>
    %338 = vector.extract_strided_slice %320 {offsets = [0, 64], sizes = [2, 32], strides = [1, 1]} : vector<2x96xf32> to vector<2x32xf32>
    %339 = vector.extract_strided_slice %321 {offsets = [0, 64], sizes = [2, 32], strides = [1, 1]} : vector<2x96xf32> to vector<2x32xf32>
    %340 = vector.broadcast %255 : vector<1x32xf32> to vector<2x32xf32>
    %341 = arith.addf %339, %340 : vector<2x32xf32>
    %342 = arith.mulf %329, %341 : vector<2x32xf32>
    %343 = arith.addf %338, %342 : vector<2x32xf32>
    %344 = math.tanh %343 : vector<2x32xf32>
    %cst_64 = arith.constant 1.000000e+00 : f32
    %345 = vector.broadcast %cst_64 : f32 to vector<2x32xf32>
    %346 = arith.subf %345, %337 : vector<2x32xf32>
    %347 = arith.mulf %346, %344 : vector<2x32xf32>
    %348 = arith.mulf %337, %319 : vector<2x32xf32>
    %349 = arith.addf %347, %348 : vector<2x32xf32>
    %350 = vector.extract_strided_slice %258 {offsets = [6, 0], sizes = [2, 96], strides = [1, 1]} : vector<16x96xf32> to vector<2x96xf32>
    %cst_65 = arith.constant dense<0.000000e+00> : vector<2x96xf32>
    %351 = tpu.matmul %349, %253, %cst_65 {dimension_numbers = #tpu.dot_dimension_numbers<[1], [0], [0], [1], [0, 0, 1, 1], [], []>} : vector<2x32xf32>, vector<32x96xf32>, vector<2x96xf32> -> vector<2x96xf32>
    %352 = vector.extract_strided_slice %350 {offsets = [0, 0], sizes = [2, 32], strides = [1, 1]} : vector<2x96xf32> to vector<2x32xf32>
    %353 = vector.extract_strided_slice %351 {offsets = [0, 0], sizes = [2, 32], strides = [1, 1]} : vector<2x96xf32> to vector<2x32xf32>
    %354 = arith.addf %352, %353 : vector<2x32xf32>
    %355 = arith.negf %354 : vector<2x32xf32>
    %356 = math.exp %355 : vector<2x32xf32>
    %cst_66 = arith.constant 1.000000e+00 : f32
    %357 = vector.broadcast %cst_66 : f32 to vector<2x32xf32>
    %358 = arith.addf %357, %356 : vector<2x32xf32>
    %359 = arith.divf %357, %358 : vector<2x32xf32>
    %360 = vector.extract_strided_slice %350 {offsets = [0, 32], sizes = [2, 32], strides = [1, 1]} : vector<2x96xf32> to vector<2x32xf32>
    %361 = vector.extract_strided_slice %351 {offsets = [0, 32], sizes = [2, 32], strides = [1, 1]} : vector<2x96xf32> to vector<2x32xf32>
    %362 = arith.addf %360, %361 : vector<2x32xf32>
    %363 = arith.negf %362 : vector<2x32xf32>
    %364 = math.exp %363 : vector<2x32xf32>
    %cst_67 = arith.constant 1.000000e+00 : f32
    %365 = vector.broadcast %cst_67 : f32 to vector<2x32xf32>
    %366 = arith.addf %365, %364 : vector<2x32xf32>
    %367 = arith.divf %365, %366 : vector<2x32xf32>
    %368 = vector.extract_strided_slice %350 {offsets = [0, 64], sizes = [2, 32], strides = [1, 1]} : vector<2x96xf32> to vector<2x32xf32>
    %369 = vector.extract_strided_slice %351 {offsets = [0, 64], sizes = [2, 32], strides = [1, 1]} : vector<2x96xf32> to vector<2x32xf32>
    %370 = vector.broadcast %255 : vector<1x32xf32> to vector<2x32xf32>
    %371 = arith.addf %369, %370 : vector<2x32xf32>
    %372 = arith.mulf %359, %371 : vector<2x32xf32>
    %373 = arith.addf %368, %372 : vector<2x32xf32>
    %374 = math.tanh %373 : vector<2x32xf32>
    %cst_68 = arith.constant 1.000000e+00 : f32
    %375 = vector.broadcast %cst_68 : f32 to vector<2x32xf32>
    %376 = arith.subf %375, %367 : vector<2x32xf32>
    %377 = arith.mulf %376, %374 : vector<2x32xf32>
    %378 = arith.mulf %367, %349 : vector<2x32xf32>
    %379 = arith.addf %377, %378 : vector<2x32xf32>
    %380 = vector.extract_strided_slice %258 {offsets = [8, 0], sizes = [2, 96], strides = [1, 1]} : vector<16x96xf32> to vector<2x96xf32>
    %cst_69 = arith.constant dense<0.000000e+00> : vector<2x96xf32>
    %381 = tpu.matmul %379, %253, %cst_69 {dimension_numbers = #tpu.dot_dimension_numbers<[1], [0], [0], [1], [0, 0, 1, 1], [], []>} : vector<2x32xf32>, vector<32x96xf32>, vector<2x96xf32> -> vector<2x96xf32>
    %382 = vector.extract_strided_slice %380 {offsets = [0, 0], sizes = [2, 32], strides = [1, 1]} : vector<2x96xf32> to vector<2x32xf32>
    %383 = vector.extract_strided_slice %381 {offsets = [0, 0], sizes = [2, 32], strides = [1, 1]} : vector<2x96xf32> to vector<2x32xf32>
    %384 = arith.addf %382, %383 : vector<2x32xf32>
    %385 = arith.negf %384 : vector<2x32xf32>
    %386 = math.exp %385 : vector<2x32xf32>
    %cst_70 = arith.constant 1.000000e+00 : f32
    %387 = vector.broadcast %cst_70 : f32 to vector<2x32xf32>
    %388 = arith.addf %387, %386 : vector<2x32xf32>
    %389 = arith.divf %387, %388 : vector<2x32xf32>
    %390 = vector.extract_strided_slice %380 {offsets = [0, 32], sizes = [2, 32], strides = [1, 1]} : vector<2x96xf32> to vector<2x32xf32>
    %391 = vector.extract_strided_slice %381 {offsets = [0, 32], sizes = [2, 32], strides = [1, 1]} : vector<2x96xf32> to vector<2x32xf32>
    %392 = arith.addf %390, %391 : vector<2x32xf32>
    %393 = arith.negf %392 : vector<2x32xf32>
    %394 = math.exp %393 : vector<2x32xf32>
    %cst_71 = arith.constant 1.000000e+00 : f32
    %395 = vector.broadcast %cst_71 : f32 to vector<2x32xf32>
    %396 = arith.addf %395, %394 : vector<2x32xf32>
    %397 = arith.divf %395, %396 : vector<2x32xf32>
    %398 = vector.extract_strided_slice %380 {offsets = [0, 64], sizes = [2, 32], strides = [1, 1]} : vector<2x96xf32> to vector<2x32xf32>
    %399 = vector.extract_strided_slice %381 {offsets = [0, 64], sizes = [2, 32], strides = [1, 1]} : vector<2x96xf32> to vector<2x32xf32>
    %400 = vector.broadcast %255 : vector<1x32xf32> to vector<2x32xf32>
    %401 = arith.addf %399, %400 : vector<2x32xf32>
    %402 = arith.mulf %389, %401 : vector<2x32xf32>
    %403 = arith.addf %398, %402 : vector<2x32xf32>
    %404 = math.tanh %403 : vector<2x32xf32>
    %cst_72 = arith.constant 1.000000e+00 : f32
    %405 = vector.broadcast %cst_72 : f32 to vector<2x32xf32>
    %406 = arith.subf %405, %397 : vector<2x32xf32>
    %407 = arith.mulf %406, %404 : vector<2x32xf32>
    %408 = arith.mulf %397, %379 : vector<2x32xf32>
    %409 = arith.addf %407, %408 : vector<2x32xf32>
    %410 = vector.extract_strided_slice %258 {offsets = [10, 0], sizes = [2, 96], strides = [1, 1]} : vector<16x96xf32> to vector<2x96xf32>
    %cst_73 = arith.constant dense<0.000000e+00> : vector<2x96xf32>
    %411 = tpu.matmul %409, %253, %cst_73 {dimension_numbers = #tpu.dot_dimension_numbers<[1], [0], [0], [1], [0, 0, 1, 1], [], []>} : vector<2x32xf32>, vector<32x96xf32>, vector<2x96xf32> -> vector<2x96xf32>
    %412 = vector.extract_strided_slice %410 {offsets = [0, 0], sizes = [2, 32], strides = [1, 1]} : vector<2x96xf32> to vector<2x32xf32>
    %413 = vector.extract_strided_slice %411 {offsets = [0, 0], sizes = [2, 32], strides = [1, 1]} : vector<2x96xf32> to vector<2x32xf32>
    %414 = arith.addf %412, %413 : vector<2x32xf32>
    %415 = arith.negf %414 : vector<2x32xf32>
    %416 = math.exp %415 : vector<2x32xf32>
    %cst_74 = arith.constant 1.000000e+00 : f32
    %417 = vector.broadcast %cst_74 : f32 to vector<2x32xf32>
    %418 = arith.addf %417, %416 : vector<2x32xf32>
    %419 = arith.divf %417, %418 : vector<2x32xf32>
    %420 = vector.extract_strided_slice %410 {offsets = [0, 32], sizes = [2, 32], strides = [1, 1]} : vector<2x96xf32> to vector<2x32xf32>
    %421 = vector.extract_strided_slice %411 {offsets = [0, 32], sizes = [2, 32], strides = [1, 1]} : vector<2x96xf32> to vector<2x32xf32>
    %422 = arith.addf %420, %421 : vector<2x32xf32>
    %423 = arith.negf %422 : vector<2x32xf32>
    %424 = math.exp %423 : vector<2x32xf32>
    %cst_75 = arith.constant 1.000000e+00 : f32
    %425 = vector.broadcast %cst_75 : f32 to vector<2x32xf32>
    %426 = arith.addf %425, %424 : vector<2x32xf32>
    %427 = arith.divf %425, %426 : vector<2x32xf32>
    %428 = vector.extract_strided_slice %410 {offsets = [0, 64], sizes = [2, 32], strides = [1, 1]} : vector<2x96xf32> to vector<2x32xf32>
    %429 = vector.extract_strided_slice %411 {offsets = [0, 64], sizes = [2, 32], strides = [1, 1]} : vector<2x96xf32> to vector<2x32xf32>
    %430 = vector.broadcast %255 : vector<1x32xf32> to vector<2x32xf32>
    %431 = arith.addf %429, %430 : vector<2x32xf32>
    %432 = arith.mulf %419, %431 : vector<2x32xf32>
    %433 = arith.addf %428, %432 : vector<2x32xf32>
    %434 = math.tanh %433 : vector<2x32xf32>
    %cst_76 = arith.constant 1.000000e+00 : f32
    %435 = vector.broadcast %cst_76 : f32 to vector<2x32xf32>
    %436 = arith.subf %435, %427 : vector<2x32xf32>
    %437 = arith.mulf %436, %434 : vector<2x32xf32>
    %438 = arith.mulf %427, %409 : vector<2x32xf32>
    %439 = arith.addf %437, %438 : vector<2x32xf32>
    %440 = vector.extract_strided_slice %258 {offsets = [12, 0], sizes = [2, 96], strides = [1, 1]} : vector<16x96xf32> to vector<2x96xf32>
    %cst_77 = arith.constant dense<0.000000e+00> : vector<2x96xf32>
    %441 = tpu.matmul %439, %253, %cst_77 {dimension_numbers = #tpu.dot_dimension_numbers<[1], [0], [0], [1], [0, 0, 1, 1], [], []>} : vector<2x32xf32>, vector<32x96xf32>, vector<2x96xf32> -> vector<2x96xf32>
    %442 = vector.extract_strided_slice %440 {offsets = [0, 0], sizes = [2, 32], strides = [1, 1]} : vector<2x96xf32> to vector<2x32xf32>
    %443 = vector.extract_strided_slice %441 {offsets = [0, 0], sizes = [2, 32], strides = [1, 1]} : vector<2x96xf32> to vector<2x32xf32>
    %444 = arith.addf %442, %443 : vector<2x32xf32>
    %445 = arith.negf %444 : vector<2x32xf32>
    %446 = math.exp %445 : vector<2x32xf32>
    %cst_78 = arith.constant 1.000000e+00 : f32
    %447 = vector.broadcast %cst_78 : f32 to vector<2x32xf32>
    %448 = arith.addf %447, %446 : vector<2x32xf32>
    %449 = arith.divf %447, %448 : vector<2x32xf32>
    %450 = vector.extract_strided_slice %440 {offsets = [0, 32], sizes = [2, 32], strides = [1, 1]} : vector<2x96xf32> to vector<2x32xf32>
    %451 = vector.extract_strided_slice %441 {offsets = [0, 32], sizes = [2, 32], strides = [1, 1]} : vector<2x96xf32> to vector<2x32xf32>
    %452 = arith.addf %450, %451 : vector<2x32xf32>
    %453 = arith.negf %452 : vector<2x32xf32>
    %454 = math.exp %453 : vector<2x32xf32>
    %cst_79 = arith.constant 1.000000e+00 : f32
    %455 = vector.broadcast %cst_79 : f32 to vector<2x32xf32>
    %456 = arith.addf %455, %454 : vector<2x32xf32>
    %457 = arith.divf %455, %456 : vector<2x32xf32>
    %458 = vector.extract_strided_slice %440 {offsets = [0, 64], sizes = [2, 32], strides = [1, 1]} : vector<2x96xf32> to vector<2x32xf32>
    %459 = vector.extract_strided_slice %441 {offsets = [0, 64], sizes = [2, 32], strides = [1, 1]} : vector<2x96xf32> to vector<2x32xf32>
    %460 = vector.broadcast %255 : vector<1x32xf32> to vector<2x32xf32>
    %461 = arith.addf %459, %460 : vector<2x32xf32>
    %462 = arith.mulf %449, %461 : vector<2x32xf32>
    %463 = arith.addf %458, %462 : vector<2x32xf32>
    %464 = math.tanh %463 : vector<2x32xf32>
    %cst_80 = arith.constant 1.000000e+00 : f32
    %465 = vector.broadcast %cst_80 : f32 to vector<2x32xf32>
    %466 = arith.subf %465, %457 : vector<2x32xf32>
    %467 = arith.mulf %466, %464 : vector<2x32xf32>
    %468 = arith.mulf %457, %439 : vector<2x32xf32>
    %469 = arith.addf %467, %468 : vector<2x32xf32>
    %470 = vector.extract_strided_slice %258 {offsets = [14, 0], sizes = [2, 96], strides = [1, 1]} : vector<16x96xf32> to vector<2x96xf32>
    %cst_81 = arith.constant dense<0.000000e+00> : vector<2x96xf32>
    %471 = tpu.matmul %469, %253, %cst_81 {dimension_numbers = #tpu.dot_dimension_numbers<[1], [0], [0], [1], [0, 0, 1, 1], [], []>} : vector<2x32xf32>, vector<32x96xf32>, vector<2x96xf32> -> vector<2x96xf32>
    %472 = vector.extract_strided_slice %470 {offsets = [0, 0], sizes = [2, 32], strides = [1, 1]} : vector<2x96xf32> to vector<2x32xf32>
    %473 = vector.extract_strided_slice %471 {offsets = [0, 0], sizes = [2, 32], strides = [1, 1]} : vector<2x96xf32> to vector<2x32xf32>
    %474 = arith.addf %472, %473 : vector<2x32xf32>
    %475 = arith.negf %474 : vector<2x32xf32>
    %476 = math.exp %475 : vector<2x32xf32>
    %cst_82 = arith.constant 1.000000e+00 : f32
    %477 = vector.broadcast %cst_82 : f32 to vector<2x32xf32>
    %478 = arith.addf %477, %476 : vector<2x32xf32>
    %479 = arith.divf %477, %478 : vector<2x32xf32>
    %480 = vector.extract_strided_slice %470 {offsets = [0, 32], sizes = [2, 32], strides = [1, 1]} : vector<2x96xf32> to vector<2x32xf32>
    %481 = vector.extract_strided_slice %471 {offsets = [0, 32], sizes = [2, 32], strides = [1, 1]} : vector<2x96xf32> to vector<2x32xf32>
    %482 = arith.addf %480, %481 : vector<2x32xf32>
    %483 = arith.negf %482 : vector<2x32xf32>
    %484 = math.exp %483 : vector<2x32xf32>
    %cst_83 = arith.constant 1.000000e+00 : f32
    %485 = vector.broadcast %cst_83 : f32 to vector<2x32xf32>
    %486 = arith.addf %485, %484 : vector<2x32xf32>
    %487 = arith.divf %485, %486 : vector<2x32xf32>
    %488 = vector.extract_strided_slice %470 {offsets = [0, 64], sizes = [2, 32], strides = [1, 1]} : vector<2x96xf32> to vector<2x32xf32>
    %489 = vector.extract_strided_slice %471 {offsets = [0, 64], sizes = [2, 32], strides = [1, 1]} : vector<2x96xf32> to vector<2x32xf32>
    %490 = vector.broadcast %255 : vector<1x32xf32> to vector<2x32xf32>
    %491 = arith.addf %489, %490 : vector<2x32xf32>
    %492 = arith.mulf %479, %491 : vector<2x32xf32>
    %493 = arith.addf %488, %492 : vector<2x32xf32>
    %494 = math.tanh %493 : vector<2x32xf32>
    %cst_84 = arith.constant 1.000000e+00 : f32
    %495 = vector.broadcast %cst_84 : f32 to vector<2x32xf32>
    %496 = arith.subf %495, %487 : vector<2x32xf32>
    %497 = arith.mulf %496, %494 : vector<2x32xf32>
    %498 = arith.mulf %487, %469 : vector<2x32xf32>
    %499 = arith.addf %497, %498 : vector<2x32xf32>
    %500 = tpu.concatenate %289, %319, %349, %379, %409, %439, %469, %499 in 0 : vector<2x32xf32>, vector<2x32xf32>, vector<2x32xf32>, vector<2x32xf32>, vector<2x32xf32>, vector<2x32xf32>, vector<2x32xf32>, vector<2x32xf32> -> vector<16x32xf32>
    %c0_85 = arith.constant 0 : index
    %c0_86 = arith.constant 0 : index
    %501 = vector.load %arg9[%c0_85, %c0_86] : memref<32x96xf32, #tpu.memory_space<vmem>>, vector<32x96xf32>
    %c0_87 = arith.constant 0 : index
    %c0_88 = arith.constant 0 : index
    %502 = vector.load %arg10[%c0_87, %c0_88] : memref<32x96xf32, #tpu.memory_space<vmem>>, vector<32x96xf32>
    %c0_89 = arith.constant 0 : index
    %c0_90 = arith.constant 0 : index
    %503 = vector.load %arg11[%c0_89, %c0_90] : memref<1x96xf32, #tpu.memory_space<vmem>>, vector<1x96xf32>
    %c0_91 = arith.constant 0 : index
    %c0_92 = arith.constant 0 : index
    %504 = vector.load %arg12[%c0_91, %c0_92] : memref<1x32xf32, #tpu.memory_space<vmem>>, vector<1x32xf32>
    %cst_93 = arith.constant dense<0.000000e+00> : vector<16x96xf32>
    %505 = tpu.matmul %500, %501, %cst_93 {dimension_numbers = #tpu.dot_dimension_numbers<[1], [0], [0], [1], [0, 0, 1, 1], [], []>} : vector<16x32xf32>, vector<32x96xf32>, vector<16x96xf32> -> vector<16x96xf32>
    %506 = vector.broadcast %503 : vector<1x96xf32> to vector<16x96xf32>
    %507 = arith.addf %505, %506 : vector<16x96xf32>
    %cst_94 = arith.constant 0.000000e+00 : f32
    %508 = vector.broadcast %cst_94 : f32 to vector<2x32xf32>
    %509 = vector.extract_strided_slice %507 {offsets = [0, 0], sizes = [2, 96], strides = [1, 1]} : vector<16x96xf32> to vector<2x96xf32>
    %cst_95 = arith.constant dense<0.000000e+00> : vector<2x96xf32>
    %510 = tpu.matmul %508, %502, %cst_95 {dimension_numbers = #tpu.dot_dimension_numbers<[1], [0], [0], [1], [0, 0, 1, 1], [], []>} : vector<2x32xf32>, vector<32x96xf32>, vector<2x96xf32> -> vector<2x96xf32>
    %511 = vector.extract_strided_slice %509 {offsets = [0, 0], sizes = [2, 32], strides = [1, 1]} : vector<2x96xf32> to vector<2x32xf32>
    %512 = vector.extract_strided_slice %510 {offsets = [0, 0], sizes = [2, 32], strides = [1, 1]} : vector<2x96xf32> to vector<2x32xf32>
    %513 = arith.addf %511, %512 : vector<2x32xf32>
    %514 = arith.negf %513 : vector<2x32xf32>
    %515 = math.exp %514 : vector<2x32xf32>
    %cst_96 = arith.constant 1.000000e+00 : f32
    %516 = vector.broadcast %cst_96 : f32 to vector<2x32xf32>
    %517 = arith.addf %516, %515 : vector<2x32xf32>
    %518 = arith.divf %516, %517 : vector<2x32xf32>
    %519 = vector.extract_strided_slice %509 {offsets = [0, 32], sizes = [2, 32], strides = [1, 1]} : vector<2x96xf32> to vector<2x32xf32>
    %520 = vector.extract_strided_slice %510 {offsets = [0, 32], sizes = [2, 32], strides = [1, 1]} : vector<2x96xf32> to vector<2x32xf32>
    %521 = arith.addf %519, %520 : vector<2x32xf32>
    %522 = arith.negf %521 : vector<2x32xf32>
    %523 = math.exp %522 : vector<2x32xf32>
    %cst_97 = arith.constant 1.000000e+00 : f32
    %524 = vector.broadcast %cst_97 : f32 to vector<2x32xf32>
    %525 = arith.addf %524, %523 : vector<2x32xf32>
    %526 = arith.divf %524, %525 : vector<2x32xf32>
    %527 = vector.extract_strided_slice %509 {offsets = [0, 64], sizes = [2, 32], strides = [1, 1]} : vector<2x96xf32> to vector<2x32xf32>
    %528 = vector.extract_strided_slice %510 {offsets = [0, 64], sizes = [2, 32], strides = [1, 1]} : vector<2x96xf32> to vector<2x32xf32>
    %529 = vector.broadcast %504 : vector<1x32xf32> to vector<2x32xf32>
    %530 = arith.addf %528, %529 : vector<2x32xf32>
    %531 = arith.mulf %518, %530 : vector<2x32xf32>
    %532 = arith.addf %527, %531 : vector<2x32xf32>
    %533 = math.tanh %532 : vector<2x32xf32>
    %cst_98 = arith.constant 1.000000e+00 : f32
    %534 = vector.broadcast %cst_98 : f32 to vector<2x32xf32>
    %535 = arith.subf %534, %526 : vector<2x32xf32>
    %536 = arith.mulf %535, %533 : vector<2x32xf32>
    %537 = arith.mulf %526, %508 : vector<2x32xf32>
    %538 = arith.addf %536, %537 : vector<2x32xf32>
    %539 = vector.extract_strided_slice %507 {offsets = [2, 0], sizes = [2, 96], strides = [1, 1]} : vector<16x96xf32> to vector<2x96xf32>
    %cst_99 = arith.constant dense<0.000000e+00> : vector<2x96xf32>
    %540 = tpu.matmul %538, %502, %cst_99 {dimension_numbers = #tpu.dot_dimension_numbers<[1], [0], [0], [1], [0, 0, 1, 1], [], []>} : vector<2x32xf32>, vector<32x96xf32>, vector<2x96xf32> -> vector<2x96xf32>
    %541 = vector.extract_strided_slice %539 {offsets = [0, 0], sizes = [2, 32], strides = [1, 1]} : vector<2x96xf32> to vector<2x32xf32>
    %542 = vector.extract_strided_slice %540 {offsets = [0, 0], sizes = [2, 32], strides = [1, 1]} : vector<2x96xf32> to vector<2x32xf32>
    %543 = arith.addf %541, %542 : vector<2x32xf32>
    %544 = arith.negf %543 : vector<2x32xf32>
    %545 = math.exp %544 : vector<2x32xf32>
    %cst_100 = arith.constant 1.000000e+00 : f32
    %546 = vector.broadcast %cst_100 : f32 to vector<2x32xf32>
    %547 = arith.addf %546, %545 : vector<2x32xf32>
    %548 = arith.divf %546, %547 : vector<2x32xf32>
    %549 = vector.extract_strided_slice %539 {offsets = [0, 32], sizes = [2, 32], strides = [1, 1]} : vector<2x96xf32> to vector<2x32xf32>
    %550 = vector.extract_strided_slice %540 {offsets = [0, 32], sizes = [2, 32], strides = [1, 1]} : vector<2x96xf32> to vector<2x32xf32>
    %551 = arith.addf %549, %550 : vector<2x32xf32>
    %552 = arith.negf %551 : vector<2x32xf32>
    %553 = math.exp %552 : vector<2x32xf32>
    %cst_101 = arith.constant 1.000000e+00 : f32
    %554 = vector.broadcast %cst_101 : f32 to vector<2x32xf32>
    %555 = arith.addf %554, %553 : vector<2x32xf32>
    %556 = arith.divf %554, %555 : vector<2x32xf32>
    %557 = vector.extract_strided_slice %539 {offsets = [0, 64], sizes = [2, 32], strides = [1, 1]} : vector<2x96xf32> to vector<2x32xf32>
    %558 = vector.extract_strided_slice %540 {offsets = [0, 64], sizes = [2, 32], strides = [1, 1]} : vector<2x96xf32> to vector<2x32xf32>
    %559 = vector.broadcast %504 : vector<1x32xf32> to vector<2x32xf32>
    %560 = arith.addf %558, %559 : vector<2x32xf32>
    %561 = arith.mulf %548, %560 : vector<2x32xf32>
    %562 = arith.addf %557, %561 : vector<2x32xf32>
    %563 = math.tanh %562 : vector<2x32xf32>
    %cst_102 = arith.constant 1.000000e+00 : f32
    %564 = vector.broadcast %cst_102 : f32 to vector<2x32xf32>
    %565 = arith.subf %564, %556 : vector<2x32xf32>
    %566 = arith.mulf %565, %563 : vector<2x32xf32>
    %567 = arith.mulf %556, %538 : vector<2x32xf32>
    %568 = arith.addf %566, %567 : vector<2x32xf32>
    %569 = vector.extract_strided_slice %507 {offsets = [4, 0], sizes = [2, 96], strides = [1, 1]} : vector<16x96xf32> to vector<2x96xf32>
    %cst_103 = arith.constant dense<0.000000e+00> : vector<2x96xf32>
    %570 = tpu.matmul %568, %502, %cst_103 {dimension_numbers = #tpu.dot_dimension_numbers<[1], [0], [0], [1], [0, 0, 1, 1], [], []>} : vector<2x32xf32>, vector<32x96xf32>, vector<2x96xf32> -> vector<2x96xf32>
    %571 = vector.extract_strided_slice %569 {offsets = [0, 0], sizes = [2, 32], strides = [1, 1]} : vector<2x96xf32> to vector<2x32xf32>
    %572 = vector.extract_strided_slice %570 {offsets = [0, 0], sizes = [2, 32], strides = [1, 1]} : vector<2x96xf32> to vector<2x32xf32>
    %573 = arith.addf %571, %572 : vector<2x32xf32>
    %574 = arith.negf %573 : vector<2x32xf32>
    %575 = math.exp %574 : vector<2x32xf32>
    %cst_104 = arith.constant 1.000000e+00 : f32
    %576 = vector.broadcast %cst_104 : f32 to vector<2x32xf32>
    %577 = arith.addf %576, %575 : vector<2x32xf32>
    %578 = arith.divf %576, %577 : vector<2x32xf32>
    %579 = vector.extract_strided_slice %569 {offsets = [0, 32], sizes = [2, 32], strides = [1, 1]} : vector<2x96xf32> to vector<2x32xf32>
    %580 = vector.extract_strided_slice %570 {offsets = [0, 32], sizes = [2, 32], strides = [1, 1]} : vector<2x96xf32> to vector<2x32xf32>
    %581 = arith.addf %579, %580 : vector<2x32xf32>
    %582 = arith.negf %581 : vector<2x32xf32>
    %583 = math.exp %582 : vector<2x32xf32>
    %cst_105 = arith.constant 1.000000e+00 : f32
    %584 = vector.broadcast %cst_105 : f32 to vector<2x32xf32>
    %585 = arith.addf %584, %583 : vector<2x32xf32>
    %586 = arith.divf %584, %585 : vector<2x32xf32>
    %587 = vector.extract_strided_slice %569 {offsets = [0, 64], sizes = [2, 32], strides = [1, 1]} : vector<2x96xf32> to vector<2x32xf32>
    %588 = vector.extract_strided_slice %570 {offsets = [0, 64], sizes = [2, 32], strides = [1, 1]} : vector<2x96xf32> to vector<2x32xf32>
    %589 = vector.broadcast %504 : vector<1x32xf32> to vector<2x32xf32>
    %590 = arith.addf %588, %589 : vector<2x32xf32>
    %591 = arith.mulf %578, %590 : vector<2x32xf32>
    %592 = arith.addf %587, %591 : vector<2x32xf32>
    %593 = math.tanh %592 : vector<2x32xf32>
    %cst_106 = arith.constant 1.000000e+00 : f32
    %594 = vector.broadcast %cst_106 : f32 to vector<2x32xf32>
    %595 = arith.subf %594, %586 : vector<2x32xf32>
    %596 = arith.mulf %595, %593 : vector<2x32xf32>
    %597 = arith.mulf %586, %568 : vector<2x32xf32>
    %598 = arith.addf %596, %597 : vector<2x32xf32>
    %599 = vector.extract_strided_slice %507 {offsets = [6, 0], sizes = [2, 96], strides = [1, 1]} : vector<16x96xf32> to vector<2x96xf32>
    %cst_107 = arith.constant dense<0.000000e+00> : vector<2x96xf32>
    %600 = tpu.matmul %598, %502, %cst_107 {dimension_numbers = #tpu.dot_dimension_numbers<[1], [0], [0], [1], [0, 0, 1, 1], [], []>} : vector<2x32xf32>, vector<32x96xf32>, vector<2x96xf32> -> vector<2x96xf32>
    %601 = vector.extract_strided_slice %599 {offsets = [0, 0], sizes = [2, 32], strides = [1, 1]} : vector<2x96xf32> to vector<2x32xf32>
    %602 = vector.extract_strided_slice %600 {offsets = [0, 0], sizes = [2, 32], strides = [1, 1]} : vector<2x96xf32> to vector<2x32xf32>
    %603 = arith.addf %601, %602 : vector<2x32xf32>
    %604 = arith.negf %603 : vector<2x32xf32>
    %605 = math.exp %604 : vector<2x32xf32>
    %cst_108 = arith.constant 1.000000e+00 : f32
    %606 = vector.broadcast %cst_108 : f32 to vector<2x32xf32>
    %607 = arith.addf %606, %605 : vector<2x32xf32>
    %608 = arith.divf %606, %607 : vector<2x32xf32>
    %609 = vector.extract_strided_slice %599 {offsets = [0, 32], sizes = [2, 32], strides = [1, 1]} : vector<2x96xf32> to vector<2x32xf32>
    %610 = vector.extract_strided_slice %600 {offsets = [0, 32], sizes = [2, 32], strides = [1, 1]} : vector<2x96xf32> to vector<2x32xf32>
    %611 = arith.addf %609, %610 : vector<2x32xf32>
    %612 = arith.negf %611 : vector<2x32xf32>
    %613 = math.exp %612 : vector<2x32xf32>
    %cst_109 = arith.constant 1.000000e+00 : f32
    %614 = vector.broadcast %cst_109 : f32 to vector<2x32xf32>
    %615 = arith.addf %614, %613 : vector<2x32xf32>
    %616 = arith.divf %614, %615 : vector<2x32xf32>
    %617 = vector.extract_strided_slice %599 {offsets = [0, 64], sizes = [2, 32], strides = [1, 1]} : vector<2x96xf32> to vector<2x32xf32>
    %618 = vector.extract_strided_slice %600 {offsets = [0, 64], sizes = [2, 32], strides = [1, 1]} : vector<2x96xf32> to vector<2x32xf32>
    %619 = vector.broadcast %504 : vector<1x32xf32> to vector<2x32xf32>
    %620 = arith.addf %618, %619 : vector<2x32xf32>
    %621 = arith.mulf %608, %620 : vector<2x32xf32>
    %622 = arith.addf %617, %621 : vector<2x32xf32>
    %623 = math.tanh %622 : vector<2x32xf32>
    %cst_110 = arith.constant 1.000000e+00 : f32
    %624 = vector.broadcast %cst_110 : f32 to vector<2x32xf32>
    %625 = arith.subf %624, %616 : vector<2x32xf32>
    %626 = arith.mulf %625, %623 : vector<2x32xf32>
    %627 = arith.mulf %616, %598 : vector<2x32xf32>
    %628 = arith.addf %626, %627 : vector<2x32xf32>
    %629 = vector.extract_strided_slice %507 {offsets = [8, 0], sizes = [2, 96], strides = [1, 1]} : vector<16x96xf32> to vector<2x96xf32>
    %cst_111 = arith.constant dense<0.000000e+00> : vector<2x96xf32>
    %630 = tpu.matmul %628, %502, %cst_111 {dimension_numbers = #tpu.dot_dimension_numbers<[1], [0], [0], [1], [0, 0, 1, 1], [], []>} : vector<2x32xf32>, vector<32x96xf32>, vector<2x96xf32> -> vector<2x96xf32>
    %631 = vector.extract_strided_slice %629 {offsets = [0, 0], sizes = [2, 32], strides = [1, 1]} : vector<2x96xf32> to vector<2x32xf32>
    %632 = vector.extract_strided_slice %630 {offsets = [0, 0], sizes = [2, 32], strides = [1, 1]} : vector<2x96xf32> to vector<2x32xf32>
    %633 = arith.addf %631, %632 : vector<2x32xf32>
    %634 = arith.negf %633 : vector<2x32xf32>
    %635 = math.exp %634 : vector<2x32xf32>
    %cst_112 = arith.constant 1.000000e+00 : f32
    %636 = vector.broadcast %cst_112 : f32 to vector<2x32xf32>
    %637 = arith.addf %636, %635 : vector<2x32xf32>
    %638 = arith.divf %636, %637 : vector<2x32xf32>
    %639 = vector.extract_strided_slice %629 {offsets = [0, 32], sizes = [2, 32], strides = [1, 1]} : vector<2x96xf32> to vector<2x32xf32>
    %640 = vector.extract_strided_slice %630 {offsets = [0, 32], sizes = [2, 32], strides = [1, 1]} : vector<2x96xf32> to vector<2x32xf32>
    %641 = arith.addf %639, %640 : vector<2x32xf32>
    %642 = arith.negf %641 : vector<2x32xf32>
    %643 = math.exp %642 : vector<2x32xf32>
    %cst_113 = arith.constant 1.000000e+00 : f32
    %644 = vector.broadcast %cst_113 : f32 to vector<2x32xf32>
    %645 = arith.addf %644, %643 : vector<2x32xf32>
    %646 = arith.divf %644, %645 : vector<2x32xf32>
    %647 = vector.extract_strided_slice %629 {offsets = [0, 64], sizes = [2, 32], strides = [1, 1]} : vector<2x96xf32> to vector<2x32xf32>
    %648 = vector.extract_strided_slice %630 {offsets = [0, 64], sizes = [2, 32], strides = [1, 1]} : vector<2x96xf32> to vector<2x32xf32>
    %649 = vector.broadcast %504 : vector<1x32xf32> to vector<2x32xf32>
    %650 = arith.addf %648, %649 : vector<2x32xf32>
    %651 = arith.mulf %638, %650 : vector<2x32xf32>
    %652 = arith.addf %647, %651 : vector<2x32xf32>
    %653 = math.tanh %652 : vector<2x32xf32>
    %cst_114 = arith.constant 1.000000e+00 : f32
    %654 = vector.broadcast %cst_114 : f32 to vector<2x32xf32>
    %655 = arith.subf %654, %646 : vector<2x32xf32>
    %656 = arith.mulf %655, %653 : vector<2x32xf32>
    %657 = arith.mulf %646, %628 : vector<2x32xf32>
    %658 = arith.addf %656, %657 : vector<2x32xf32>
    %659 = vector.extract_strided_slice %507 {offsets = [10, 0], sizes = [2, 96], strides = [1, 1]} : vector<16x96xf32> to vector<2x96xf32>
    %cst_115 = arith.constant dense<0.000000e+00> : vector<2x96xf32>
    %660 = tpu.matmul %658, %502, %cst_115 {dimension_numbers = #tpu.dot_dimension_numbers<[1], [0], [0], [1], [0, 0, 1, 1], [], []>} : vector<2x32xf32>, vector<32x96xf32>, vector<2x96xf32> -> vector<2x96xf32>
    %661 = vector.extract_strided_slice %659 {offsets = [0, 0], sizes = [2, 32], strides = [1, 1]} : vector<2x96xf32> to vector<2x32xf32>
    %662 = vector.extract_strided_slice %660 {offsets = [0, 0], sizes = [2, 32], strides = [1, 1]} : vector<2x96xf32> to vector<2x32xf32>
    %663 = arith.addf %661, %662 : vector<2x32xf32>
    %664 = arith.negf %663 : vector<2x32xf32>
    %665 = math.exp %664 : vector<2x32xf32>
    %cst_116 = arith.constant 1.000000e+00 : f32
    %666 = vector.broadcast %cst_116 : f32 to vector<2x32xf32>
    %667 = arith.addf %666, %665 : vector<2x32xf32>
    %668 = arith.divf %666, %667 : vector<2x32xf32>
    %669 = vector.extract_strided_slice %659 {offsets = [0, 32], sizes = [2, 32], strides = [1, 1]} : vector<2x96xf32> to vector<2x32xf32>
    %670 = vector.extract_strided_slice %660 {offsets = [0, 32], sizes = [2, 32], strides = [1, 1]} : vector<2x96xf32> to vector<2x32xf32>
    %671 = arith.addf %669, %670 : vector<2x32xf32>
    %672 = arith.negf %671 : vector<2x32xf32>
    %673 = math.exp %672 : vector<2x32xf32>
    %cst_117 = arith.constant 1.000000e+00 : f32
    %674 = vector.broadcast %cst_117 : f32 to vector<2x32xf32>
    %675 = arith.addf %674, %673 : vector<2x32xf32>
    %676 = arith.divf %674, %675 : vector<2x32xf32>
    %677 = vector.extract_strided_slice %659 {offsets = [0, 64], sizes = [2, 32], strides = [1, 1]} : vector<2x96xf32> to vector<2x32xf32>
    %678 = vector.extract_strided_slice %660 {offsets = [0, 64], sizes = [2, 32], strides = [1, 1]} : vector<2x96xf32> to vector<2x32xf32>
    %679 = vector.broadcast %504 : vector<1x32xf32> to vector<2x32xf32>
    %680 = arith.addf %678, %679 : vector<2x32xf32>
    %681 = arith.mulf %668, %680 : vector<2x32xf32>
    %682 = arith.addf %677, %681 : vector<2x32xf32>
    %683 = math.tanh %682 : vector<2x32xf32>
    %cst_118 = arith.constant 1.000000e+00 : f32
    %684 = vector.broadcast %cst_118 : f32 to vector<2x32xf32>
    %685 = arith.subf %684, %676 : vector<2x32xf32>
    %686 = arith.mulf %685, %683 : vector<2x32xf32>
    %687 = arith.mulf %676, %658 : vector<2x32xf32>
    %688 = arith.addf %686, %687 : vector<2x32xf32>
    %689 = vector.extract_strided_slice %507 {offsets = [12, 0], sizes = [2, 96], strides = [1, 1]} : vector<16x96xf32> to vector<2x96xf32>
    %cst_119 = arith.constant dense<0.000000e+00> : vector<2x96xf32>
    %690 = tpu.matmul %688, %502, %cst_119 {dimension_numbers = #tpu.dot_dimension_numbers<[1], [0], [0], [1], [0, 0, 1, 1], [], []>} : vector<2x32xf32>, vector<32x96xf32>, vector<2x96xf32> -> vector<2x96xf32>
    %691 = vector.extract_strided_slice %689 {offsets = [0, 0], sizes = [2, 32], strides = [1, 1]} : vector<2x96xf32> to vector<2x32xf32>
    %692 = vector.extract_strided_slice %690 {offsets = [0, 0], sizes = [2, 32], strides = [1, 1]} : vector<2x96xf32> to vector<2x32xf32>
    %693 = arith.addf %691, %692 : vector<2x32xf32>
    %694 = arith.negf %693 : vector<2x32xf32>
    %695 = math.exp %694 : vector<2x32xf32>
    %cst_120 = arith.constant 1.000000e+00 : f32
    %696 = vector.broadcast %cst_120 : f32 to vector<2x32xf32>
    %697 = arith.addf %696, %695 : vector<2x32xf32>
    %698 = arith.divf %696, %697 : vector<2x32xf32>
    %699 = vector.extract_strided_slice %689 {offsets = [0, 32], sizes = [2, 32], strides = [1, 1]} : vector<2x96xf32> to vector<2x32xf32>
    %700 = vector.extract_strided_slice %690 {offsets = [0, 32], sizes = [2, 32], strides = [1, 1]} : vector<2x96xf32> to vector<2x32xf32>
    %701 = arith.addf %699, %700 : vector<2x32xf32>
    %702 = arith.negf %701 : vector<2x32xf32>
    %703 = math.exp %702 : vector<2x32xf32>
    %cst_121 = arith.constant 1.000000e+00 : f32
    %704 = vector.broadcast %cst_121 : f32 to vector<2x32xf32>
    %705 = arith.addf %704, %703 : vector<2x32xf32>
    %706 = arith.divf %704, %705 : vector<2x32xf32>
    %707 = vector.extract_strided_slice %689 {offsets = [0, 64], sizes = [2, 32], strides = [1, 1]} : vector<2x96xf32> to vector<2x32xf32>
    %708 = vector.extract_strided_slice %690 {offsets = [0, 64], sizes = [2, 32], strides = [1, 1]} : vector<2x96xf32> to vector<2x32xf32>
    %709 = vector.broadcast %504 : vector<1x32xf32> to vector<2x32xf32>
    %710 = arith.addf %708, %709 : vector<2x32xf32>
    %711 = arith.mulf %698, %710 : vector<2x32xf32>
    %712 = arith.addf %707, %711 : vector<2x32xf32>
    %713 = math.tanh %712 : vector<2x32xf32>
    %cst_122 = arith.constant 1.000000e+00 : f32
    %714 = vector.broadcast %cst_122 : f32 to vector<2x32xf32>
    %715 = arith.subf %714, %706 : vector<2x32xf32>
    %716 = arith.mulf %715, %713 : vector<2x32xf32>
    %717 = arith.mulf %706, %688 : vector<2x32xf32>
    %718 = arith.addf %716, %717 : vector<2x32xf32>
    %719 = vector.extract_strided_slice %507 {offsets = [14, 0], sizes = [2, 96], strides = [1, 1]} : vector<16x96xf32> to vector<2x96xf32>
    %cst_123 = arith.constant dense<0.000000e+00> : vector<2x96xf32>
    %720 = tpu.matmul %718, %502, %cst_123 {dimension_numbers = #tpu.dot_dimension_numbers<[1], [0], [0], [1], [0, 0, 1, 1], [], []>} : vector<2x32xf32>, vector<32x96xf32>, vector<2x96xf32> -> vector<2x96xf32>
    %721 = vector.extract_strided_slice %719 {offsets = [0, 0], sizes = [2, 32], strides = [1, 1]} : vector<2x96xf32> to vector<2x32xf32>
    %722 = vector.extract_strided_slice %720 {offsets = [0, 0], sizes = [2, 32], strides = [1, 1]} : vector<2x96xf32> to vector<2x32xf32>
    %723 = arith.addf %721, %722 : vector<2x32xf32>
    %724 = arith.negf %723 : vector<2x32xf32>
    %725 = math.exp %724 : vector<2x32xf32>
    %cst_124 = arith.constant 1.000000e+00 : f32
    %726 = vector.broadcast %cst_124 : f32 to vector<2x32xf32>
    %727 = arith.addf %726, %725 : vector<2x32xf32>
    %728 = arith.divf %726, %727 : vector<2x32xf32>
    %729 = vector.extract_strided_slice %719 {offsets = [0, 32], sizes = [2, 32], strides = [1, 1]} : vector<2x96xf32> to vector<2x32xf32>
    %730 = vector.extract_strided_slice %720 {offsets = [0, 32], sizes = [2, 32], strides = [1, 1]} : vector<2x96xf32> to vector<2x32xf32>
    %731 = arith.addf %729, %730 : vector<2x32xf32>
    %732 = arith.negf %731 : vector<2x32xf32>
    %733 = math.exp %732 : vector<2x32xf32>
    %cst_125 = arith.constant 1.000000e+00 : f32
    %734 = vector.broadcast %cst_125 : f32 to vector<2x32xf32>
    %735 = arith.addf %734, %733 : vector<2x32xf32>
    %736 = arith.divf %734, %735 : vector<2x32xf32>
    %737 = vector.extract_strided_slice %719 {offsets = [0, 64], sizes = [2, 32], strides = [1, 1]} : vector<2x96xf32> to vector<2x32xf32>
    %738 = vector.extract_strided_slice %720 {offsets = [0, 64], sizes = [2, 32], strides = [1, 1]} : vector<2x96xf32> to vector<2x32xf32>
    %739 = vector.broadcast %504 : vector<1x32xf32> to vector<2x32xf32>
    %740 = arith.addf %738, %739 : vector<2x32xf32>
    %741 = arith.mulf %728, %740 : vector<2x32xf32>
    %742 = arith.addf %737, %741 : vector<2x32xf32>
    %743 = math.tanh %742 : vector<2x32xf32>
    %cst_126 = arith.constant 1.000000e+00 : f32
    %744 = vector.broadcast %cst_126 : f32 to vector<2x32xf32>
    %745 = arith.subf %744, %736 : vector<2x32xf32>
    %746 = arith.mulf %745, %743 : vector<2x32xf32>
    %747 = arith.mulf %736, %718 : vector<2x32xf32>
    %748 = arith.addf %746, %747 : vector<2x32xf32>
    %cst_127 = arith.constant 0.000000e+00 : f32
    %749 = vector.broadcast %cst_127 : f32 to vector<2x32xf32>
    %750 = arith.maximumf %748, %749 : vector<2x32xf32>
    %c0_128 = arith.constant 0 : index
    %c0_129 = arith.constant 0 : index
    %751 = vector.load %arg13[%c0_128, %c0_129] : memref<32x32xf32, #tpu.memory_space<vmem>>, vector<32x32xf32>
    %c0_130 = arith.constant 0 : index
    %c0_131 = arith.constant 0 : index
    %752 = vector.load %arg14[%c0_130, %c0_131] : memref<1x32xf32, #tpu.memory_space<vmem>>, vector<1x32xf32>
    %cst_132 = arith.constant dense<0.000000e+00> : vector<2x32xf32>
    %753 = tpu.matmul %750, %751, %cst_132 {dimension_numbers = #tpu.dot_dimension_numbers<[1], [0], [0], [1], [0, 0, 1, 1], [], []>} : vector<2x32xf32>, vector<32x32xf32>, vector<2x32xf32> -> vector<2x32xf32>
    %754 = vector.broadcast %752 : vector<1x32xf32> to vector<2x32xf32>
    %755 = arith.addf %753, %754 : vector<2x32xf32>
    %cst_133 = arith.constant 0.000000e+00 : f32
    %756 = vector.broadcast %cst_133 : f32 to vector<2x32xf32>
    %757 = arith.maximumf %755, %756 : vector<2x32xf32>
    %c0_134 = arith.constant 0 : index
    %c0_135 = arith.constant 0 : index
    %758 = vector.load %arg15[%c0_134, %c0_135] : memref<32x16xf32, #tpu.memory_space<vmem>>, vector<32x16xf32>
    %c0_136 = arith.constant 0 : index
    %c0_137 = arith.constant 0 : index
    %759 = vector.load %arg16[%c0_136, %c0_137] : memref<1x16xf32, #tpu.memory_space<vmem>>, vector<1x16xf32>
    %cst_138 = arith.constant dense<0.000000e+00> : vector<2x16xf32>
    %760 = tpu.matmul %757, %758, %cst_138 {dimension_numbers = #tpu.dot_dimension_numbers<[1], [0], [0], [1], [0, 0, 1, 1], [], []>} : vector<2x32xf32>, vector<32x16xf32>, vector<2x16xf32> -> vector<2x16xf32>
    %761 = vector.broadcast %759 : vector<1x16xf32> to vector<2x16xf32>
    %762 = arith.addf %760, %761 : vector<2x16xf32>
    %cst_139 = arith.constant 0.000000e+00 : f32
    %763 = vector.broadcast %cst_139 : f32 to vector<2x16xf32>
    %764 = arith.maximumf %762, %763 : vector<2x16xf32>
    %c0_140 = arith.constant 0 : index
    %c0_141 = arith.constant 0 : index
    %765 = vector.load %arg17[%c0_140, %c0_141] : memref<2x16xf32, #tpu.memory_space<vmem>>, vector<2x16xf32>
    tpu.vector_store %arg17[%c0_140, %c0_141], %764 {strides = array<i32>} : memref<2x16xf32, #tpu.memory_space<vmem>>, vector<2x16xf32>,
    return
  }
}

</mosaic_0001>

<bundles_post_ra>
// kernel: tpu_custom_call.1
= control target key start
LH: loop header
LB: loop body
LE: loop exit
PB: predicated region body
PF: predicated region fallthrough
CT: control target
= control target key end

     0   :  { %s3059_s0 = inlined_call_operand.vmem [shape: f32[16,32], index: 0, kind: input, shape index: {}]   ;;  %s3060_s1 = inlined_call_operand.vmem [shape: f32[32,96], index: 1, kind: input, shape index: {}]   ;;  %s3061_s2 = inlined_call_operand.hbm [shape: f32[32,96], index: 2, kind: input, shape index: {}]   ;;  %s3062_s3 = inlined_call_operand.vmem [shape: f32[1,96], index: 3, kind: input, shape index: {}]   ;;  %s3063_s4 = inlined_call_operand.vmem [shape: f32[1,32], index: 4, kind: input, shape index: {}]   ;;  %s3064_s5 = inlined_call_operand.hbm [shape: f32[32,96], index: 5, kind: input, shape index: {}]   ;;  %s3065_s6 = inlined_call_operand.hbm [shape: f32[32,96], index: 6, kind: input, shape index: {}]   ;;  %s3066_s7 = inlined_call_operand.vmem [shape: f32[1,96], index: 7, kind: input, shape index: {}]   ;;  %s3067_s8 = inlined_call_operand.vmem [shape: f32[1,32], index: 8, kind: input, shape index: {}]   ;;  %s3068_s9 = inlined_call_operand.hbm [shape: f32[32,96], index: 9, kind: input, shape index: {}]   ;;  %s3069_s10 = inlined_call_operand.hbm [shape: f32[32,96], index: 10, kind: input, shape index: {}]   ;;  %s3070_s11 = inlined_call_operand.vmem [shape: f32[1,96], index: 11, kind: input, shape index: {}]   ;;  %s3071_s12 = inlined_call_operand.vmem [shape: f32[1,32], index: 12, kind: input, shape index: {}]   ;;  %s3072_s13 = inlined_call_operand.hbm [shape: f32[32,32], index: 13, kind: input, shape index: {}]   ;;  %s3073_s14 = inlined_call_operand.vmem [shape: f32[1,32], index: 14, kind: input, shape index: {}]   ;;  %s3074_s15 = inlined_call_operand.vmem [shape: f32[32,16], index: 15, kind: input, shape index: {}]   ;;  %s3075_s16 = inlined_call_operand.vmem [shape: f32[1,16], index: 16, kind: input, shape index: {}]   ;;  %s3076_s17 = inlined_call_operand.hbm [shape: f32[2,16], index: 17, kind: output, shape index: {}]  }
   0x1   :  { %3079 = sst [smem:[#allocation19_spill]] %s3059_s0 }
   0x2   :  { %3080 = sst [smem:[#allocation20_spill]] %s3060_s1 }
   0x3   :  { %22 = vsyncpa [#allocation3], 0 }
   0x4   :  { %23 = vsyncpa [#allocation6], 0 }
   0x5   :  { %24 = vsyncpa [#allocation9], 0 }
   0x6   :  { %25 = vsyncpa [#allocation12], 0 }
   0x7   :  { %26 = vsyncpa [#allocation4], 0  ;;  %s52_s26 = sshll.u32 %s3064_s5, 4  ;;  %s2479_s27 = smov [#allocation5]   ;;  %s53_s26 = int_to_ptr.hbm [resolvable:$true] %s52_s26 }
   0x8   :  { %s54_s28 = sshll.u32 %s2479_s27, 4  ;;  %s82_s30 = sshll.u32 %s3068_s9, 4  ;;  %s55_s28 = int_to_ptr.vmem [resolvable:$true] %s54_s28  ;;  %s83_s30 = int_to_ptr.hbm [resolvable:$true] %s82_s30 }
   0x9   :  { %s2480_s18 = smov 128   ;;  %s2481_s19 = smov 8  }
   0xa   :  { %60 = dma.hbm_to_vmem [thread:$0]  %s53_s26, 512, %s55_s28, [#allocation6], %s2480_s18, %s2480_s18, %s2481_s19  }
   0xb   :  { %s2482_s1 = smov [#allocation8]   ;;  %s35_s5 = sshll.u32 %s3061_s2, 4  ;;  %s36_s5 = int_to_ptr.hbm [resolvable:$true] %s35_s5 }
   0xc   :  { %s84_s20 = sshll.u32 %s2482_s1, 4  ;;  %s65_s24 = sshll.u32 %s3065_s6, 4  ;;  %s85_s20 = int_to_ptr.vmem [resolvable:$true] %s84_s20  ;;  %s66_s24 = int_to_ptr.hbm [resolvable:$true] %s65_s24 }
   0xd   :  { %90 = dma.hbm_to_vmem [thread:$0]  %s83_s30, 512, %s85_s20, [#allocation9], %s2480_s18, %s2480_s18, %s2481_s19  }
   0xe   :  { %s2483_s25 = smov [#allocation2]   ;;  %s2484_s26 = smov [#allocation7]  }
   0xf   :  { %s37_s27 = sshll.u32 %s2483_s25, 4  ;;  %s67_s2 = sshll.u32 %s2484_s26, 4  ;;  %s38_s27 = int_to_ptr.vmem [resolvable:$true] %s37_s27  ;;  %s68_s2 = int_to_ptr.vmem [resolvable:$true] %s67_s2 }
  0x10   :  { %43 = dma.hbm_to_vmem [thread:$0]  %s36_s5, 512, %s38_s27, [#allocation3], %s2480_s18, %s2480_s18, %s2481_s19  }
  0x11   :  { %s95_s0 = sshll.u32 %s3069_s10, 4  ;;  %s112_s1 = sshll.u32 %s3072_s13, 4  ;;  %s96_s0 = int_to_ptr.hbm [resolvable:$true] %s95_s0  ;;  %s113_s1 = int_to_ptr.hbm [resolvable:$true] %s112_s1 }
  0x12   :  { %73 = dma.hbm_to_vmem [thread:$0]  %s66_s24, 512, %s68_s2, [#allocation6], %s2480_s18, %s2480_s18, %s2481_s19  }
  0x13   :  { %s2485_s20 = smov [#allocation10]   ;;  %s2486_s22 = smov [#allocation11]  }
  0x14   :  { %s97_s21 = sshll.u32 %s2485_s20, 4  ;;  %s114_s10 = sshll.u32 %s2486_s22, 4  ;;  %s98_s21 = int_to_ptr.vmem [resolvable:$true] %s97_s21  ;;  %s115_s10 = int_to_ptr.vmem [resolvable:$true] %s114_s10 }
  0x15   :  { %103 = dma.hbm_to_vmem [thread:$0]  %s96_s0, 512, %s98_s21, [#allocation9], %s2480_s18, %s2480_s18, %s2481_s19  }
  0x16   :  { %120 = dma.hbm_to_vmem [thread:$0]  %s113_s1, 512, %s115_s10, [#allocation12], %s2480_s18, %s2480_s18, %s2481_s19  }
  0x17   :  { %2469 = dma.done.wait [#allocation3], 512  }
  0x18   :  { %2470 = vsyncadd [#allocation3], 4294966784 }
  0x19   :  { %2471 = dma.done.wait [#allocation6], 1024  }
  0x1a   :  { %2472 = vsyncadd [#allocation6], 4294966272 }
  0x1b   :  { %2473 = dma.done.wait [#allocation9], 1024  }
  0x1c   :  { %2474 = vsyncadd [#allocation9], 4294966272 }
  0x1d   :  { %2475 = dma.done.wait [#allocation12], 512  }
  0x1e   :  { %2476 = vsyncadd [#allocation12], 4294966784  ;;  %s3081_s9 = sld [smem:[#allocation20_spill]]  ;;  %v160_v1 = vld [vmem:[#allocation2 + $0x18] sm:$0xff]  ;;  %v159_v3 = vld [vmem:[#allocation2 + $0x10] sm:$0xff]  ;;  %vm166_vm0 = vcmask 261120  }
  0x1f   :  { %211 = vmatpush.msra.mxu1 %v160_v1  ;;  %v158_v5 = vld [vmem:[#allocation2 + $0x8] sm:$0xff]  ;;  %v157_v7 = vld [vmem:[#allocation2] sm:$0xff]  ;;  %281 = vmatpush.msra.mxu2 %v160_v1  ;;  %s3082_s28 = sld [smem:[#allocation19_spill]]  ;;  %s2487_s6 = smov 64   ;;  %v2488_v10 = vmov 0.0   ;;  %vm761_vm13 = vcmask 1041408  }
  0x20   :  { %353 = vmatpush.msra.mxu3 %v160_v1  ;;  %v2149_v9 = vld [vmem:[%s3063_s4] ss:$0 sm:$0xff]  ;;  %vm763_vm14 = vcmask 1043456   ;;  %s2490_s0 = smov [#allocation13]  }
  0x21   :  { %212 = vmatpush.msra.mxu1 %v159_v3  ;;  %282 = vmatpush.msra.mxu2 %v159_v3  ;;  %v2645_v14 = vld [vmem:[%s3062_s3] ss:$0 sm:$0xff]  ;;  %s2489_s3 = smov 96  }
  0x22   :  { %354 = vmatpush.msra.mxu3 %v159_v3  ;;  %241 = vrot.lane.b32.xlu0 %v2149_v9, %s2487_s6 }
  0x23   :  { %213 = vmatpush.msra.mxu1 %v158_v5  ;;  %283 = vmatpush.msra.mxu2 %v158_v5 }
  0x24   :  { %v156_v0 = vld [vmem:[%s3081_s9 + $0x18] sm:$0xff]  ;;  %v155_v2 = vld [vmem:[%s3081_s9 + $0x10] sm:$0xff]  ;;  %v154_v4 = vld [vmem:[%s3081_s9 + $0x8] sm:$0xff]  ;;  %355 = vmatpush.msra.mxu3 %v158_v5 }
  0x25   :  { %185 = vmatpush.msra.mxu0 %v156_v0  ;;  %v153_v6 = vld [vmem:[%s3081_s9] sm:$0xff]  ;;  %214 = vmatpush.msra.mxu1 %v157_v7 }
  0x26   :  { %v151_v8 = vld [vmem:[%s3082_s28] sm:$0xff]  ;;  %215 = vmatmul.f32.vlgmr.msra.gmra.mxu1 %v2488_v10  ;;  %284 = vmatpush.msra.mxu2 %v157_v7 }
  0x27   :  { %186 = vmatpush.msra.mxu0 %v155_v2  ;;  %425 = vmatpush.msrb.mxu1 %v160_v1 }
  0x28   :  { %497 = vmatpush.msrb.mxu2 %v160_v1  ;;  %356 = vmatpush.msra.mxu3 %v157_v7 }
  0x29   :  { %187 = vmatpush.msra.mxu0 %v154_v4  ;;  %426 = vmatpush.msrb.mxu1 %v159_v3 }
  0x2a   :  { %498 = vmatpush.msrb.mxu2 %v159_v3  ;;  %563 = vmatpush.msrb.mxu3 %v160_v1 }
  0x2b   :  { %188 = vmatpush.msra.mxu0 %v153_v6  ;;  %427 = vmatpush.msrb.mxu1 %v158_v5 }
  0x2c   :  { %2084 = vmatmul.msk.f32.vlgmr.msra.gmra.mxu0 %vm166_vm0, %v151_v8  ;;  %499 = vmatpush.msrb.mxu2 %v158_v5 }
  0x2d   :  { %635 = vmatpush.msrb.mxu0 %v160_v1  ;;  %564 = vmatpush.msrb.mxu3 %v159_v3 }
  0x2e   :  { %428 = vmatpush.msrb.mxu1 %v157_v7  ;;  %500 = vmatpush.msrb.mxu2 %v157_v7 }
  0x2f   :  { %636 = vmatpush.msrb.mxu0 %v159_v3  ;;  %565 = vmatpush.msrb.mxu3 %v158_v5 }
  0x30   :  { %707 = vmatpush.msra.mxu1 %v160_v1 }
  0x31   :  { %637 = vmatpush.msrb.mxu0 %v158_v5  ;;  %566 = vmatpush.msrb.mxu3 %v157_v7 }
  0x32   :  { %708 = vmatpush.msra.mxu1 %v159_v3 }
  0x33   :  { %638 = vmatpush.msrb.mxu0 %v157_v7 }
  0x34   :  { %709 = vmatpush.msra.mxu1 %v158_v5 }
  0x36   :  { %710 = vmatpush.msra.mxu1 %v157_v7 }
  0x94   :  { %v2638_v11 = vpop.permute.xlu0 %241 }
  0xa3   :  { %v216_v12 = vpop.f32.mrf.mxu1 }
  0xa4   :  { %v244_v13 = vadd.f32 %v2638_v11, %v216_v12 }
  0xa6   :  { %246 = vrot.lane.b32.xlu0 %v244_v13, %s2487_s6 }
  0xa9   :  { %v190_v15 = vpop.f32.mrf.mxu0 }
  0xaa   :  { %v2648_v16 = vadd.f32 %v2645_v14, %v190_v15 }
  0xac   :  { %v219_v17 = vadd.f32 %v216_v12, %v2648_v16 }
  0xae   :  { %v2086_v18 = vmul.f32 -1.442695, %v219_v17 }
  0xb0   :  { %2157 = vpow2.f32 %v2086_v18 }
  0xb6   :  { %v2158_v19 = vpop.eup %2157 }
  0xb7   :  { %v223_v20 = vadd.f32 1.0, %v2158_v19 }
  0xb9   :  { %2159 = vrcp.f32 %v223_v20  ;;  %v235_v26 = vand.u32 2147483648, %v223_v20  ;;  %vm229_vm2 = vweird.f32 %v223_v20  ;;  %v233_v27 = vand.u32 2147483647, %v223_v20 }
  0xbb   :  { %v236_v29 = vor.u32 1.1754944e-38, %v235_v26  ;;  %vm234_vm4 = vcmp.eq.f32.partialorder %v233_v27, 8.507059e+37 }
  0xbf   :  { %v2160_v21 = vpop.eup %2159 }
  0xc0   :  { %v225_v22 = vmul.f32 %v2160_v21, %v223_v20  ;;  %vm230_vm1 = vweird.f32 %v2160_v21 }
  0xc1   :  { %vm231_vm3 = vmor %vm229_vm2, %vm230_vm1 }
  0xc2   :  { %v226_v23 = vsub.f32 1.0, %v225_v22 }
  0xc4   :  { %v227_v24 = vmul.f32 %v2160_v21, %v226_v23 }
  0xc6   :  { %v228_v25 = vadd.f32 %v2160_v21, %v227_v24 }
  0xc8   :  { %v232_v28 = vsel %vm231_vm3, %v2160_v21, %v228_v25 }
  0xc9   :  { %v237_v31 = vsel %vm234_vm4, %v236_v29, %v232_v28  ;;  %vm765_vm4 = vcmask 1045504  }
  0xca   :  { %v256_v36 = vsub.f32 1.0, %v237_v31  ;;  %v262_v38 = vmul.f32 0.0, %v237_v31 }
 0x118   :  { %v247_v30 = vpop.permute.xlu0 %246 }
 0x119   :  { %v249_v32 = vmul.f32 %v247_v30, %v237_v31 }
 0x11b   :  { %251 = vrot.lane.b32.xlu1 %v249_v32, %s2487_s6 }
 0x18d   :  { %v252_v33 = vpop.permute.xlu1 %251 }
 0x18e   :  { %v254_v34 = vadd.f32 %v252_v33, %v2648_v16 }
 0x190   :  { %2161 = vtanh.f32 %v254_v34 }
 0x196   :  { %v2162_v35 = vpop.eup %2161 }
 0x197   :  { %258 = vrot.lane.b32.xlu1 %v2162_v35, %s2489_s3 }
 0x209   :  { %v259_v37 = vpop.permute.xlu1 %258 }
 0x20a   :  { %v261_v39 = vmul.f32 %v259_v37, %v256_v36 }
 0x20c   :  { %v2654_v40 = vadd.f32 %v262_v38, %v261_v39 }
 0x20e   :  { %265 = vrot.lane.b32.xlu2 %v2654_v40, %s2489_s3  ;;  %v331_v2 = vrot.slane %v2654_v40, 6 }
 0x268   :  { %v266_v41 = vpop.permute.xlu2 %265 }
 0x269   :  { %2087 = vmatmul.msk.f32.vlgmr.msra.gmra.mxu2 %vm166_vm0, %v266_v41 }
 0x2ec   :  { %v286_v42 = vpop.f32.mrf.mxu2 }
 0x2ed   :  { %v312_v43 = vadd.f32 %v286_v42, %v2638_v11  ;;  %v290_v45 = vrot.slane %v286_v42, 6 }
 0x2ef   :  { %v314_v44 = vrot.slane %v312_v43, 6  ;;  %v292_v46 = vadd.f32 %v290_v45, %v2648_v16 }
 0x2f1   :  { %315 = vrot.lane.b32.xlu2 %v314_v44, %s2487_s6  ;;  %v2088_v47 = vmul.f32 -1.442695, %v292_v46 }
 0x2f3   :  { %2163 = vpow2.f32 %v2088_v47 }
 0x2f9   :  { %v2164_v48 = vpop.eup %2163 }
 0x2fa   :  { %v296_v49 = vadd.f32 1.0, %v2164_v48 }
 0x2fc   :  { %2165 = vrcp.f32 %v296_v49  ;;  %v308_v55 = vand.u32 2147483648, %v296_v49  ;;  %vm302_vm6 = vweird.f32 %v296_v49  ;;  %v306_v56 = vand.u32 2147483647, %v296_v49 }
 0x2fe   :  { %v309_v58 = vor.u32 1.1754944e-38, %v308_v55  ;;  %vm307_vm8 = vcmp.eq.f32.partialorder %v306_v56, 8.507059e+37 }
 0x302   :  { %v2166_v50 = vpop.eup %2165 }
 0x303   :  { %v298_v51 = vmul.f32 %v2166_v50, %v296_v49  ;;  %vm303_vm5 = vweird.f32 %v2166_v50 }
 0x304   :  { %vm304_vm7 = vmor %vm302_vm6, %vm303_vm5 }
 0x305   :  { %v299_v52 = vsub.f32 1.0, %v298_v51 }
 0x307   :  { %v300_v53 = vmul.f32 %v2166_v50, %v299_v52 }
 0x309   :  { %v301_v54 = vadd.f32 %v2166_v50, %v300_v53 }
 0x30b   :  { %v305_v57 = vsel %vm304_vm7, %v2166_v50, %v301_v54 }
 0x30c   :  { %v310_v60 = vsel %vm307_vm8, %v309_v58, %v305_v57 }
 0x30d   :  { %v325_v1 = vsub.f32 1.0, %v310_v60  ;;  %v333_v5 = vmul.f32 %v331_v2, %v310_v60 }
 0x34b   :  { %v316_v59 = vpop.permute.xlu2 %315 }
 0x34c   :  { %v318_v61 = vmul.f32 %v316_v59, %v310_v60 }
 0x34e   :  { %320 = vrot.lane.b32.xlu0 %v318_v61, %s2487_s6 }
 0x3c0   :  { %v321_v62 = vpop.permute.xlu0 %320 }
 0x3c1   :  { %v323_v63 = vadd.f32 %v321_v62, %v2648_v16 }
 0x3c3   :  { %2167 = vtanh.f32 %v323_v63 }
 0x3c9   :  { %v2168_v0 = vpop.eup %2167 }
 0x3ca   :  { %327 = vrot.lane.b32.xlu1 %v2168_v0, %s2489_s3 }
 0x43c   :  { %v328_v3 = vpop.permute.xlu1 %327 }
 0x43d   :  { %v330_v4 = vmul.f32 %v328_v3, %v325_v1 }
 0x43f   :  { %v334_v6 = vadd.f32 %v333_v5, %v330_v4 }
 0x441   :  { %v336_v7 = vrot.slane %v334_v6, 2  ;;  %v403_v37 = vrot.slane %v334_v6, 6  ;;  %v762_v43 = vsel %vm761_vm13, %v2654_v40, %v334_v6 }
 0x443   :  { %337 = vrot.lane.b32.xlu2 %v336_v7, %s2489_s3 }
 0x49d   :  { %v338_v8 = vpop.permute.xlu2 %337 }
 0x49e   :  { %2089 = vmatmul.msk.f32.vlgmr.msra.gmra.mxu3 %vm166_vm0, %v338_v8 }
 0x521   :  { %v358_v9 = vpop.f32.mrf.mxu3 }
 0x522   :  { %v384_v12 = vadd.f32 %v358_v9, %v2638_v11  ;;  %v362_v15 = vrot.slane %v358_v9, 4 }
 0x524   :  { %v386_v13 = vrot.slane %v384_v12, 4  ;;  %v364_v17 = vadd.f32 %v362_v15, %v2648_v16 }
 0x526   :  { %387 = vrot.lane.b32.xlu0 %v386_v13, %s2487_s6  ;;  %v2090_v18 = vmul.f32 -1.442695, %v364_v17 }
 0x528   :  { %2169 = vpow2.f32 %v2090_v18 }
 0x52e   :  { %v2170_v19 = vpop.eup %2169 }
 0x52f   :  { %v368_v20 = vadd.f32 1.0, %v2170_v19 }
 0x531   :  { %2171 = vrcp.f32 %v368_v20  ;;  %v380_v26 = vand.u32 2147483648, %v368_v20  ;;  %vm374_vm10 = vweird.f32 %v368_v20  ;;  %v378_v27 = vand.u32 2147483647, %v368_v20 }
 0x533   :  { %v381_v29 = vor.u32 1.1754944e-38, %v380_v26  ;;  %vm379_vm12 = vcmp.eq.f32.partialorder %v378_v27, 8.507059e+37 }
 0x537   :  { %v2172_v21 = vpop.eup %2171 }
 0x538   :  { %v370_v22 = vmul.f32 %v2172_v21, %v368_v20  ;;  %vm375_vm9 = vweird.f32 %v2172_v21 }
 0x539   :  { %vm376_vm11 = vmor %vm374_vm10, %vm375_vm9 }
 0x53a   :  { %v371_v23 = vsub.f32 1.0, %v370_v22 }
 0x53c   :  { %v372_v24 = vmul.f32 %v2172_v21, %v371_v23 }
 0x53e   :  { %v373_v25 = vadd.f32 %v2172_v21, %v372_v24 }
 0x540   :  { %v377_v28 = vsel %vm376_vm11, %v2172_v21, %v373_v25 }
 0x541   :  { %v382_v31 = vsel %vm379_vm12, %v381_v29, %v377_v28 }
 0x542   :  { %v397_v36 = vsub.f32 1.0, %v382_v31  ;;  %v405_v39 = vmul.f32 %v403_v37, %v382_v31 }
 0x598   :  { %v388_v30 = vpop.permute.xlu0 %387 }
 0x599   :  { %v390_v32 = vmul.f32 %v388_v30, %v382_v31 }
 0x59b   :  { %392 = vrot.lane.b32.xlu1 %v390_v32, %s2487_s6 }
 0x60d   :  { %v393_v33 = vpop.permute.xlu1 %392 }
 0x60e   :  { %v395_v34 = vadd.f32 %v393_v33, %v2648_v16 }
 0x610   :  { %2173 = vtanh.f32 %v395_v34 }
 0x616   :  { %v2174_v35 = vpop.eup %2173 }
 0x617   :  { %399 = vrot.lane.b32.xlu2 %v2174_v35, %s2489_s3 }
 0x671   :  { %v400_v38 = vpop.permute.xlu2 %399 }
 0x672   :  { %v402_v41 = vmul.f32 %v400_v38, %v397_v36  ;;  %v775_v38 = vld [vmem:[#allocation5 + $0x18] sm:$0xff] }
 0x673   :  { %807 = vmatpush.msra.mxu2 %v775_v38 }
 0x674   :  { %v406_v42 = vadd.f32 %v405_v39, %v402_v41  ;;  %v774_v39 = vld [vmem:[#allocation5 + $0x10] sm:$0xff]  ;;  %v773_v41 = vld [vmem:[#allocation5 + $0x8] sm:$0xff] }
 0x675   :  { %808 = vmatpush.msra.mxu2 %v774_v39 }
 0x676   :  { %v408_v44 = vrot.slane %v406_v42, 4  ;;  %v764_v45 = vsel %vm763_vm14, %v762_v43, %v406_v42  ;;  %v475_v6 = vrot.slane %v406_v42, 6  ;;  %v772_v42 = vld [vmem:[#allocation5] sm:$0xff] }
 0x677   :  { %809 = vmatpush.msra.mxu2 %v773_v41 }
 0x678   :  { %409 = vrot.lane.b32.xlu0 %v408_v44, %s2489_s3 }
 0x679   :  { %810 = vmatpush.msra.mxu2 %v772_v42 }
 0x6ea   :  { %v410_v46 = vpop.permute.xlu0 %409 }
 0x6eb   :  { %2091 = vmatmul.msk.f32.vlgmr.msrb.gmra.mxu1 %vm166_vm0, %v410_v46 }
 0x768   :  { %v430_v47 = vpop.f32.mrf.mxu1 }
 0x769   :  { %v456_v48 = vadd.f32 %v430_v47, %v2638_v11  ;;  %v434_v50 = vrot.slane %v430_v47, 2 }
 0x76b   :  { %v458_v49 = vrot.slane %v456_v48, 2  ;;  %v436_v51 = vadd.f32 %v434_v50, %v2648_v16 }
 0x76d   :  { %459 = vrot.lane.b32.xlu1 %v458_v49, %s2487_s6  ;;  %v2092_v52 = vmul.f32 -1.442695, %v436_v51 }
 0x76f   :  { %2175 = vpow2.f32 %v2092_v52  ;;  %v2707_v52 = vld [vmem:[#allocation7 + $0x18] sm:$0xff] }
 0x770   :  { %830 = vmatpush.msra.mxu3 %v2707_v52  ;;  %900 = vmatpush.msra.mxu0 %v2707_v52 }
 0x771   :  { %972 = vmatpush.msrb.mxu1 %v2707_v52 }
 0x775   :  { %v2176_v40 = vpop.eup %2175 }
 0x776   :  { %v440_v53 = vadd.f32 1.0, %v2176_v40  ;;  %v2709_v40 = vld [vmem:[#allocation7 + $0x10] sm:$0xff] }
 0x777   :  { %831 = vmatpush.msra.mxu3 %v2709_v40  ;;  %901 = vmatpush.msra.mxu0 %v2709_v40 }
 0x778   :  { %2177 = vrcp.f32 %v440_v53  ;;  %v452_v59 = vand.u32 2147483648, %v440_v53  ;;  %vm446_vm1 = vweird.f32 %v440_v53  ;;  %v450_v60 = vand.u32 2147483647, %v440_v53  ;;  %973 = vmatpush.msrb.mxu1 %v2709_v40 }
 0x77a   :  { %v453_v62 = vor.u32 1.1754944e-38, %v452_v59  ;;  %vm451_vm3 = vcmp.eq.f32.partialorder %v450_v60, 8.507059e+37 }
 0x77e   :  { %v2178_v54 = vpop.eup %2177 }
 0x77f   :  { %v442_v55 = vmul.f32 %v2178_v54, %v440_v53  ;;  %vm447_vm15 = vweird.f32 %v2178_v54  ;;  %v2713_v53 = vld [vmem:[#allocation7 + $0x8] sm:$0xff] }
 0x780   :  { %vm448_vm2 = vmor %vm446_vm1, %vm447_vm15  ;;  %832 = vmatpush.msra.mxu3 %v2713_v53  ;;  %902 = vmatpush.msra.mxu0 %v2713_v53 }
 0x781   :  { %v443_v56 = vsub.f32 1.0, %v442_v55  ;;  %974 = vmatpush.msrb.mxu1 %v2713_v53  ;;  %v2152_v55 = vld [vmem:[%s3067_s8] ss:$0 sm:$0xff] }
 0x783   :  { %v444_v57 = vmul.f32 %v2178_v54, %v443_v56 }
 0x785   :  { %v445_v58 = vadd.f32 %v2178_v54, %v444_v57 }
 0x787   :  { %v449_v61 = vsel %vm448_vm2, %v2178_v54, %v445_v58  ;;  %v2719_v54 = vld [vmem:[#allocation7] sm:$0xff] }
 0x788   :  { %v454_v0 = vsel %vm451_vm3, %v453_v62, %v449_v61  ;;  %833 = vmatpush.msra.mxu3 %v2719_v54  ;;  %903 = vmatpush.msra.mxu0 %v2719_v54 }
 0x789   :  { %v469_v5 = vsub.f32 1.0, %v454_v0  ;;  %v477_v8 = vmul.f32 %v475_v6, %v454_v0  ;;  %975 = vmatpush.msrb.mxu1 %v2719_v54 }
 0x7df   :  { %v460_v63 = vpop.permute.xlu1 %459 }
 0x7e0   :  { %v462_v1 = vmul.f32 %v460_v63, %v454_v0 }
 0x7e2   :  { %464 = vrot.lane.b32.xlu2 %v462_v1, %s2487_s6 }
 0x83c   :  { %v465_v2 = vpop.permute.xlu2 %464 }
 0x83d   :  { %v467_v3 = vadd.f32 %v465_v2, %v2648_v16  ;;  %v152_v16 = vld [vmem:[%s3082_s28 + $0x8] sm:$0xff] }
 0x83e   :  { %2085 = vmatmul.msk.f32.gmra.mxu0 %vm166_vm0, %v152_v16 }
 0x83f   :  { %2179 = vtanh.f32 %v467_v3 }
 0x845   :  { %v2180_v4 = vpop.eup %2179 }
 0x846   :  { %471 = vrot.lane.b32.xlu0 %v2180_v4, %s2489_s3  ;;  %v2755_v4 = vld [vmem:[%s3066_s7] ss:$0 sm:$0xff] }
 0x8b8   :  { %v472_v7 = vpop.permute.xlu0 %471 }
 0x8b9   :  { %v474_v9 = vmul.f32 %v472_v7, %v469_v5 }
 0x8bb   :  { %v478_v12 = vadd.f32 %v477_v8, %v474_v9  ;;  %v193_v20 = vpop.f32.mrf.mxu0 }
 0x8bc   :  { %v2695_v21 = vadd.f32 %v2645_v14, %v193_v20 }
 0x8bd   :  { %v480_v13 = vrot.slane %v478_v12, 6  ;;  %v766_v15 = vsel %vm765_vm4, %v764_v45, %v478_v12 }
 0x8be   :  { %v770_v37 = vmax.f32 %v766_v15, 0.0 }
 0x8bf   :  { %481 = vrot.lane.b32.xlu1 %v480_v13, %s2489_s3 }
 0x931   :  { %v482_v17 = vpop.permute.xlu1 %481 }
 0x932   :  { %2093 = vmatmul.msk.f32.vlgmr.msrb.gmra.mxu2 %vm166_vm0, %v482_v17 }
 0x933   :  { %1254 = vmatpush.msrb.mxu2 %v2707_v52 }
 0x935   :  { %1255 = vmatpush.msrb.mxu2 %v2709_v40 }
 0x937   :  { %1256 = vmatpush.msrb.mxu2 %v2713_v53 }
 0x939   :  { %1257 = vmatpush.msrb.mxu2 %v2719_v54 }
 0x9b5   :  { %v502_v18 = vpop.f32.mrf.mxu2 }
 0x9b6   :  { %v525_v19 = vadd.f32 %v502_v18, %v2638_v11  ;;  %v505_v22 = vadd.f32 %v502_v18, %v2695_v21 }
 0x9b8   :  { %527 = vrot.lane.b32.xlu2 %v525_v19, %s2487_s6  ;;  %v2094_v23 = vmul.f32 -1.442695, %v505_v22 }
 0x9ba   :  { %2181 = vpow2.f32 %v2094_v23 }
 0x9c0   :  { %v2182_v24 = vpop.eup %2181 }
 0x9c1   :  { %v509_v25 = vadd.f32 1.0, %v2182_v24 }
 0x9c3   :  { %2183 = vrcp.f32 %v509_v25  ;;  %v521_v31 = vand.u32 2147483648, %v509_v25  ;;  %vm515_vm6 = vweird.f32 %v509_v25  ;;  %v519_v32 = vand.u32 2147483647, %v509_v25 }
 0x9c5   :  { %v522_v14 = vor.u32 1.1754944e-38, %v521_v31  ;;  %vm520_vm8 = vcmp.eq.f32.partialorder %v519_v32, 8.507059e+37 }
 0x9c9   :  { %v2184_v26 = vpop.eup %2183 }
 0x9ca   :  { %v511_v27 = vmul.f32 %v2184_v26, %v509_v25  ;;  %vm516_vm5 = vweird.f32 %v2184_v26 }
 0x9cb   :  { %vm517_vm7 = vmor %vm515_vm6, %vm516_vm5 }
 0x9cc   :  { %v512_v28 = vsub.f32 1.0, %v511_v27 }
 0x9ce   :  { %v513_v29 = vmul.f32 %v2184_v26, %v512_v28 }
 0x9d0   :  { %v514_v30 = vadd.f32 %v2184_v26, %v513_v29 }
 0x9d2   :  { %v518_v33 = vsel %vm517_vm7, %v2184_v26, %v514_v30 }
 0x9d3   :  { %v523_v35 = vsel %vm520_vm8, %v522_v14, %v518_v33 }
 0x9d4   :  { %v537_v47 = vsub.f32 1.0, %v523_v35  ;;  %v544_v49 = vmul.f32 %v523_v35, %v480_v13 }
 0xa12   :  { %v528_v34 = vpop.permute.xlu2 %527 }
 0xa13   :  { %v530_v36 = vmul.f32 %v528_v34, %v523_v35 }
 0xa15   :  { %532 = vrot.lane.b32.xlu0 %v530_v36, %s2487_s6 }
 0xa1d   :  { %787 = vrot.lane.b32.xlu0 %v770_v37, %s2489_s3 }
 0xa87   :  { %v533_v43 = vpop.permute.xlu0 %532 }
 0xa88   :  { %v535_v44 = vadd.f32 %v533_v43, %v2695_v21 }
 0xa8a   :  { %2185 = vtanh.f32 %v535_v44 }
 0xa8f   :  { %v788_v45 = vpop.permute.xlu0 %787 }
 0xa90   :  { %v2186_v46 = vpop.eup %2185  ;;  %2101 = vmatmul.msk.f32.vlgmr.msra.gmra.mxu2 %vm166_vm0, %v788_v45 }
 0xa91   :  { %539 = vrot.lane.b32.xlu1 %v2186_v46, %s2489_s3 }
 0xa99   :  { %860 = vrot.lane.b32.xlu1 %v2152_v55, %s2487_s6 }
 0xb03   :  { %v540_v48 = vpop.permute.xlu1 %539 }
 0xb04   :  { %v542_v50 = vmul.f32 %v540_v48, %v537_v47 }
 0xb06   :  { %v2703_v51 = vadd.f32 %v544_v49, %v542_v50 }
 0xb08   :  { %547 = vrot.lane.b32.xlu2 %v2703_v51, %s2489_s3  ;;  %v613_v46 = vrot.slane %v2703_v51, 6 }
 0xb0b   :  { %v2747_v60 = vpop.permute.xlu1 %860 }
 0xb13   :  { %v812_v5 = vpop.f32.mrf.mxu2 }
 0xb14   :  { %v2758_v7 = vadd.f32 %v2755_v4, %v812_v5 }
 0xb62   :  { %v548_v56 = vpop.permute.xlu2 %547 }
 0xb63   :  { %2095 = vmatmul.msk.f32.vlgmr.msrb.gmra.mxu3 %vm166_vm0, %v548_v56 }
 0xb64   :  { %1044 = vmatpush.msrb.mxu3 %v2707_v52 }
 0xb66   :  { %1045 = vmatpush.msrb.mxu3 %v2709_v40 }
 0xb68   :  { %1046 = vmatpush.msrb.mxu3 %v2713_v53 }
 0xb6a   :  { %1047 = vmatpush.msrb.mxu3 %v2719_v54 }
 0xb6b   :  { %834 = vmatmul.f32.vlgmr.msra.gmra.mxu3 %v2488_v10 }
 0xb6c   :  { %1326 = vmatpush.msra.mxu3 %v2707_v52 }
 0xb6e   :  { %1327 = vmatpush.msra.mxu3 %v2709_v40 }
 0xb70   :  { %1328 = vmatpush.msra.mxu3 %v2713_v53 }
 0xb72   :  { %1329 = vmatpush.msra.mxu3 %v2719_v54 }
 0xbe6   :  { %v568_v57 = vpop.f32.mrf.mxu3 }
 0xbe7   :  { %v594_v58 = vadd.f32 %v568_v57, %v2638_v11  ;;  %v572_v63 = vrot.slane %v568_v57, 6 }
 0xbe9   :  { %v596_v59 = vrot.slane %v594_v58, 6  ;;  %v574_v0 = vadd.f32 %v572_v63, %v2695_v21 }
 0xbeb   :  { %597 = vrot.lane.b32.xlu2 %v596_v59, %s2487_s6  ;;  %v2096_v1 = vmul.f32 -1.442695, %v574_v0 }
 0xbed   :  { %2187 = vpow2.f32 %v2096_v1 }
 0xbee   :  { %v835_v61 = vpop.f32.mrf.mxu3 }
 0xbef   :  { %v863_v62 = vadd.f32 %v2747_v60, %v835_v61  ;;  %v838_v8 = vadd.f32 %v835_v61, %v2758_v7 }
 0xbf1   :  { %865 = vrot.lane.b32.xlu0 %v863_v62, %s2487_s6  ;;  %v2103_v12 = vmul.f32 -1.442695, %v838_v8 }
 0xbf3   :  { %v2188_v2 = vpop.eup %2187 }
 0xbf4   :  { %v578_v3 = vadd.f32 1.0, %v2188_v2 }
 0xbf6   :  { %2189 = vrcp.f32 %v578_v3  ;;  %v590_v17 = vand.u32 2147483648, %v578_v3  ;;  %vm584_vm10 = vweird.f32 %v578_v3  ;;  %v588_v19 = vand.u32 2147483647, %v578_v3 }
 0xbf7   :  { %2191 = vpow2.f32 %v2103_v12 }
 0xbf8   :  { %v591_v23 = vor.u32 1.1754944e-38, %v590_v17  ;;  %vm589_vm12 = vcmp.eq.f32.partialorder %v588_v19, 8.507059e+37 }
 0xbfc   :  { %v2190_v6 = vpop.eup %2189 }
 0xbfd   :  { %v580_v9 = vmul.f32 %v2190_v6, %v578_v3  ;;  %vm585_vm9 = vweird.f32 %v2190_v6  ;;  %v2192_v18 = vpop.eup %2191 }
 0xbfe   :  { %vm586_vm11 = vmor %vm584_vm10, %vm585_vm9  ;;  %v842_v22 = vadd.f32 1.0, %v2192_v18 }
 0xbff   :  { %v581_v13 = vsub.f32 1.0, %v580_v9 }
 0xc00   :  { %2193 = vrcp.f32 %v842_v22  ;;  %v854_v32 = vand.u32 2147483648, %v842_v22  ;;  %vm848_vm1 = vweird.f32 %v842_v22  ;;  %v852_v33 = vand.u32 2147483647, %v842_v22 }
 0xc01   :  { %v582_v15 = vmul.f32 %v2190_v6, %v581_v13 }
 0xc02   :  { %v855_v34 = vor.u32 1.1754944e-38, %v854_v32  ;;  %vm853_vm3 = vcmp.eq.f32.partialorder %v852_v33, 8.507059e+37 }
 0xc03   :  { %v583_v16 = vadd.f32 %v2190_v6, %v582_v15 }
 0xc05   :  { %v587_v20 = vsel %vm586_vm11, %v2190_v6, %v583_v16 }
 0xc06   :  { %v592_v25 = vsel %vm589_vm12, %v591_v23, %v587_v20  ;;  %v2194_v27 = vpop.eup %2193 }
 0xc07   :  { %v844_v28 = vmul.f32 %v2194_v27, %v842_v22  ;;  %vm849_vm15 = vweird.f32 %v2194_v27  ;;  %v607_v45 = vsub.f32 1.0, %v592_v25  ;;  %v615_v48 = vmul.f32 %v613_v46, %v592_v25 }
 0xc08   :  { %vm850_vm2 = vmor %vm848_vm1, %vm849_vm15 }
 0xc09   :  { %v845_v29 = vsub.f32 1.0, %v844_v28 }
 0xc0b   :  { %v846_v30 = vmul.f32 %v2194_v27, %v845_v29 }
 0xc0d   :  { %v847_v31 = vadd.f32 %v2194_v27, %v846_v30 }
 0xc0f   :  { %v851_v14 = vsel %vm850_vm2, %v2194_v27, %v847_v31 }
 0xc10   :  { %v856_v35 = vsel %vm853_vm3, %v855_v34, %v851_v14 }
 0xc11   :  { %v875_v55 = vsub.f32 1.0, %v856_v35  ;;  %v881_v58 = vmul.f32 0.0, %v856_v35 }
 0xc45   :  { %v598_v24 = vpop.permute.xlu2 %597 }
 0xc46   :  { %v600_v26 = vmul.f32 %v598_v24, %v592_v25 }
 0xc48   :  { %602 = vrot.lane.b32.xlu1 %v600_v26, %s2487_s6 }
 0xc63   :  { %v866_v36 = vpop.permute.xlu0 %865 }
 0xc64   :  { %v868_v37 = vmul.f32 %v866_v36, %v856_v35 }
 0xc66   :  { %870 = vrot.lane.b32.xlu2 %v868_v37, %s2487_s6 }
 0xcba   :  { %v603_v38 = vpop.permute.xlu1 %602 }
 0xcbb   :  { %v605_v39 = vadd.f32 %v603_v38, %v2695_v21 }
 0xcbd   :  { %2195 = vtanh.f32 %v605_v39 }
 0xcc0   :  { %v871_v41 = vpop.permute.xlu2 %870 }
 0xcc1   :  { %v873_v42 = vadd.f32 %v871_v41, %v2758_v7 }
 0xcc3   :  { %v2196_v43 = vpop.eup %2195  ;;  %2197 = vtanh.f32 %v873_v42 }
 0xcc4   :  { %609 = vrot.lane.b32.xlu0 %v2196_v43, %s2489_s3 }
 0xcc9   :  { %v2198_v44 = vpop.eup %2197 }
 0xcca   :  { %877 = vrot.lane.b32.xlu1 %v2198_v44, %s2489_s3 }
 0xd36   :  { %v610_v47 = vpop.permute.xlu0 %609 }
 0xd37   :  { %v612_v49 = vmul.f32 %v610_v47, %v607_v45 }
 0xd39   :  { %v2768_v50 = vadd.f32 %v615_v48, %v612_v49 }
 0xd3b   :  { %v618_v56 = vrot.slane %v2768_v50, 2 }
 0xd3c   :  { %v878_v57 = vpop.permute.xlu1 %877 }
 0xd3d   :  { %v880_v59 = vmul.f32 %v878_v57, %v875_v55  ;;  %619 = vrot.lane.b32.xlu2 %v618_v56, %s2489_s3 }
 0xd3f   :  { %v2772_v61 = vadd.f32 %v881_v58, %v880_v59  ;;  %v685_v58 = vrot.slane %v2768_v50, 6 }
 0xd41   :  { %884 = vrot.lane.b32.xlu0 %v2772_v61, %s2489_s3 }
 0xd97   :  { %v620_v62 = vpop.permute.xlu2 %619 }
 0xd98   :  { %2097 = vmatmul.msk.f32.vlgmr.msrb.gmra.mxu0 %vm166_vm0, %v620_v62 }
 0xd99   :  { %1116 = vmatpush.msrb.mxu0 %v2707_v52 }
 0xd9b   :  { %1117 = vmatpush.msrb.mxu0 %v2709_v40 }
 0xd9d   :  { %1118 = vmatpush.msrb.mxu0 %v2713_v53 }
 0xd9f   :  { %1119 = vmatpush.msrb.mxu0 %v2719_v54 }
 0xdb3   :  { %v885_v63 = vpop.permute.xlu0 %884 }
 0xdb4   :  { %2104 = vmatmul.msk.f32.vlgmr.msra.gmra.mxu0 %vm166_vm0, %v885_v63 }
 0xe15   :  { %v640_v0 = vpop.f32.mrf.mxu0 }
 0xe16   :  { %v666_v1 = vadd.f32 %v640_v0, %v2638_v11  ;;  %v644_v8 = vrot.slane %v640_v0, 4 }
 0xe18   :  { %v668_v2 = vrot.slane %v666_v1, 4  ;;  %v646_v9 = vadd.f32 %v644_v8, %v2695_v21  ;;  %v767_v1 = vsel %vm761_vm13, %v2703_v51, %v2768_v50 }
 0xe1a   :  { %669 = vrot.lane.b32.xlu1 %v668_v2, %s2487_s6  ;;  %v2098_v13 = vmul.f32 -1.442695, %v646_v9 }
 0xe1c   :  { %2199 = vpow2.f32 %v2098_v13 }
 0xe22   :  { %v2200_v17 = vpop.eup %2199 }
 0xe23   :  { %v650_v18 = vadd.f32 1.0, %v2200_v17 }
 0xe25   :  { %v662_v31 = vand.u32 2147483648, %v650_v18  ;;  %vm656_vm6 = vweird.f32 %v650_v18  ;;  %v660_v32 = vand.u32 2147483647, %v650_v18 }
 0xe27   :  { %v663_v34 = vor.u32 1.1754944e-38, %v662_v31  ;;  %vm661_vm9 = vcmp.eq.f32.partialorder %v660_v32, 8.507059e+37 }
 0xe31   :  { %v905_v3 = vpop.f32.mrf.mxu0 }
 0xe32   :  { %v931_v5 = vadd.f32 %v905_v3, %v2747_v60  ;;  %v909_v12 = vrot.slane %v905_v3, 6 }
 0xe34   :  { %v933_v6 = vrot.slane %v931_v5, 6  ;;  %v911_v15 = vadd.f32 %v909_v12, %v2758_v7 }
 0xe36   :  { %934 = vrot.lane.b32.xlu2 %v933_v6, %s2487_s6  ;;  %v2105_v16 = vmul.f32 -1.442695, %v911_v15  ;;  %v950_v6 = vrot.slane %v2772_v61, 6 }
 0xe38   :  { %2201 = vpow2.f32 %v2105_v16 }
 0xe39   :  { %2203 = vrcp.f32 %v650_v18 }
 0xe3e   :  { %v2202_v19 = vpop.eup %2201 }
 0xe3f   :  { %v915_v20 = vadd.f32 1.0, %v2202_v19  ;;  %v2204_v22 = vpop.eup %2203 }
 0xe40   :  { %v652_v23 = vmul.f32 %v2204_v22, %v650_v18  ;;  %vm657_vm5 = vweird.f32 %v2204_v22 }
 0xe41   :  { %2205 = vrcp.f32 %v915_v20  ;;  %vm658_vm7 = vmor %vm656_vm6, %vm657_vm5  ;;  %v927_v35 = vand.u32 2147483648, %v915_v20  ;;  %vm921_vm10 = vweird.f32 %v915_v20  ;;  %v925_v36 = vand.u32 2147483647, %v915_v20 }
 0xe42   :  { %v653_v25 = vsub.f32 1.0, %v652_v23 }
 0xe43   :  { %v928_v42 = vor.u32 1.1754944e-38, %v927_v35  ;;  %vm926_vm12 = vcmp.eq.f32.partialorder %v925_v36, 8.507059e+37 }
 0xe44   :  { %v654_v27 = vmul.f32 %v2204_v22, %v653_v25 }
 0xe46   :  { %v655_v29 = vadd.f32 %v2204_v22, %v654_v27 }
 0xe47   :  { %v2206_v24 = vpop.eup %2205 }
 0xe48   :  { %v917_v26 = vmul.f32 %v2206_v24, %v915_v20  ;;  %v659_v33 = vsel %vm658_vm7, %v2204_v22, %v655_v29  ;;  %vm922_vm8 = vweird.f32 %v2206_v24 }
 0xe49   :  { %v664_v38 = vsel %vm661_vm9, %v663_v34, %v659_v33  ;;  %vm923_vm11 = vmor %vm921_vm10, %vm922_vm8 }
 0xe4a   :  { %v918_v28 = vsub.f32 1.0, %v917_v26  ;;  %v679_v57 = vsub.f32 1.0, %v664_v38  ;;  %v687_v62 = vmul.f32 %v685_v58, %v664_v38 }
 0xe4c   :  { %v919_v30 = vmul.f32 %v2206_v24, %v918_v28 }
 0xe4e   :  { %v920_v14 = vadd.f32 %v2206_v24, %v919_v30 }
 0xe50   :  { %v924_v41 = vsel %vm923_vm11, %v2206_v24, %v920_v14 }
 0xe51   :  { %v929_v44 = vsel %vm926_vm12, %v928_v42, %v924_v41 }
 0xe52   :  { %v944_v5 = vsub.f32 1.0, %v929_v44  ;;  %v952_v9 = vmul.f32 %v950_v6, %v929_v44 }
 0xe8c   :  { %v670_v37 = vpop.permute.xlu1 %669 }
 0xe8d   :  { %v672_v39 = vmul.f32 %v670_v37, %v664_v38 }
 0xe8f   :  { %674 = vrot.lane.b32.xlu0 %v672_v39, %s2487_s6 }
 0xe90   :  { %v935_v43 = vpop.permute.xlu2 %934 }
 0xe91   :  { %v937_v45 = vmul.f32 %v935_v43, %v929_v44 }
 0xe93   :  { %939 = vrot.lane.b32.xlu1 %v937_v45, %s2487_s6 }
 0xf01   :  { %v675_v46 = vpop.permute.xlu0 %674 }
 0xf02   :  { %v677_v47 = vadd.f32 %v675_v46, %v2695_v21 }
 0xf04   :  { %2207 = vtanh.f32 %v677_v47 }
 0xf05   :  { %v940_v48 = vpop.permute.xlu1 %939 }
 0xf06   :  { %v942_v49 = vadd.f32 %v940_v48, %v2758_v7 }
 0xf08   :  { %2209 = vtanh.f32 %v942_v49 }
 0xf0a   :  { %v2208_v55 = vpop.eup %2207 }
 0xf0b   :  { %681 = vrot.lane.b32.xlu2 %v2208_v55, %s2489_s3 }
 0xf0e   :  { %v2210_v56 = vpop.eup %2209 }
 0xf0f   :  { %946 = vrot.lane.b32.xlu0 %v2210_v56, %s2489_s3 }
 0xf65   :  { %v682_v59 = vpop.permute.xlu2 %681 }
 0xf66   :  { %v684_v63 = vmul.f32 %v682_v59, %v679_v57 }
 0xf68   :  { %v2795_v0 = vadd.f32 %v687_v62, %v684_v63 }
 0xf6a   :  { %v690_v2 = vrot.slane %v2795_v0, 4  ;;  %v2803_v3 = vsel %vm763_vm14, %v767_v1, %v2795_v0 }
 0xf6c   :  { %691 = vrot.lane.b32.xlu1 %v690_v2, %s2489_s3 }
 0xf81   :  { %v947_v8 = vpop.permute.xlu0 %946 }
 0xf82   :  { %v949_v12 = vmul.f32 %v947_v8, %v944_v5 }
 0xf84   :  { %v953_v13 = vadd.f32 %v952_v9, %v949_v12 }
 0xf86   :  { %v955_v15 = vrot.slane %v953_v13, 2  ;;  %v1022_v39 = vrot.slane %v953_v13, 6  ;;  %v1380_v45 = vsel %vm761_vm13, %v2772_v61, %v953_v13 }
 0xf88   :  { %956 = vrot.lane.b32.xlu2 %v955_v15, %s2489_s3 }
 0xfde   :  { %v692_v16 = vpop.permute.xlu1 %691 }
 0xfdf   :  { %2099 = vmatmul.msk.f32.vlgmr.msra.gmra.mxu1 %vm166_vm0, %v692_v16 }
 0xfe0   :  { %1182 = vmatpush.msra.mxu1 %v2707_v52 }
 0xfe2   :  { %1183 = vmatpush.msra.mxu1 %v2709_v40  ;;  %v957_v51 = vpop.permute.xlu2 %956 }
 0xfe4   :  { %1184 = vmatpush.msra.mxu1 %v2713_v53 }
 0xfe6   :  { %1185 = vmatpush.msra.mxu1 %v2719_v54 }
 0xfe7   :  { %2106 = vmatmul.msk.f32.vlgmr.msrb.gmra.mxu1 %vm166_vm0, %v957_v51 }
0x105c   :  { %v712_v50 = vpop.f32.mrf.mxu1 }
0x105d   :  { %v738_v36 = vadd.f32 %v712_v50, %v2638_v11  ;;  %v716_v48 = vrot.slane %v712_v50, 2 }
0x105f   :  { %v740_v37 = vrot.slane %v738_v36, 2  ;;  %v718_v49 = vadd.f32 %v716_v48, %v2695_v21 }
0x1061   :  { %v2100_v55 = vmul.f32 -1.442695, %v718_v49 }
0x1064   :  { %v977_v17 = vpop.f32.mrf.mxu1 }
0x1065   :  { %v1003_v18 = vadd.f32 %v977_v17, %v2747_v60  ;;  %v981_v20 = vrot.slane %v977_v17, 4 }
0x1067   :  { %v1005_v19 = vrot.slane %v1003_v18, 4  ;;  %v983_v22 = vadd.f32 %v981_v20, %v2758_v7 }
0x1069   :  { %1006 = vrot.lane.b32.xlu0 %v1005_v19, %s2487_s6  ;;  %v2107_v52 = vmul.f32 -1.442695, %v983_v22 }
0x106b   :  { %2211 = vpow2.f32 %v2107_v52 }
0x1071   :  { %v2212_v40 = vpop.eup %2211 }
0x1072   :  { %v987_v23 = vadd.f32 1.0, %v2212_v40 }
0x1074   :  { %2213 = vrcp.f32 %v987_v23  ;;  %v999_v27 = vand.u32 2147483648, %v987_v23  ;;  %vm993_vm1 = vweird.f32 %v987_v23  ;;  %v997_v28 = vand.u32 2147483647, %v987_v23 }
0x1076   :  { %v1000_v30 = vor.u32 1.1754944e-38, %v999_v27  ;;  %vm998_vm3 = vcmp.eq.f32.partialorder %v997_v28, 8.507059e+37 }
0x107a   :  { %v2214_v53 = vpop.eup %2213 }
0x107b   :  { %v989_v24 = vmul.f32 %v2214_v53, %v987_v23  ;;  %vm994_vm15 = vweird.f32 %v2214_v53 }
0x107c   :  { %vm995_vm2 = vmor %vm993_vm1, %vm994_vm15 }
0x107d   :  { %v990_v54 = vsub.f32 1.0, %v989_v24 }
0x107f   :  { %v991_v25 = vmul.f32 %v2214_v53, %v990_v54 }
0x1081   :  { %v992_v26 = vadd.f32 %v2214_v53, %v991_v25 }
0x1083   :  { %v996_v29 = vsel %vm995_vm2, %v2214_v53, %v992_v26 }
0x1084   :  { %v1001_v32 = vsel %vm998_vm3, %v1000_v30, %v996_v29 }
0x1085   :  { %v1016_v38 = vsub.f32 1.0, %v1001_v32  ;;  %v1024_v42 = vmul.f32 %v1022_v39, %v1001_v32 }
0x10db   :  { %v1007_v31 = vpop.permute.xlu0 %1006 }
0x10dc   :  { %v1009_v33 = vmul.f32 %v1007_v31, %v1001_v32 }
0x10de   :  { %1011 = vrot.lane.b32.xlu1 %v1009_v33, %s2487_s6 }
0x1150   :  { %v1012_v14 = vpop.permute.xlu1 %1011 }
0x1151   :  { %v1014_v34 = vadd.f32 %v1012_v14, %v2758_v7 }
0x1153   :  { %2215 = vtanh.f32 %v1014_v34 }
0x1154   :  { %2217 = vpow2.f32 %v2100_v55 }
0x1159   :  { %v2216_v35 = vpop.eup %2215 }
0x115a   :  { %1018 = vrot.lane.b32.xlu2 %v2216_v35, %s2489_s3  ;;  %v2218_v56 = vpop.eup %2217  ;;  %v757_v35 = vrot.slane %v2795_v0, 6 }
0x115b   :  { %v722_v57 = vadd.f32 1.0, %v2218_v56 }
0x115d   :  { %2219 = vrcp.f32 %v722_v57  ;;  %v734_v6 = vand.u32 2147483648, %v722_v57  ;;  %vm728_vm6 = vweird.f32 %v722_v57  ;;  %v732_v8 = vand.u32 2147483647, %v722_v57 }
0x115f   :  { %v735_v12 = vor.u32 1.1754944e-38, %v734_v6  ;;  %vm733_vm8 = vcmp.eq.f32.partialorder %v732_v8, 8.507059e+37 }
0x1162   :  { %741 = vrot.lane.b32.xlu2 %v740_v37, %s2487_s6 }
0x1163   :  { %v2220_v61 = vpop.eup %2219 }
0x1164   :  { %v724_v58 = vmul.f32 %v2220_v61, %v722_v57  ;;  %vm729_vm5 = vweird.f32 %v2220_v61 }
0x1165   :  { %vm730_vm7 = vmor %vm728_vm6, %vm729_vm5 }
0x1166   :  { %v725_v59 = vsub.f32 1.0, %v724_v58 }
0x1168   :  { %v726_v62 = vmul.f32 %v2220_v61, %v725_v59 }
0x116a   :  { %v727_v2 = vadd.f32 %v2220_v61, %v726_v62 }
0x116c   :  { %v731_v9 = vsel %vm730_vm7, %v2220_v61, %v727_v2 }
0x116d   :  { %v736_v15 = vsel %vm733_vm8, %v735_v12, %v731_v9 }
0x116e   :  { %v751_v34 = vsub.f32 1.0, %v736_v15  ;;  %v759_v37 = vmul.f32 %v757_v35, %v736_v15  ;;  %v2915_v35 = vld [vmem:[%s3070_s11] ss:$0 sm:$0xff] }
0x11b4   :  { %v1019_v41 = vpop.permute.xlu2 %1018 }
0x11b5   :  { %v1021_v43 = vmul.f32 %v1019_v41, %v1016_v38 }
0x11b7   :  { %v2822_v44 = vadd.f32 %v1024_v42, %v1021_v43 }
0x11b9   :  { %v1027_v46 = vrot.slane %v2822_v44, 4  ;;  %v2829_v47 = vsel %vm763_vm14, %v1380_v45, %v2822_v44 }
0x11bb   :  { %1028 = vrot.lane.b32.xlu0 %v1027_v46, %s2489_s3 }
0x11bc   :  { %v742_v13 = vpop.permute.xlu2 %741 }
0x11bd   :  { %v744_v16 = vmul.f32 %v742_v13, %v736_v15 }
0x122d   :  { %v1029_v11 = vpop.permute.xlu0 %1028 }
0x122e   :  { %2108 = vmatmul.msk.f32.vlgmr.msrb.gmra.mxu3 %vm166_vm0, %v1029_v11 }
0x12b1   :  { %v1049_v63 = vpop.f32.mrf.mxu3 }
0x12b2   :  { %v1075_v1 = vadd.f32 %v1049_v63, %v2747_v60  ;;  %v1053_v51 = vrot.slane %v1049_v63, 2 }
0x12b4   :  { %v1077_v5 = vrot.slane %v1075_v1, 2  ;;  %v1055_v50 = vadd.f32 %v1053_v51, %v2758_v7  ;;  %v1388_v51 = vld [vmem:[#allocation8 + $0x10] sm:$0xff] }
0x12b6   :  { %1078 = vrot.lane.b32.xlu1 %v1077_v5, %s2487_s6  ;;  %v2109_v17 = vmul.f32 -1.442695, %v1055_v50  ;;  %v1387_v50 = vld [vmem:[#allocation8 + $0x8] sm:$0xff] }
0x12b8   :  { %2221 = vpow2.f32 %v2109_v17  ;;  %v1386_v17 = vld [vmem:[#allocation8] sm:$0xff] }
0x12be   :  { %746 = vrot.lane.b32.xlu1 %v744_v16, %s2487_s6  ;;  %v2222_v18 = vpop.eup %2221  ;;  %v1389_v16 = vld [vmem:[#allocation8 + $0x18] sm:$0xff] }
0x12bf   :  { %v1059_v19 = vadd.f32 1.0, %v2222_v18  ;;  %1421 = vmatpush.msra.mxu0 %v1389_v16 }
0x12c1   :  { %2223 = vrcp.f32 %v1059_v19  ;;  %v1071_v53 = vand.u32 2147483648, %v1059_v19  ;;  %vm1065_vm10 = vweird.f32 %v1059_v19  ;;  %v1069_v24 = vand.u32 2147483647, %v1059_v19  ;;  %1422 = vmatpush.msra.mxu0 %v1388_v51 }
0x12c3   :  { %v1072_v25 = vor.u32 1.1754944e-38, %v1071_v53  ;;  %vm1070_vm12 = vcmp.eq.f32.partialorder %v1069_v24, 8.507059e+37  ;;  %1423 = vmatpush.msra.mxu0 %v1387_v50 }
0x12c5   :  { %1424 = vmatpush.msra.mxu0 %v1386_v17 }
0x12c7   :  { %v2224_v20 = vpop.eup %2223 }
0x12c8   :  { %v1061_v22 = vmul.f32 %v2224_v20, %v1059_v19  ;;  %vm1066_vm9 = vweird.f32 %v2224_v20 }
0x12c9   :  { %vm1067_vm11 = vmor %vm1065_vm10, %vm1066_vm9 }
0x12ca   :  { %v1062_v52 = vsub.f32 1.0, %v1061_v22 }
0x12cc   :  { %v1063_v40 = vmul.f32 %v2224_v20, %v1062_v52 }
0x12ce   :  { %v1064_v23 = vadd.f32 %v2224_v20, %v1063_v40 }
0x12d0   :  { %v1068_v54 = vsel %vm1067_vm11, %v2224_v20, %v1064_v23 }
0x12d1   :  { %v1073_v27 = vsel %vm1070_vm12, %v1072_v25, %v1068_v54  ;;  %v2868_v54 = vld [vmem:[#allocation10 + $0x18] sm:$0xff]  ;;  %v2870_v25 = vld [vmem:[#allocation10 + $0x10] sm:$0xff] }
0x12d2   :  { %v1088_v42 = vsub.f32 1.0, %v1073_v27  ;;  %1444 = vmatpush.msrb.mxu1 %v2868_v54  ;;  %1514 = vmatpush.msra.mxu2 %v2868_v54 }
0x12d3   :  { %1586 = vmatpush.msrb.mxu3 %v2868_v54 }
0x12d4   :  { %1445 = vmatpush.msrb.mxu1 %v2870_v25  ;;  %1515 = vmatpush.msra.mxu2 %v2870_v25 }
0x12d5   :  { %1587 = vmatpush.msrb.mxu3 %v2870_v25 }
0x1328   :  { %v1079_v26 = vpop.permute.xlu1 %1078 }
0x1329   :  { %v1081_v28 = vmul.f32 %v1079_v26, %v1073_v27  ;;  %v2874_v26 = vld [vmem:[#allocation10 + $0x8] sm:$0xff] }
0x132a   :  { %1446 = vmatpush.msrb.mxu1 %v2874_v26  ;;  %1516 = vmatpush.msra.mxu2 %v2874_v26 }
0x132b   :  { %1083 = vrot.lane.b32.xlu0 %v1081_v28, %s2487_s6  ;;  %1588 = vmatpush.msrb.mxu3 %v2874_v26  ;;  %v2154_v28 = vld [vmem:[%s3071_s12] ss:$0 sm:$0xff] }
0x1330   :  { %v747_v29 = vpop.permute.xlu1 %746 }
0x1331   :  { %v749_v30 = vadd.f32 %v747_v29, %v2695_v21 }
0x1333   :  { %2225 = vtanh.f32 %v749_v30 }
0x1339   :  { %v2226_v31 = vpop.eup %2225 }
0x133a   :  { %753 = vrot.lane.b32.xlu0 %v2226_v31, %s2489_s3 }
0x139d   :  { %v1084_v32 = vpop.permute.xlu0 %1083 }
0x139e   :  { %v1086_v33 = vadd.f32 %v1084_v32, %v2758_v7  ;;  %v1094_v7 = vrot.slane %v2822_v44, 6 }
0x13a0   :  { %2227 = vtanh.f32 %v1086_v33  ;;  %v1096_v45 = vmul.f32 %v1094_v7, %v1073_v27  ;;  %v2880_v27 = vld [vmem:[#allocation10] sm:$0xff] }
0x13a1   :  { %1447 = vmatpush.msrb.mxu1 %v2880_v27  ;;  %1517 = vmatpush.msra.mxu2 %v2880_v27 }
0x13a2   :  { %1589 = vmatpush.msrb.mxu3 %v2880_v27 }
0x13a6   :  { %v2228_v14 = vpop.eup %2227 }
0x13a7   :  { %1090 = vrot.lane.b32.xlu2 %v2228_v14, %s2489_s3 }
0x13ac   :  { %v754_v36 = vpop.permute.xlu0 %753 }
0x13ad   :  { %v756_v38 = vmul.f32 %v754_v36, %v751_v34 }
0x13af   :  { %v760_v39 = vadd.f32 %v759_v37, %v756_v38 }
0x13b1   :  { %v769_v21 = vsel %vm765_vm4, %v2803_v3, %v760_v39 }
0x13b2   :  { %v771_v41 = vmax.f32 %v769_v21, 0.0 }
0x13b4   :  { %789 = vrot.lane.b32.xlu2 %v771_v41, %s2489_s3 }
0x1401   :  { %v1091_v43 = vpop.permute.xlu2 %1090 }
0x1402   :  { %v1093_v46 = vmul.f32 %v1091_v43, %v1088_v42 }
0x1404   :  { %v1097_v11 = vadd.f32 %v1096_v45, %v1093_v46 }
0x1406   :  { %v1099_v48 = vrot.slane %v1097_v11, 6  ;;  %v1382_v0 = vsel %vm765_vm4, %v2829_v47, %v1097_v11 }
0x1408   :  { %1100 = vrot.lane.b32.xlu1 %v1099_v48, %s2489_s3 }
0x140e   :  { %v790_v49 = vpop.permute.xlu2 %789 }
0x140f   :  { %2102 = vmatmul.msk.f32.gmra.mxu2 %vm166_vm0, %v790_v49 }
0x147a   :  { %v1101_v3 = vpop.permute.xlu1 %1100 }
0x147b   :  { %2110 = vmatmul.msk.f32.vlgmr.msrb.gmra.mxu0 %vm166_vm0, %v1101_v3 }
0x147c   :  { %1868 = vmatpush.msrb.mxu0 %v2868_v54 }
0x147e   :  { %1869 = vmatpush.msrb.mxu0 %v2870_v25 }
0x1480   :  { %1870 = vmatpush.msrb.mxu0 %v2874_v26 }
0x1482   :  { %1871 = vmatpush.msrb.mxu0 %v2880_v27 }
0x1492   :  { %v815_v44 = vpop.f32.mrf.mxu2 }
0x1493   :  { %v2856_v57 = vadd.f32 %v2755_v4, %v815_v44 }
0x14f8   :  { %v1121_v55 = vpop.f32.mrf.mxu0 }
0x14f9   :  { %v1144_v56 = vadd.f32 %v1121_v55, %v2747_v60  ;;  %v1124_v61 = vadd.f32 %v1121_v55, %v2856_v57 }
0x14fb   :  { %1146 = vrot.lane.b32.xlu0 %v1144_v56, %s2487_s6  ;;  %v2111_v47 = vmul.f32 -1.442695, %v1124_v61 }
0x14fd   :  { %2229 = vpow2.f32 %v2111_v47 }
0x1503   :  { %v2230_v58 = vpop.eup %2229 }
0x1504   :  { %v1128_v59 = vadd.f32 1.0, %v2230_v58 }
0x1506   :  { %2231 = vrcp.f32 %v1128_v59  ;;  %v1140_v6 = vand.u32 2147483648, %v1128_v59  ;;  %vm1134_vm1 = vweird.f32 %v1128_v59  ;;  %v1138_v8 = vand.u32 2147483647, %v1128_v59 }
0x1508   :  { %v1141_v4 = vor.u32 1.1754944e-38, %v1140_v6  ;;  %vm1139_vm3 = vcmp.eq.f32.partialorder %v1138_v8, 8.507059e+37 }
0x150c   :  { %v2232_v62 = vpop.eup %2231 }
0x150d   :  { %v1130_v63 = vmul.f32 %v2232_v62, %v1128_v59  ;;  %vm1135_vm15 = vweird.f32 %v2232_v62 }
0x150e   :  { %vm1136_vm2 = vmor %vm1134_vm1, %vm1135_vm15 }
0x150f   :  { %v1131_v1 = vsub.f32 1.0, %v1130_v63 }
0x1511   :  { %v1132_v2 = vmul.f32 %v2232_v62, %v1131_v1 }
0x1513   :  { %v1133_v5 = vadd.f32 %v2232_v62, %v1132_v2 }
0x1515   :  { %v1137_v9 = vsel %vm1136_vm2, %v2232_v62, %v1133_v5 }
0x1516   :  { %v1142_v13 = vsel %vm1139_vm3, %v1141_v4, %v1137_v9 }
0x1517   :  { %v1156_v52 = vsub.f32 1.0, %v1142_v13  ;;  %v1163_v23 = vmul.f32 %v1142_v13, %v1099_v48 }
0x156d   :  { %v1147_v12 = vpop.permute.xlu0 %1146 }
0x156e   :  { %v1149_v15 = vmul.f32 %v1147_v12, %v1142_v13 }
0x1570   :  { %1151 = vrot.lane.b32.xlu1 %v1149_v15, %s2487_s6 }
0x1578   :  { %1401 = vrot.lane.b32.xlu1 %v1382_v0, %s2489_s3 }
0x15e2   :  { %v1152_v18 = vpop.permute.xlu1 %1151 }
0x15e3   :  { %v1154_v19 = vadd.f32 %v1152_v18, %v2856_v57 }
0x15e5   :  { %2233 = vtanh.f32 %v1154_v19 }
0x15ea   :  { %v1402_v20 = vpop.permute.xlu1 %1401 }
0x15eb   :  { %v2234_v22 = vpop.eup %2233  ;;  %2118 = vmatmul.msk.f32.vlgmr.msra.gmra.mxu0 %vm166_vm0, %v1402_v20 }
0x15ec   :  { %1158 = vrot.lane.b32.xlu2 %v2234_v22, %s2489_s3 }
0x15f4   :  { %1474 = vrot.lane.b32.xlu2 %v2154_v28, %s2487_s6 }
0x1646   :  { %v1159_v40 = vpop.permute.xlu2 %1158 }
0x1647   :  { %v1161_v53 = vmul.f32 %v1159_v40, %v1156_v52 }
0x1649   :  { %v2864_v24 = vadd.f32 %v1163_v23, %v1161_v53 }
0x164b   :  { %1166 = vrot.lane.b32.xlu0 %v2864_v24, %s2489_s3  ;;  %v1232_v20 = vrot.slane %v2864_v24, 6 }
0x164e   :  { %v2908_v33 = vpop.permute.xlu2 %1474 }
0x1668   :  { %v1426_v37 = vpop.f32.mrf.mxu0 }
0x1669   :  { %v2919_v38 = vadd.f32 %v2915_v35, %v1426_v37 }
0x16bd   :  { %v1167_v29 = vpop.permute.xlu0 %1166 }
0x16be   :  { %2112 = vmatmul.msk.f32.vlgmr.msra.gmra.mxu1 %vm166_vm0, %v1167_v29 }
0x16bf   :  { %1658 = vmatpush.msra.mxu1 %v2868_v54 }
0x16c1   :  { %1659 = vmatpush.msra.mxu1 %v2870_v25 }
0x16c3   :  { %1660 = vmatpush.msra.mxu1 %v2874_v26 }
0x16c5   :  { %1661 = vmatpush.msra.mxu1 %v2880_v27 }
0x16c6   :  { %1448 = vmatmul.f32.vlgmr.msrb.gmra.mxu1 %v2488_v10 }
0x16c7   :  { %1940 = vmatpush.msrb.mxu1 %v2868_v54 }
0x16c9   :  { %1941 = vmatpush.msrb.mxu1 %v2870_v25 }
0x16cb   :  { %1942 = vmatpush.msrb.mxu1 %v2874_v26 }
0x16cd   :  { %1943 = vmatpush.msrb.mxu1 %v2880_v27 }
0x173b   :  { %v1187_v30 = vpop.f32.mrf.mxu1 }
0x173c   :  { %v1213_v31 = vadd.f32 %v1187_v30, %v2747_v60  ;;  %v1191_v10 = vrot.slane %v1187_v30, 6 }
0x173e   :  { %v1215_v32 = vrot.slane %v1213_v31, 6  ;;  %v1193_v36 = vadd.f32 %v1191_v10, %v2856_v57 }
0x1740   :  { %1216 = vrot.lane.b32.xlu0 %v1215_v32, %s2487_s6  ;;  %v2113_v39 = vmul.f32 -1.442695, %v1193_v36 }
0x1742   :  { %2235 = vpow2.f32 %v2113_v39 }
0x1743   :  { %v1449_v14 = vpop.f32.mrf.mxu1 }
0x1744   :  { %v1477_v34 = vadd.f32 %v2908_v33, %v1449_v14  ;;  %v1452_v21 = vadd.f32 %v1449_v14, %v2919_v38 }
0x1746   :  { %1479 = vrot.lane.b32.xlu1 %v1477_v34, %s2487_s6  ;;  %v2120_v41 = vmul.f32 -1.442695, %v1452_v21 }
0x1748   :  { %v2236_v42 = vpop.eup %2235  ;;  %2237 = vpow2.f32 %v2120_v41 }
0x1749   :  { %v1197_v7 = vadd.f32 1.0, %v2236_v42 }
0x174b   :  { %2239 = vrcp.f32 %v1197_v7  ;;  %v1209_v44 = vand.u32 2147483648, %v1197_v7  ;;  %vm1203_vm6 = vweird.f32 %v1197_v7  ;;  %v1207_v61 = vand.u32 2147483647, %v1197_v7 }
0x174d   :  { %v1210_v59 = vor.u32 1.1754944e-38, %v1209_v44  ;;  %vm1208_vm8 = vcmp.eq.f32.partialorder %v1207_v61, 8.507059e+37 }
0x174e   :  { %v2238_v43 = vpop.eup %2237 }
0x174f   :  { %v1456_v45 = vadd.f32 1.0, %v2238_v43 }
0x1751   :  { %v2240_v46 = vpop.eup %2239  ;;  %2241 = vrcp.f32 %v1456_v45  ;;  %v1468_v2 = vand.u32 2147483648, %v1456_v45  ;;  %vm1462_vm10 = vweird.f32 %v1456_v45  ;;  %v1466_v6 = vand.u32 2147483647, %v1456_v45 }
0x1752   :  { %v1199_v11 = vmul.f32 %v2240_v46, %v1197_v7  ;;  %vm1204_vm5 = vweird.f32 %v2240_v46 }
0x1753   :  { %vm1205_vm7 = vmor %vm1203_vm6, %vm1204_vm5  ;;  %v1469_v9 = vor.u32 1.1754944e-38, %v1468_v2  ;;  %vm1467_vm12 = vcmp.eq.f32.partialorder %v1466_v6, 8.507059e+37 }
0x1754   :  { %v1200_v0 = vsub.f32 1.0, %v1199_v11 }
0x1756   :  { %v1201_v3 = vmul.f32 %v2240_v46, %v1200_v0 }
0x1757   :  { %v2242_v48 = vpop.eup %2241 }
0x1758   :  { %v1458_v49 = vmul.f32 %v2242_v48, %v1456_v45  ;;  %v1202_v56 = vadd.f32 %v2240_v46, %v1201_v3  ;;  %vm1463_vm9 = vweird.f32 %v2242_v48 }
0x1759   :  { %vm1464_vm11 = vmor %vm1462_vm10, %vm1463_vm9 }
0x175a   :  { %v1459_v55 = vsub.f32 1.0, %v1458_v49  ;;  %v1206_v58 = vsel %vm1205_vm7, %v2240_v46, %v1202_v56 }
0x175b   :  { %v1211_v1 = vsel %vm1208_vm8, %v1210_v59, %v1206_v58 }
0x175c   :  { %v1460_v47 = vmul.f32 %v2242_v48, %v1459_v55  ;;  %v1226_v19 = vsub.f32 1.0, %v1211_v1  ;;  %v1234_v52 = vmul.f32 %v1232_v20, %v1211_v1 }
0x175e   :  { %v1461_v62 = vadd.f32 %v2242_v48, %v1460_v47 }
0x1760   :  { %v1465_v8 = vsel %vm1464_vm11, %v2242_v48, %v1461_v62 }
0x1761   :  { %v1470_v4 = vsel %vm1467_vm12, %v1469_v9, %v1465_v8 }
0x1762   :  { %v1489_v53 = vsub.f32 1.0, %v1470_v4  ;;  %v1495_v30 = vmul.f32 0.0, %v1470_v4 }
0x17b2   :  { %v1217_v63 = vpop.permute.xlu0 %1216 }
0x17b3   :  { %v1219_v5 = vmul.f32 %v1217_v63, %v1211_v1 }
0x17b5   :  { %1221 = vrot.lane.b32.xlu2 %v1219_v5, %s2487_s6 }
0x17b8   :  { %v1480_v12 = vpop.permute.xlu1 %1479 }
0x17b9   :  { %v1482_v13 = vmul.f32 %v1480_v12, %v1470_v4 }
0x17bb   :  { %1484 = vrot.lane.b32.xlu0 %v1482_v13, %s2487_s6 }
0x180f   :  { %v1222_v15 = vpop.permute.xlu2 %1221 }
0x1810   :  { %v1224_v16 = vadd.f32 %v1222_v15, %v2856_v57 }
0x1812   :  { %2243 = vtanh.f32 %v1224_v16 }
0x1818   :  { %v2244_v51 = vpop.eup %2243 }
0x1819   :  { %1228 = vrot.lane.b32.xlu1 %v2244_v51, %s2489_s3 }
0x182d   :  { %v1485_v50 = vpop.permute.xlu0 %1484 }
0x182e   :  { %v1487_v17 = vadd.f32 %v1485_v50, %v2919_v38 }
0x1830   :  { %2245 = vtanh.f32 %v1487_v17 }
0x1836   :  { %v2246_v18 = vpop.eup %2245 }
0x1837   :  { %1491 = vrot.lane.b32.xlu2 %v2246_v18, %s2489_s3 }
0x188b   :  { %v1229_v22 = vpop.permute.xlu1 %1228 }
0x188c   :  { %v1231_v40 = vmul.f32 %v1229_v22, %v1226_v19 }
0x188e   :  { %v2929_v23 = vadd.f32 %v1234_v52, %v1231_v40 }
0x1890   :  { %v1237_v28 = vrot.slane %v2929_v23, 2  ;;  %v1304_v47 = vrot.slane %v2929_v23, 6 }
0x1891   :  { %v1492_v29 = vpop.permute.xlu2 %1491 }
0x1892   :  { %v1494_v31 = vmul.f32 %v1492_v29, %v1489_v53  ;;  %1238 = vrot.lane.b32.xlu0 %v1237_v28, %s2489_s3 }
0x1894   :  { %v2933_v32 = vadd.f32 %v1495_v30, %v1494_v31 }
0x1896   :  { %1498 = vrot.lane.b32.xlu1 %v2933_v32, %s2489_s3 }
0x1904   :  { %v1239_v14 = vpop.permute.xlu0 %1238 }
0x1905   :  { %2114 = vmatmul.msk.f32.vlgmr.msrb.gmra.mxu2 %vm166_vm0, %v1239_v14 }
0x1906   :  { %1730 = vmatpush.msrb.mxu2 %v2868_v54 }
0x1908   :  { %1731 = vmatpush.msrb.mxu2 %v2870_v25  ;;  %v1499_v34 = vpop.permute.xlu1 %1498 }
0x190a   :  { %1732 = vmatpush.msrb.mxu2 %v2874_v26 }
0x190c   :  { %1733 = vmatpush.msrb.mxu2 %v2880_v27 }
0x190d   :  { %2121 = vmatmul.msk.f32.vlgmr.msra.gmra.mxu2 %vm166_vm0, %v1499_v34 }
0x1988   :  { %v1259_v10 = vpop.f32.mrf.mxu2 }
0x1989   :  { %v1263_v36 = vrot.slane %v1259_v10, 4  ;;  %v1285_v37 = vadd.f32 %v1259_v10, %v2747_v60  ;;  %v1383_v10 = vsel %vm761_vm13, %v2864_v24, %v2929_v23 }
0x198b   :  { %v1265_v39 = vadd.f32 %v1263_v36, %v2856_v57  ;;  %v1287_v21 = vrot.slane %v1285_v37, 4 }
0x198d   :  { %v2115_v41 = vmul.f32 -1.442695, %v1265_v39  ;;  %1288 = vrot.lane.b32.xlu2 %v1287_v21, %s2487_s6  ;;  %v1564_v39 = vrot.slane %v2933_v32, 6 }
0x198f   :  { %2247 = vpow2.f32 %v2115_v41 }
0x1990   :  { %v1519_v42 = vpop.f32.mrf.mxu2 }
0x1991   :  { %v1545_v7 = vadd.f32 %v1519_v42, %v2908_v33  ;;  %v1523_v62 = vrot.slane %v1519_v42, 6 }
0x1993   :  { %v1547_v43 = vrot.slane %v1545_v7, 6  ;;  %v1525_v63 = vadd.f32 %v1523_v62, %v2919_v38 }
0x1995   :  { %v2248_v45 = vpop.eup %2247  ;;  %1548 = vrot.lane.b32.xlu0 %v1547_v43, %s2487_s6  ;;  %v2122_v1 = vmul.f32 -1.442695, %v1525_v63 }
0x1996   :  { %v1269_v46 = vadd.f32 1.0, %v2248_v45 }
0x1998   :  { %2249 = vrcp.f32 %v1269_v46  ;;  %v1281_v49 = vand.u32 2147483648, %v1269_v46  ;;  %v1279_v55 = vand.u32 2147483647, %v1269_v46  ;;  %vm1275_vm1 = vweird.f32 %v1269_v46 }
0x1999   :  { %2251 = vpow2.f32 %v2122_v1 }
0x199a   :  { %v1282_v44 = vor.u32 1.1754944e-38, %v1281_v49  ;;  %vm1280_vm3 = vcmp.eq.f32.partialorder %v1279_v55, 8.507059e+37 }
0x199e   :  { %v2250_v11 = vpop.eup %2249 }
0x199f   :  { %v1271_v48 = vmul.f32 %v2250_v11, %v1269_v46  ;;  %vm1276_vm15 = vweird.f32 %v2250_v11  ;;  %v2252_v2 = vpop.eup %2251 }
0x19a0   :  { %vm1277_vm2 = vmor %vm1275_vm1, %vm1276_vm15  ;;  %v1529_v5 = vadd.f32 1.0, %v2252_v2 }
0x19a1   :  { %v1272_v0 = vsub.f32 1.0, %v1271_v48 }
0x19a2   :  { %2253 = vrcp.f32 %v1529_v5  ;;  %v1541_v16 = vand.u32 2147483648, %v1529_v5  ;;  %vm1535_vm6 = vweird.f32 %v1529_v5  ;;  %v1539_v51 = vand.u32 2147483647, %v1529_v5 }
0x19a3   :  { %v1273_v3 = vmul.f32 %v2250_v11, %v1272_v0 }
0x19a4   :  { %v1542_v17 = vor.u32 1.1754944e-38, %v1541_v16  ;;  %vm1540_vm8 = vcmp.eq.f32.partialorder %v1539_v51, 8.507059e+37 }
0x19a5   :  { %v1274_v56 = vadd.f32 %v2250_v11, %v1273_v3 }
0x19a7   :  { %v1278_v61 = vsel %vm1277_vm2, %v2250_v11, %v1274_v56 }
0x19a8   :  { %v1283_v58 = vsel %vm1280_vm3, %v1282_v44, %v1278_v61  ;;  %v2254_v9 = vpop.eup %2253 }
0x19a9   :  { %v1306_v59 = vmul.f32 %v1304_v47, %v1283_v58  ;;  %v1531_v4 = vmul.f32 %v2254_v9, %v1529_v5  ;;  %vm1536_vm5 = vweird.f32 %v2254_v9  ;;  %v1298_v30 = vsub.f32 1.0, %v1283_v58 }
0x19aa   :  { %vm1537_vm7 = vmor %vm1535_vm6, %vm1536_vm5 }
0x19ab   :  { %v1532_v12 = vsub.f32 1.0, %v1531_v4 }
0x19ad   :  { %v1533_v13 = vmul.f32 %v2254_v9, %v1532_v12 }
0x19af   :  { %v1534_v15 = vadd.f32 %v2254_v9, %v1533_v13 }
0x19b1   :  { %v1538_v50 = vsel %vm1537_vm7, %v2254_v9, %v1534_v15 }
0x19b2   :  { %v1543_v19 = vsel %vm1540_vm8, %v1542_v17, %v1538_v50 }
0x19b3   :  { %v1558_v21 = vsub.f32 1.0, %v1543_v19  ;;  %v1566_v42 = vmul.f32 %v1564_v39, %v1543_v19 }
0x19e7   :  { %v1289_v6 = vpop.permute.xlu2 %1288 }
0x19e8   :  { %v1291_v8 = vmul.f32 %v1289_v6, %v1283_v58 }
0x19ea   :  { %1293 = vrot.lane.b32.xlu1 %v1291_v8, %s2487_s6 }
0x1a07   :  { %v1549_v18 = vpop.permute.xlu0 %1548 }
0x1a08   :  { %v1551_v20 = vmul.f32 %v1549_v18, %v1543_v19 }
0x1a0a   :  { %1553 = vrot.lane.b32.xlu2 %v1551_v20, %s2487_s6 }
0x1a5c   :  { %v1294_v22 = vpop.permute.xlu1 %1293 }
0x1a5d   :  { %v1296_v52 = vadd.f32 %v1294_v22, %v2856_v57 }
0x1a5f   :  { %2255 = vtanh.f32 %v1296_v52 }
0x1a64   :  { %v1554_v40 = vpop.permute.xlu2 %1553 }
0x1a65   :  { %v2256_v53 = vpop.eup %2255  ;;  %v1556_v28 = vadd.f32 %v1554_v40, %v2919_v38 }
0x1a66   :  { %1300 = vrot.lane.b32.xlu0 %v2256_v53, %s2489_s3 }
0x1a67   :  { %2257 = vtanh.f32 %v1556_v28 }
0x1a6d   :  { %v2258_v29 = vpop.eup %2257 }
0x1a6e   :  { %1560 = vrot.lane.b32.xlu1 %v2258_v29, %s2489_s3 }
0x1ad8   :  { %v1301_v31 = vpop.permute.xlu0 %1300 }
0x1ad9   :  { %v1303_v14 = vmul.f32 %v1301_v31, %v1298_v30 }
0x1adb   :  { %v2956_v34 = vadd.f32 %v1306_v59, %v1303_v14 }
0x1add   :  { %v1309_v36 = vrot.slane %v2956_v34, 4  ;;  %v2964_v37 = vsel %vm763_vm14, %v1383_v10, %v2956_v34 }
0x1adf   :  { %1310 = vrot.lane.b32.xlu2 %v1309_v36, %s2489_s3 }
0x1ae0   :  { %v1561_v41 = vpop.permute.xlu1 %1560 }
0x1ae1   :  { %v1563_v7 = vmul.f32 %v1561_v41, %v1558_v21 }
0x1ae3   :  { %v1567_v43 = vadd.f32 %v1566_v42, %v1563_v7 }
0x1ae5   :  { %v1569_v45 = vrot.slane %v1567_v43, 2  ;;  %v1636_v4 = vrot.slane %v1567_v43, 6 }
0x1ae7   :  { %1570 = vrot.lane.b32.xlu0 %v1569_v45, %s2489_s3 }
0x1b39   :  { %v1311_v46 = vpop.permute.xlu2 %1310 }
0x1b3a   :  { %2116 = vmatmul.msk.f32.vlgmr.msra.gmra.mxu3 %vm166_vm0, %v1311_v46 }
0x1b3b   :  { %1796 = vmatpush.msra.mxu3 %v2868_v54 }
0x1b3d   :  { %1797 = vmatpush.msra.mxu3 %v2870_v25 }
0x1b3f   :  { %1798 = vmatpush.msra.mxu3 %v2874_v26 }
0x1b41   :  { %1799 = vmatpush.msra.mxu3 %v2880_v27 }
0x1b59   :  { %v1571_v24 = vpop.permute.xlu0 %1570 }
0x1b5a   :  { %2123 = vmatmul.msk.f32.vlgmr.msrb.gmra.mxu3 %vm166_vm0, %v1571_v24 }
0x1bbd   :  { %v1331_v23 = vpop.f32.mrf.mxu3 }
0x1bbe   :  { %v1357_v8 = vadd.f32 %v1331_v23, %v2747_v60  ;;  %v1335_v18 = vrot.slane %v1331_v23, 2 }
0x1bc0   :  { %v1359_v9 = vrot.slane %v1357_v8, 2  ;;  %v1337_v19 = vadd.f32 %v1335_v18, %v2856_v57 }
0x1bc2   :  { %v2117_v20 = vmul.f32 -1.442695, %v1337_v19 }
0x1bdd   :  { %v1591_v32 = vpop.f32.mrf.mxu3 }
0x1bde   :  { %v1617_v11 = vadd.f32 %v1591_v32, %v2908_v33  ;;  %v1595_v0 = vrot.slane %v1591_v32, 4 }
0x1be0   :  { %v1619_v48 = vrot.slane %v1617_v11, 4  ;;  %v1597_v49 = vadd.f32 %v1595_v0, %v2919_v38 }
0x1be2   :  { %1620 = vrot.lane.b32.xlu1 %v1619_v48, %s2487_s6  ;;  %v2124_v54 = vmul.f32 -1.442695, %v1597_v49 }
0x1be4   :  { %2259 = vpow2.f32 %v2124_v54 }
0x1bea   :  { %v2260_v25 = vpop.eup %2259 }
0x1beb   :  { %v1601_v3 = vadd.f32 1.0, %v2260_v25 }
0x1bed   :  { %2261 = vrcp.f32 %v1601_v3  ;;  %v1613_v61 = vand.u32 2147483648, %v1601_v3  ;;  %vm1607_vm14 = vweird.f32 %v1601_v3  ;;  %v1611_v47 = vand.u32 2147483647, %v1601_v3 }
0x1bef   :  { %v1614_v59 = vor.u32 1.1754944e-38, %v1613_v61  ;;  %vm1612_vm10 = vcmp.eq.f32.partialorder %v1611_v47, 8.507059e+37 }
0x1bf3   :  { %v2262_v26 = vpop.eup %2261 }
0x1bf4   :  { %v1603_v27 = vmul.f32 %v2262_v26, %v1601_v3  ;;  %vm1608_vm13 = vweird.f32 %v2262_v26 }
0x1bf5   :  { %vm1609_vm9 = vmor %vm1607_vm14, %vm1608_vm13 }
0x1bf6   :  { %v1604_v55 = vsub.f32 1.0, %v1603_v27 }
0x1bf8   :  { %v1605_v56 = vmul.f32 %v2262_v26, %v1604_v55 }
0x1bfa   :  { %v1606_v44 = vadd.f32 %v2262_v26, %v1605_v56 }
0x1bfc   :  { %v1610_v58 = vsel %vm1609_vm9, %v2262_v26, %v1606_v44 }
0x1bfd   :  { %v1615_v63 = vsel %vm1612_vm10, %v1614_v59, %v1610_v58 }
0x1bfe   :  { %v1630_v12 = vsub.f32 1.0, %v1615_v63  ;;  %v1638_v15 = vmul.f32 %v1636_v4, %v1615_v63 }
0x1c54   :  { %v1621_v62 = vpop.permute.xlu1 %1620 }
0x1c55   :  { %v1623_v1 = vmul.f32 %v1621_v62, %v1615_v63 }
0x1c57   :  { %1625 = vrot.lane.b32.xlu2 %v1623_v1, %s2487_s6 }
0x1cb1   :  { %v1626_v2 = vpop.permute.xlu2 %1625 }
0x1cb2   :  { %v1628_v5 = vadd.f32 %v1626_v2, %v2919_v38 }
0x1cb4   :  { %2263 = vtanh.f32 %v1628_v5  ;;  %v1376_v5 = vrot.slane %v2956_v34, 6 }
0x1cb5   :  { %2265 = vpow2.f32 %v2117_v20 }
0x1cba   :  { %v2264_v6 = vpop.eup %2263 }
0x1cbb   :  { %1632 = vrot.lane.b32.xlu0 %v2264_v6, %s2489_s3  ;;  %v2266_v60 = vpop.eup %2265 }
0x1cbc   :  { %v1341_v22 = vadd.f32 1.0, %v2266_v60 }
0x1cbe   :  { %2267 = vrcp.f32 %v1341_v22  ;;  %v1353_v39 = vand.u32 2147483648, %v1341_v22  ;;  %vm1347_vm12 = vweird.f32 %v1341_v22  ;;  %v1351_v21 = vand.u32 2147483647, %v1341_v22 }
0x1cc0   :  { %v1354_v7 = vor.u32 1.1754944e-38, %v1353_v39  ;;  %vm1352_vm1 = vcmp.eq.f32.partialorder %v1351_v21, 8.507059e+37 }
0x1cc3   :  { %1360 = vrot.lane.b32.xlu0 %v1359_v9, %s2487_s6 }
0x1cc4   :  { %v2268_v52 = vpop.eup %2267 }
0x1cc5   :  { %v1343_v40 = vmul.f32 %v2268_v52, %v1341_v22  ;;  %vm1348_vm11 = vweird.f32 %v2268_v52 }
0x1cc6   :  { %vm1349_vm15 = vmor %vm1347_vm12, %vm1348_vm11 }
0x1cc7   :  { %v1344_v53 = vsub.f32 1.0, %v1343_v40 }
0x1cc9   :  { %v1345_v28 = vmul.f32 %v2268_v52, %v1344_v53 }
0x1ccb   :  { %v1346_v14 = vadd.f32 %v2268_v52, %v1345_v28 }
0x1ccd   :  { %v1350_v42 = vsel %vm1349_vm15, %v2268_v52, %v1346_v14 }
0x1cce   :  { %v1355_v45 = vsel %vm1352_vm1, %v1354_v7, %v1350_v42 }
0x1ccf   :  { %v1370_v2 = vsub.f32 1.0, %v1355_v45  ;;  %v1378_v8 = vmul.f32 %v1376_v5, %v1355_v45 }
0x1d2d   :  { %v1633_v13 = vpop.permute.xlu0 %1632 }
0x1d2e   :  { %v1635_v16 = vmul.f32 %v1633_v13, %v1630_v12 }
0x1d30   :  { %v1639_v51 = vadd.f32 %v1638_v15, %v1635_v16 }
0x1d32   :  { %v1641_v50 = vrot.slane %v1639_v51, 4  ;;  %v1708_v26 = vrot.slane %v1639_v51, 6 }
0x1d34   :  { %1642 = vrot.lane.b32.xlu1 %v1641_v50, %s2489_s3 }
0x1d35   :  { %v1361_v43 = vpop.permute.xlu0 %1360 }
0x1d36   :  { %v1363_v46 = vmul.f32 %v1361_v43, %v1355_v45 }
0x1da6   :  { %v1643_v17 = vpop.permute.xlu1 %1642 }
0x1da7   :  { %2125 = vmatmul.msk.f32.vlgmr.msra.gmra.mxu1 %vm166_vm0, %v1643_v17 }
0x1e24   :  { %v1663_v29 = vpop.f32.mrf.mxu1 }
0x1e25   :  { %v1667_v30 = vrot.slane %v1663_v29, 2  ;;  %v1689_v31 = vadd.f32 %v1663_v29, %v2908_v33 }
0x1e27   :  { %v1669_v10 = vadd.f32 %v1667_v30, %v2919_v38  ;;  %v1691_v36 = vrot.slane %v1689_v31, 2 }
0x1e29   :  { %v2126_v41 = vmul.f32 -1.442695, %v1669_v10  ;;  %1692 = vrot.lane.b32.xlu2 %v1691_v36, %s2487_s6 }
0x1e2b   :  { %2269 = vpow2.f32 %v2126_v41 }
0x1e31   :  { %v2270_v24 = vpop.eup %2269  ;;  %1365 = vrot.lane.b32.xlu2 %v1363_v46, %s2487_s6 }
0x1e32   :  { %v1673_v23 = vadd.f32 1.0, %v2270_v24 }
0x1e34   :  { %2271 = vrcp.f32 %v1673_v23  ;;  %v1685_v0 = vand.u32 2147483648, %v1673_v23  ;;  %v1683_v54 = vand.u32 2147483647, %v1673_v23  ;;  %vm1679_vm3 = vweird.f32 %v1673_v23 }
0x1e36   :  { %v1686_v3 = vor.u32 1.1754944e-38, %v1685_v0  ;;  %vm1684_vm6 = vcmp.eq.f32.partialorder %v1683_v54, 8.507059e+37 }
0x1e3a   :  { %v2272_v32 = vpop.eup %2271 }
0x1e3b   :  { %v1675_v11 = vmul.f32 %v2272_v32, %v1673_v23  ;;  %vm1680_vm2 = vweird.f32 %v2272_v32 }
0x1e3c   :  { %vm1681_vm5 = vmor %vm1679_vm3, %vm1680_vm2 }
0x1e3d   :  { %v1676_v48 = vsub.f32 1.0, %v1675_v11 }
0x1e3f   :  { %v1677_v49 = vmul.f32 %v2272_v32, %v1676_v48 }
0x1e41   :  { %v1678_v25 = vadd.f32 %v2272_v32, %v1677_v49 }
0x1e43   :  { %v1682_v27 = vsel %vm1681_vm5, %v2272_v32, %v1678_v25 }
0x1e44   :  { %v1687_v55 = vsel %vm1684_vm6, %v1686_v3, %v1682_v27 }
0x1e45   :  { %v1710_v56 = vmul.f32 %v1708_v26, %v1687_v55  ;;  %v1702_v12 = vsub.f32 1.0, %v1687_v55 }
0x1e83   :  { %v1693_v44 = vpop.permute.xlu2 %1692 }
0x1e84   :  { %v1695_v61 = vmul.f32 %v1693_v44, %v1687_v55 }
0x1e86   :  { %1697 = vrot.lane.b32.xlu1 %v1695_v61, %s2487_s6 }
0x1e8b   :  { %v1366_v47 = vpop.permute.xlu2 %1365 }
0x1e8c   :  { %v1368_v58 = vadd.f32 %v1366_v47, %v2856_v57 }
0x1e8e   :  { %2273 = vtanh.f32 %v1368_v58 }
0x1e94   :  { %v2274_v59 = vpop.eup %2273 }
0x1e95   :  { %1372 = vrot.lane.b32.xlu1 %v2274_v59, %s2489_s3 }
0x1ef8   :  { %v1698_v62 = vpop.permute.xlu1 %1697 }
0x1ef9   :  { %v1700_v63 = vadd.f32 %v1698_v62, %v2919_v38 }
0x1efb   :  { %2275 = vtanh.f32 %v1700_v63 }
0x1f01   :  { %v2276_v1 = vpop.eup %2275 }
0x1f02   :  { %1704 = vrot.lane.b32.xlu0 %v2276_v1, %s2489_s3 }
0x1f07   :  { %v1373_v6 = vpop.permute.xlu1 %1372 }
0x1f08   :  { %v1375_v9 = vmul.f32 %v1373_v6, %v1370_v2 }
0x1f0a   :  { %v1379_v4 = vadd.f32 %v1378_v8, %v1375_v9 }
0x1f0c   :  { %v1385_v57 = vsel %vm765_vm4, %v2964_v37, %v1379_v4 }
0x1f0d   :  { %1403 = vrot.lane.b32.xlu0 %v1385_v57, %s2489_s3 }
0x1f74   :  { %v1705_v13 = vpop.permute.xlu0 %1704 }
0x1f75   :  { %v1707_v15 = vmul.f32 %v1705_v13, %v1702_v12 }
0x1f77   :  { %v1711_v38 = vadd.f32 %v1710_v56, %v1707_v15 }
0x1f79   :  { %v1713_v16 = vrot.slane %v1711_v38, 6 }
0x1f7b   :  { %1714 = vrot.lane.b32.xlu2 %v1713_v16, %s2489_s3 }
0x1f7f   :  { %v1404_v51 = vpop.permute.xlu0 %1403 }
0x1f80   :  { %2119 = vmatmul.msk.f32.gmra.mxu0 %vm166_vm0, %v1404_v51 }
0x1fd5   :  { %v1715_v34 = vpop.permute.xlu2 %1714 }
0x1fd6   :  { %2127 = vmatmul.msk.f32.vlgmr.msrb.gmra.mxu2 %vm166_vm0, %v1715_v34 }
0x1ffd   :  { %v1429_v37 = vpop.f32.mrf.mxu0 }
0x1ffe   :  { %v3005_v18 = vadd.f32 %v2915_v35, %v1429_v37 }
0x2059   :  { %v1735_v50 = vpop.f32.mrf.mxu2 }
0x205a   :  { %v1758_v17 = vadd.f32 %v1735_v50, %v2908_v33  ;;  %v1738_v19 = vadd.f32 %v1735_v50, %v3005_v18 }
0x205c   :  { %1760 = vrot.lane.b32.xlu1 %v1758_v17, %s2487_s6  ;;  %v2128_v20 = vmul.f32 -1.442695, %v1738_v19 }
0x205e   :  { %2277 = vpow2.f32 %v2128_v20 }
0x2064   :  { %v2278_v60 = vpop.eup %2277 }
0x2065   :  { %v1742_v22 = vadd.f32 1.0, %v2278_v60 }
0x2067   :  { %2279 = vrcp.f32 %v1742_v22  ;;  %v1754_v30 = vand.u32 2147483648, %v1742_v22  ;;  %vm1748_vm7 = vweird.f32 %v1742_v22  ;;  %v1752_v31 = vand.u32 2147483647, %v1742_v22 }
0x2069   :  { %v1755_v35 = vor.u32 1.1754944e-38, %v1754_v30  ;;  %vm1753_vm13 = vcmp.eq.f32.partialorder %v1752_v31, 8.507059e+37 }
0x206d   :  { %v2280_v52 = vpop.eup %2279 }
0x206e   :  { %v1744_v40 = vmul.f32 %v2280_v52, %v1742_v22  ;;  %vm1749_vm4 = vweird.f32 %v2280_v52 }
0x206f   :  { %vm1750_vm8 = vmor %vm1748_vm7, %vm1749_vm4  ;;  %vm2062_vm7 = vcmask 123904  }
0x2070   :  { %v1745_v53 = vsub.f32 1.0, %v1744_v40 }
0x2072   :  { %v1746_v28 = vmul.f32 %v2280_v52, %v1745_v53 }
0x2074   :  { %v1747_v29 = vadd.f32 %v2280_v52, %v1746_v28 }
0x2076   :  { %v1751_v14 = vsel %vm1750_vm8, %v2280_v52, %v1747_v29 }
0x2077   :  { %v1756_v36 = vsel %vm1753_vm13, %v1755_v35, %v1751_v14 }
0x2078   :  { %v1770_v7 = vsub.f32 1.0, %v1756_v36  ;;  %v1777_v45 = vmul.f32 %v1756_v36, %v1713_v16 }
0x20ce   :  { %v1761_v10 = vpop.permute.xlu1 %1760 }
0x20cf   :  { %v1763_v39 = vmul.f32 %v1761_v10, %v1756_v36 }
0x20d1   :  { %1765 = vrot.lane.b32.xlu2 %v1763_v39, %s2487_s6 }
0x212b   :  { %v1766_v21 = vpop.permute.xlu2 %1765 }
0x212c   :  { %v1768_v41 = vadd.f32 %v1766_v21, %v3005_v18 }
0x212e   :  { %2281 = vtanh.f32 %v1768_v41 }
0x2134   :  { %v2282_v42 = vpop.eup %2281 }
0x2135   :  { %1772 = vrot.lane.b32.xlu0 %v2282_v42, %s2489_s3 }
0x21a7   :  { %v1773_v43 = vpop.permute.xlu0 %1772 }
0x21a8   :  { %v1775_v46 = vmul.f32 %v1773_v43, %v1770_v7 }
0x21aa   :  { %v1778_v24 = vadd.f32 %v1777_v45, %v1775_v46 }
0x21ac   :  { %1780 = vrot.lane.b32.xlu1 %v1778_v24, %s2489_s3  ;;  %v1846_v59 = vrot.slane %v1778_v24, 6 }
0x221e   :  { %v1781_v23 = vpop.permute.xlu1 %1780 }
0x221f   :  { %2129 = vmatmul.msk.f32.vlgmr.msra.gmra.mxu3 %vm166_vm0, %v1781_v23 }
0x22a2   :  { %v1801_v32 = vpop.f32.mrf.mxu3 }
0x22a3   :  { %v1805_v11 = vrot.slane %v1801_v32, 6  ;;  %v1827_v48 = vadd.f32 %v1801_v32, %v2908_v33 }
0x22a5   :  { %v1807_v0 = vadd.f32 %v1805_v11, %v3005_v18  ;;  %v1829_v49 = vrot.slane %v1827_v48, 6 }
0x22a7   :  { %v2130_v54 = vmul.f32 -1.442695, %v1807_v0  ;;  %1830 = vrot.lane.b32.xlu2 %v1829_v49, %s2487_s6 }
0x22a9   :  { %2283 = vpow2.f32 %v2130_v54 }
0x22af   :  { %v2284_v25 = vpop.eup %2283 }
0x22b0   :  { %v1811_v3 = vadd.f32 1.0, %v2284_v25 }
0x22b2   :  { %2285 = vrcp.f32 %v1811_v3  ;;  %v1823_v56 = vand.u32 2147483648, %v1811_v3  ;;  %v1821_v61 = vand.u32 2147483647, %v1811_v3  ;;  %vm1817_vm9 = vweird.f32 %v1811_v3 }
0x22b4   :  { %v1824_v58 = vor.u32 1.1754944e-38, %v1823_v56  ;;  %vm1822_vm11 = vcmp.eq.f32.partialorder %v1821_v61, 8.507059e+37 }
0x22b8   :  { %v2286_v26 = vpop.eup %2285 }
0x22b9   :  { %v1813_v27 = vmul.f32 %v2286_v26, %v1811_v3  ;;  %vm1818_vm14 = vweird.f32 %v2286_v26 }
0x22ba   :  { %vm1819_vm10 = vmor %vm1817_vm9, %vm1818_vm14 }
0x22bb   :  { %v1814_v55 = vsub.f32 1.0, %v1813_v27 }
0x22bd   :  { %v1815_v44 = vmul.f32 %v2286_v26, %v1814_v55 }
0x22bf   :  { %v1816_v47 = vadd.f32 %v2286_v26, %v1815_v44 }
0x22c1   :  { %v1820_v62 = vsel %vm1819_vm10, %v2286_v26, %v1816_v47 }
0x22c2   :  { %v1825_v63 = vsel %vm1822_vm11, %v1824_v58, %v1820_v62 }
0x22c3   :  { %v1848_v1 = vmul.f32 %v1846_v59, %v1825_v63  ;;  %v1840_v4 = vsub.f32 1.0, %v1825_v63 }
0x2301   :  { %v1831_v2 = vpop.permute.xlu2 %1830 }
0x2302   :  { %v1833_v5 = vmul.f32 %v1831_v2, %v1825_v63 }
0x2304   :  { %1835 = vrot.lane.b32.xlu0 %v1833_v5, %s2487_s6 }
0x2376   :  { %v1836_v6 = vpop.permute.xlu0 %1835 }
0x2377   :  { %v1838_v8 = vadd.f32 %v1836_v6, %v3005_v18  ;;  %v1998_v6 = vld [vmem:[#allocation11 + $0x18] sm:$0xff] }
0x2378   :  { %2021 = vmatpush.msra.mxu2 %v1998_v6 }
0x2379   :  { %2287 = vtanh.f32 %v1838_v8  ;;  %v1997_v8 = vld [vmem:[#allocation11 + $0x10] sm:$0xff] }
0x237a   :  { %2022 = vmatpush.msra.mxu2 %v1997_v8 }
0x237f   :  { %v2288_v9 = vpop.eup %2287 }
0x2380   :  { %1842 = vrot.lane.b32.xlu1 %v2288_v9, %s2489_s3  ;;  %v1996_v9 = vld [vmem:[#allocation11 + $0x8] sm:$0xff] }
0x2381   :  { %2023 = vmatpush.msra.mxu2 %v1996_v9 }
0x23f2   :  { %v1843_v57 = vpop.permute.xlu1 %1842 }
0x23f3   :  { %v1845_v12 = vmul.f32 %v1843_v57, %v1840_v4  ;;  %v1995_v4 = vld [vmem:[#allocation11] sm:$0xff] }
0x23f4   :  { %2024 = vmatpush.msra.mxu2 %v1995_v4 }
0x23f5   :  { %v1849_v13 = vadd.f32 %v1848_v1, %v1845_v12 }
0x23f7   :  { %v1851_v15 = vrot.slane %v1849_v13, 2  ;;  %v1918_v41 = vrot.slane %v1849_v13, 6 }
0x23f9   :  { %1852 = vrot.lane.b32.xlu2 %v1851_v15, %s2489_s3 }
0x2453   :  { %v1853_v38 = vpop.permute.xlu2 %1852 }
0x2454   :  { %2131 = vmatmul.msk.f32.vlgmr.msrb.gmra.mxu0 %vm166_vm0, %v1853_v38 }
0x24d1   :  { %v1873_v16 = vpop.f32.mrf.mxu0 }
0x24d2   :  { %v1899_v51 = vadd.f32 %v1873_v16, %v2908_v33  ;;  %v1877_v50 = vrot.slane %v1873_v16, 4 }
0x24d4   :  { %v1901_v34 = vrot.slane %v1899_v51, 4  ;;  %v1879_v17 = vadd.f32 %v1877_v50, %v3005_v18  ;;  %v2032_v50 = vld [vmem:[%s3074_s15 + $0x10] sm:$0xff] }
0x24d6   :  { %1902 = vrot.lane.b32.xlu0 %v1901_v34, %s2487_s6  ;;  %v2132_v37 = vmul.f32 -1.442695, %v1879_v17  ;;  %v2033_v34 = vld [vmem:[%s3074_s15 + $0x18] sm:$0xff] }
0x24d7   :  { %2053 = vmatpush.msrb.mxu3 %v2033_v34 }
0x24d8   :  { %2289 = vpow2.f32 %v2132_v37  ;;  %v2031_v37 = vld [vmem:[%s3074_s15 + $0x8] sm:$0xff] }
0x24d9   :  { %2054 = vmatpush.msrb.mxu3 %v2032_v50 }
0x24db   :  { %2055 = vmatpush.msrb.mxu3 %v2031_v37 }
0x24de   :  { %v2290_v19 = vpop.eup %2289 }
0x24df   :  { %v1883_v20 = vadd.f32 1.0, %v2290_v19  ;;  %v2030_v19 = vld [vmem:[%s3074_s15] sm:$0xff]  ;;  %s2071_s15 = sshll.u32 %s3076_s17, 4  ;;  %s2072_s15 = int_to_ptr.hbm [resolvable:$true] %s2071_s15 }
0x24e0   :  { %2056 = vmatpush.msrb.mxu3 %v2030_v19 }
0x24e1   :  { %2291 = vrcp.f32 %v1883_v20  ;;  %v1895_v28 = vand.u32 2147483648, %v1883_v20  ;;  %vm1889_vm15 = vweird.f32 %v1883_v20  ;;  %v1893_v29 = vand.u32 2147483647, %v1883_v20 }
0x24e3   :  { %v1896_v31 = vor.u32 1.1754944e-38, %v1895_v28  ;;  %vm1894_vm2 = vcmp.eq.f32.partialorder %v1893_v29, 8.507059e+37 }
0x24e7   :  { %v2292_v60 = vpop.eup %2291 }
0x24e8   :  { %v1885_v22 = vmul.f32 %v2292_v60, %v1883_v20  ;;  %vm1890_vm12 = vweird.f32 %v2292_v60  ;;  %v2155_v20 = vld [vmem:[%s3073_s14] ss:$0 sm:$0xff] }
0x24e9   :  { %vm1891_vm1 = vmor %vm1889_vm15, %vm1890_vm12 }
0x24ea   :  { %v1886_v52 = vsub.f32 1.0, %v1885_v22 }
0x24ec   :  { %v1887_v40 = vmul.f32 %v2292_v60, %v1886_v52 }
0x24ee   :  { %v1888_v53 = vadd.f32 %v2292_v60, %v1887_v40  ;;  %v2156_v40 = vld [vmem:[%s3075_s16] ss:$0 sm:$0xff] }
0x24f0   :  { %v1892_v30 = vsel %vm1891_vm1, %v2292_v60, %v1888_v53 }
0x24f1   :  { %v1897_v35 = vsel %vm1894_vm2, %v1896_v31, %v1892_v30 }
0x24f2   :  { %v1912_v42 = vsub.f32 1.0, %v1897_v35  ;;  %v1920_v43 = vmul.f32 %v1918_v41, %v1897_v35 }
0x2548   :  { %v1903_v14 = vpop.permute.xlu0 %1902 }
0x2549   :  { %v1905_v10 = vmul.f32 %v1903_v14, %v1897_v35 }
0x254b   :  { %1907 = vrot.lane.b32.xlu1 %v1905_v10, %s2487_s6 }
0x25bd   :  { %v1908_v36 = vpop.permute.xlu1 %1907 }
0x25be   :  { %v1910_v39 = vadd.f32 %v1908_v36, %v3005_v18 }
0x25c0   :  { %2293 = vtanh.f32 %v1910_v39 }
0x25c6   :  { %v2294_v21 = vpop.eup %2293 }
0x25c7   :  { %1914 = vrot.lane.b32.xlu2 %v2294_v21, %s2489_s3 }
0x2621   :  { %v1915_v7 = vpop.permute.xlu2 %1914 }
0x2622   :  { %v1917_v45 = vmul.f32 %v1915_v7, %v1912_v42 }
0x2624   :  { %v1921_v46 = vadd.f32 %v1920_v43, %v1917_v45 }
0x2626   :  { %v1923_v24 = vrot.slane %v1921_v46, 4  ;;  %v1990_v57 = vrot.slane %v1921_v46, 6 }
0x2628   :  { %1924 = vrot.lane.b32.xlu0 %v1923_v24, %s2489_s3 }
0x269a   :  { %v1925_v23 = vpop.permute.xlu0 %1924 }
0x269b   :  { %2133 = vmatmul.msk.f32.vlgmr.msrb.gmra.mxu1 %vm166_vm0, %v1925_v23 }
0x2718   :  { %v1945_v32 = vpop.f32.mrf.mxu1 }
0x2719   :  { %v1971_v11 = vadd.f32 %v1945_v32, %v2908_v33  ;;  %v1949_v0 = vrot.slane %v1945_v32, 2 }
0x271b   :  { %v1973_v48 = vrot.slane %v1971_v11, 2  ;;  %v1951_v49 = vadd.f32 %v1949_v0, %v3005_v18 }
0x271d   :  { %1974 = vrot.lane.b32.xlu1 %v1973_v48, %s2487_s6  ;;  %v2134_v54 = vmul.f32 -1.442695, %v1951_v49 }
0x271f   :  { %2295 = vpow2.f32 %v2134_v54 }
0x2725   :  { %v2296_v25 = vpop.eup %2295 }
0x2726   :  { %v1955_v3 = vadd.f32 1.0, %v2296_v25 }
0x2728   :  { %2297 = vrcp.f32 %v1955_v3  ;;  %v1967_v61 = vand.u32 2147483648, %v1955_v3  ;;  %vm1961_vm5 = vweird.f32 %v1955_v3  ;;  %v1965_v33 = vand.u32 2147483647, %v1955_v3 }
0x272a   :  { %v1968_v58 = vor.u32 1.1754944e-38, %v1967_v61  ;;  %vm1966_vm4 = vcmp.eq.f32.partialorder %v1965_v33, 8.507059e+37 }
0x272e   :  { %v2298_v26 = vpop.eup %2297 }
0x272f   :  { %v1957_v27 = vmul.f32 %v2298_v26, %v1955_v3  ;;  %vm1962_vm3 = vweird.f32 %v2298_v26 }
0x2730   :  { %vm1963_vm6 = vmor %vm1961_vm5, %vm1962_vm3 }
0x2731   :  { %v1958_v55 = vsub.f32 1.0, %v1957_v27 }
0x2733   :  { %v1959_v56 = vmul.f32 %v2298_v26, %v1958_v55 }
0x2735   :  { %v1960_v44 = vadd.f32 %v2298_v26, %v1959_v56 }
0x2737   :  { %v1964_v47 = vsel %vm1963_vm6, %v2298_v26, %v1960_v44 }
0x2738   :  { %v1969_v62 = vsel %vm1966_vm4, %v1968_v58, %v1964_v47 }
0x2739   :  { %v1984_v12 = vsub.f32 1.0, %v1969_v62  ;;  %v1992_v15 = vmul.f32 %v1990_v57, %v1969_v62 }
0x278f   :  { %v1975_v59 = vpop.permute.xlu1 %1974 }
0x2790   :  { %v1977_v63 = vmul.f32 %v1975_v59, %v1969_v62 }
0x2792   :  { %1979 = vrot.lane.b32.xlu2 %v1977_v63, %s2487_s6  ;;  %s2069_s6 = sshll.u32 %s2490_s0, 4  ;;  %s2070_s6 = int_to_ptr.vmem [resolvable:$true] %s2069_s6 }
0x27ec   :  { %v1980_v1 = vpop.permute.xlu2 %1979 }
0x27ed   :  { %v1982_v2 = vadd.f32 %v1980_v1, %v3005_v18 }
0x27ef   :  { %2299 = vtanh.f32 %v1982_v2 }
0x27f5   :  { %v2300_v5 = vpop.eup %2299 }
0x27f6   :  { %1986 = vrot.lane.b32.xlu0 %v2300_v5, %s2489_s3 }
0x2868   :  { %v1987_v13 = vpop.permute.xlu0 %1986 }
0x2869   :  { %v1989_v38 = vmul.f32 %v1987_v13, %v1984_v12 }
0x286b   :  { %v1993_v16 = vadd.f32 %v1992_v15, %v1989_v38 }
0x286d   :  { %v1994_v51 = vmax.f32 %v1993_v16, 0.0 }
0x286f   :  { %v2004_v18 = vrot.slane %v1994_v51, 6 }
0x2871   :  { %2005 = vrot.lane.b32.xlu1 %v2004_v18, %s2489_s3 }
0x28e3   :  { %v2006_v17 = vpop.permute.xlu1 %2005 }
0x28e4   :  { %2135 = vmatmul.msk.f32.vlgmr.msra.gmra.mxu2 %vm166_vm0, %v2006_v17 }
0x2967   :  { %v2026_v60 = vpop.f32.mrf.mxu2 }
0x2968   :  { %v2027_v22 = vadd.f32 %v2155_v20, %v2026_v60 }
0x296a   :  { %v2029_v52 = vmax.f32 %v2027_v22, 0.0 }
0x296c   :  { %2136 = vmatmul.msk.f32.vlgmr.msrb.gmra.mxu3 %vm166_vm0, %v2029_v52 }
0x29ef   :  { %v2058_v53 = vpop.f32.mrf.mxu3 }
0x29f0   :  { %v2059_v28 = vadd.f32 %v2156_v40, %v2058_v53 }
0x29f2   :  { %v2061_v29 = vmax.f32 %v2059_v28, 0.0 }
0x29f4   :  { %2063 = vst.msk [vmem:[#allocation13] sm:$0x3] %vm2062_vm7, %v2061_v29 }
0x29f5   :  { %2074 = dma.vmem_to_hbm [thread:$0]  %s2070_s6, 32, %s2072_s15, [#allocation4]  }
0x29f6   :  { %2477 = dma.done.wait [#allocation4], 32  }
0x29f7   :  { %2478 = vsyncadd [#allocation4], 4294967264 }
0x29f8   :  { %2079 = vsyncpa [#allocation3], 1 }
0x29f9   :  { %2080 = vsyncpa [#allocation6], 1 }
0x29fa   :  { %2081 = vsyncpa [#allocation9], 1 }
0x29fb   :  { %2082 = vsyncpa [#allocation12], 1 }
0x29fc   :  { %2083 = vsyncpa [#allocation4], 1 }

</bundles_post_ra>
